<compile_context>
chip_gen: v6e
topology: v6e:2x2x1
jax: 0.10.0
libtpu: 0.0.40
codegen_flags: <defaults>
</compile_context>

<pallas_src>
import jax
import jax.numpy as jnp
from jax.experimental import pallas as pl
from jax.experimental.pallas import tpu as pltpu


OUT_PAD = 128  # lane-dense padded width for the 10-wide classifier output


def mlp_kernel(x_ref, w1_ref, w2_ref, w3_ref, o_ref):
    # Fused 3-layer MLP tile: bf16 operands on the MXU, f32 accumulation, ReLU on the VPU.
    # Dropout is identity (eval-mode semantics).
    # TODO(synk): training-mode dropout (random mask + 1/(1-p) scaling) not implemented.
    x = x_ref[...].astype(jnp.bfloat16)
    h1 = jnp.dot(x, w1_ref[...], preferred_element_type=jnp.float32)
    h1 = jnp.maximum(h1, 0.0).astype(jnp.bfloat16)          # ReLU (+ dropout = identity)
    h2 = jnp.dot(h1, w2_ref[...], preferred_element_type=jnp.float32)
    h2 = jnp.maximum(h2, 0.0).astype(jnp.bfloat16)          # ReLU (+ dropout = identity)
    o_ref[...] = jnp.dot(h2, w3_ref[...],
                         preferred_element_type=jnp.float32).astype(o_ref.dtype)


def mlp_forward(x, w1, w2, w3, *, block_m=256):
    """x: [B, 512] f32; w1: [512,1024], w2: [1024,1024], w3: [1024,10] (stored [in, out])."""
    B, d_in = x.shape
    d_h1 = w1.shape[1]
    d_h2 = w2.shape[1]
    out_dim = w3.shape[1]

    # bf16 weights: halves HBM weight traffic on this DMA-bound kernel.
    w1b = w1.astype(jnp.bfloat16)
    w2b = w2.astype(jnp.bfloat16)
    # Zero-pad W3's output dim 10 -> 128 for a lane-dense final matmul + store.
    w3b = jnp.pad(w3.astype(jnp.bfloat16), ((0, 0), (0, OUT_PAD - out_dim)))

    # Batch tile: multiple of 8 sublanes, capped at block_m so large batches get a
    # parallel grid (megacore sharding on v7x + pipelined activation DMA).
    bm = min(block_m, max(8, ((B + 7) // 8) * 8))
    B_pad = ((B + bm - 1) // bm) * bm
    if B_pad != B:
        x = jnp.pad(x, ((0, B_pad - B), (0, 0)))

    grid = (B_pad // bm,)

    flops = 2 * B_pad * (d_in * d_h1 + d_h1 * d_h2 + d_h2 * OUT_PAD)
    bytes_accessed = ((w1b.size + w2b.size + w3b.size) * 2   # bf16 weights
                      + x.size * 4 + B_pad * OUT_PAD * 4)    # f32 activations

    out = pl.pallas_call(
        mlp_kernel,
        out_shape=jax.ShapeDtypeStruct((B_pad, OUT_PAD), jnp.float32),
        grid_spec=pltpu.PrefetchScalarGridSpec(
            num_scalar_prefetch=0,
            grid=grid,
            in_specs=[
                pl.BlockSpec((bm, d_in), lambda i: (i, 0)),      # activation tile
                pl.BlockSpec((d_in, d_h1), lambda i: (0, 0)),    # resident weight (DMA once)
                pl.BlockSpec((d_h1, d_h2), lambda i: (0, 0)),    # resident weight (DMA once)
                pl.BlockSpec((d_h2, OUT_PAD), lambda i: (0, 0)), # resident weight (DMA once)
            ],
            out_specs=pl.BlockSpec((bm, OUT_PAD), lambda i: (i, 0)),
        ),
        compiler_params=pltpu.CompilerParams(
            dimension_semantics=("parallel",),
            # ~3.3 MiB bf16 weights + small activation tiles (double-buffered):
            # 24 MiB leaves headroom even on v7x's 64 MiB physical VMEM.
            vmem_limit_bytes=24 << 20,
        ),
        cost_estimate=pl.CostEstimate(
            flops=flops, transcendentals=0, bytes_accessed=bytes_accessed),
    )(x, w1b, w2b, w3b)

    return out[:B, :out_dim]


def init_params(key):
    # Deterministic init mimicking PyTorch's kaiming-uniform bound U(-1/sqrt(in), 1/sqrt(in)).
    k1, k2, k3 = jax.random.split(key, 3)

    def lin(k, fan_in, fan_out):
        bound = 1.0 / jnp.sqrt(fan_in)
        # stored as [in, out] so the kernel computes x @ W (== x @ W_pt.T)
        return jax.random.uniform(k, (fan_in, fan_out), jnp.float32, -bound, bound)

    w1 = lin(k1, 512, 1024)
    w2 = lin(k2, 1024, 1024)
    w3 = lin(k3, 1024, 10)
    return w1, w2, w3


if __name__ == "__main__":
    key = jax.random.PRNGKey(0)
    kx, kp = jax.random.split(key)

    B = 8  # small batch
    x = jax.random.normal(kx, (B, 512), dtype=jnp.float32)
    w1, w2, w3 = init_params(kp)

    out = mlp_forward(x, w1, w2, w3)
    out = jax.block_until_ready(out)
    assert out.shape == (B, 10)

    # Reference with matching numerics (bf16 weights/activation inputs, f32 accumulation).
    w1b = w1.astype(jnp.bfloat16)
    w2b = w2.astype(jnp.bfloat16)
    w3b = w3.astype(jnp.bfloat16)
    h1 = jnp.maximum(jnp.dot(x.astype(jnp.bfloat16), w1b,
                             preferred_element_type=jnp.float32), 0.0)
    h2 = jnp.maximum(jnp.dot(h1.astype(jnp.bfloat16), w2b,
                             preferred_element_type=jnp.float32), 0.0)
    ref = jnp.dot(h2.astype(jnp.bfloat16), w3b, preferred_element_type=jnp.float32)

    assert jnp.allclose(out, ref, atol=2e-2, rtol=2e-2)

    print("KERNEL_OK")
</pallas_src>

<mosaic_0001>
module attributes {stable_mosaic.version = 11 : i64} {
  func.func @mlp_kernel(%arg0: i32, %arg1: memref<8x512xf32, #tpu.memory_space<vmem>>, %arg2: memref<512x1024xbf16, #tpu.memory_space<vmem>>, %arg3: memref<1024x1024xbf16, #tpu.memory_space<vmem>>, %arg4: memref<1024x128xbf16, #tpu.memory_space<vmem>>, %arg5: memref<8x128xf32, #tpu.memory_space<vmem>>) attributes {dimension_semantics = [#tpu.dimension_semantics<parallel>], iteration_bounds = array<i64: 1>, scalar_prefetch = 0 : i64, scratch_operands = 0 : i64, tpu.core_type = #tpu.core_type<tc>, window_params = [{transform_indices = @transform_0, window_bounds = array<i64: 8, 512>}, {pipeline_mode = #tpu.pipeline_mode<synchronous>, transform_indices = @transform_1, window_bounds = array<i64: 512, 1024>}, {pipeline_mode = #tpu.pipeline_mode<synchronous>, transform_indices = @transform_2, window_bounds = array<i64: 1024, 1024>}, {pipeline_mode = #tpu.pipeline_mode<synchronous>, transform_indices = @transform_3, window_bounds = array<i64: 1024, 128>}, {transform_indices = @transform_4, window_bounds = array<i64: 8, 128>}]} {
    %c0 = arith.constant 0 : index
    %c0_0 = arith.constant 0 : index
    %0 = vector.load %arg1[%c0, %c0_0] : memref<8x512xf32, #tpu.memory_space<vmem>>, vector<8x512xf32>
    %1 = arith.truncf %0 : vector<8x512xf32> to vector<8x512xbf16>
    %c0_1 = arith.constant 0 : index
    %c0_2 = arith.constant 0 : index
    %2 = vector.load %arg2[%c0_1, %c0_2] : memref<512x1024xbf16, #tpu.memory_space<vmem>>, vector<512x1024xbf16>
    %cst = arith.constant dense<0.000000e+00> : vector<8x1024xf32>
    %3 = tpu.matmul %1, %2, %cst {dimension_numbers = #tpu.dot_dimension_numbers<[1], [0], [0], [1], [0, 0, 1, 1], [], []>} : vector<8x512xbf16>, vector<512x1024xbf16>, vector<8x1024xf32> -> vector<8x1024xf32>
    %cst_3 = arith.constant 0.000000e+00 : f32
    %4 = vector.broadcast %cst_3 : f32 to vector<8x1024xf32>
    %5 = arith.maximumf %3, %4 : vector<8x1024xf32>
    %6 = arith.truncf %5 : vector<8x1024xf32> to vector<8x1024xbf16>
    %c0_4 = arith.constant 0 : index
    %c0_5 = arith.constant 0 : index
    %7 = vector.load %arg3[%c0_4, %c0_5] : memref<1024x1024xbf16, #tpu.memory_space<vmem>>, vector<1024x1024xbf16>
    %cst_6 = arith.constant dense<0.000000e+00> : vector<8x1024xf32>
    %8 = tpu.matmul %6, %7, %cst_6 {dimension_numbers = #tpu.dot_dimension_numbers<[1], [0], [0], [1], [0, 0, 1, 1], [], []>} : vector<8x1024xbf16>, vector<1024x1024xbf16>, vector<8x1024xf32> -> vector<8x1024xf32>
    %cst_7 = arith.constant 0.000000e+00 : f32
    %9 = vector.broadcast %cst_7 : f32 to vector<8x1024xf32>
    %10 = arith.maximumf %8, %9 : vector<8x1024xf32>
    %11 = arith.truncf %10 : vector<8x1024xf32> to vector<8x1024xbf16>
    %c0_8 = arith.constant 0 : index
    %c0_9 = arith.constant 0 : index
    %12 = vector.load %arg4[%c0_8, %c0_9] : memref<1024x128xbf16, #tpu.memory_space<vmem>>, vector<1024x128xbf16>
    %cst_10 = arith.constant dense<0.000000e+00> : vector<8x128xf32>
    %13 = tpu.matmul %11, %12, %cst_10 {dimension_numbers = #tpu.dot_dimension_numbers<[1], [0], [0], [1], [0, 0, 1, 1], [], []>} : vector<8x1024xbf16>, vector<1024x128xbf16>, vector<8x128xf32> -> vector<8x128xf32>
    %c0_11 = arith.constant 0 : index
    %c0_12 = arith.constant 0 : index
    %14 = vector.load %arg5[%c0_11, %c0_12] : memref<8x128xf32, #tpu.memory_space<vmem>>, vector<8x128xf32>
    tpu.vector_store %arg5[%c0_11, %c0_12], %13 {strides = array<i32>} : memref<8x128xf32, #tpu.memory_space<vmem>>, vector<8x128xf32>,
    return
  }
  func.func @transform_0(%arg0: i32) -> (i32, i32) {
    %c0_i32 = arith.constant 0 : i32
    %c0_i32_0 = arith.constant 0 : i32
    return %arg0, %c0_i32 : i32, i32
  }
  func.func @transform_1(%arg0: i32) -> (i32, i32) {
    %c0_i32 = arith.constant 0 : i32
    %c0_i32_0 = arith.constant 0 : i32
    %c0_i32_1 = arith.constant 0 : i32
    return %c0_i32, %c0_i32_0 : i32, i32
  }
  func.func @transform_2(%arg0: i32) -> (i32, i32) {
    %c0_i32 = arith.constant 0 : i32
    %c0_i32_0 = arith.constant 0 : i32
    %c0_i32_1 = arith.constant 0 : i32
    return %c0_i32, %c0_i32_0 : i32, i32
  }
  func.func @transform_3(%arg0: i32) -> (i32, i32) {
    %c0_i32 = arith.constant 0 : i32
    %c0_i32_0 = arith.constant 0 : i32
    %c0_i32_1 = arith.constant 0 : i32
    return %c0_i32, %c0_i32_0 : i32, i32
  }
  func.func @transform_4(%arg0: i32) -> (i32, i32) {
    %c0_i32 = arith.constant 0 : i32
    %c0_i32_0 = arith.constant 0 : i32
    return %arg0, %c0_i32 : i32, i32
  }
}

</mosaic_0001>

<bundles_post_ra>
// kernel: tpu_custom_call.1
= control target key start
LH: loop header
LB: loop body
LE: loop exit
PB: predicated region body
PF: predicated region fallthrough
CT: control target
= control target key end

     0   :  { %9 = vsyncpa [#allocation3], 0  ;;  %s7683_s0 = inlined_call_operand.hbm [shape: f32[8,512], index: 0, kind: input, shape index: {}]   ;;  %s7684_s1 = inlined_call_operand.hbm [shape: bf16[512,1024], index: 1, kind: input, shape index: {}]   ;;  %s7685_s2 = inlined_call_operand.hbm [shape: bf16[1024,1024], index: 2, kind: input, shape index: {}]   ;;  %s7686_s3 = inlined_call_operand.hbm [shape: bf16[1024,128], index: 3, kind: input, shape index: {}]   ;;  %s7687_s4 = inlined_call_operand.hbm [shape: f32[8,128], index: 4, kind: output, shape index: {}]  }
   0x1   :  { %10 = vsyncpa [#allocation6], 0 }
   0x2   :  { %11 = vsyncpa [#allocation9], 0 }
   0x3   :  { %12 = vsyncpa [#allocation4], 0  ;;  %s7495_s15 = smov [#allocation5]  }
   0x4   :  { %s28_s16 = sshll.u32 %s7495_s15, 4  ;;  %s29_s16 = int_to_ptr.vmem [resolvable:$true] %s28_s16 }
   0x5   :  { %s7395_s17 = scalar_lea.vmem %s29_s16, 32768  ;;  %p7400_p1 = scmp.lt.s32.totalorder %s29_s16, %s29_s16 }
   0x6   :  { %p7396_p0 = scmp.ne.s32.totalorder %s29_s16, %s7395_s17  ;;  %p7401_p2 = scmp.lt.s32.totalorder %s7395_s17, %s7395_s17 }
   0x8   :  { %p7402_p3 = por %p7401_p2, %p7400_p1 }
   0xa   :  { %p7403_p4 = pnand %p7402_p3, %p7396_p0 }
   0xc   :  { %7406 = shalt.err (!%p7403_p4)
}
   0xd   :  { %s7496_s18 = smov 512   ;;  %s7497_s19 = smov 32  }
   0xe   :  { %34 = dma.hbm_to_vmem [thread:$0]  %s7684_s1, 32768, %s29_s16, [#allocation6], %s7496_s18, %s7496_s18, %s7497_s19  }
   0xf   :  { %s7498_s22 = smov [#allocation2]   ;;  %s7499_s24 = smov [#allocation7]  }
  0x10   :  { %s19_s23 = sshll.u32 %s7498_s22, 4  ;;  %s40_s25 = sshll.u32 %s7499_s24, 4  ;;  %s20_s23 = int_to_ptr.vmem [resolvable:$true] %s19_s23  ;;  %s41_s25 = int_to_ptr.vmem [resolvable:$true] %s40_s25 }
  0x11   :  { %s7415_s26 = scalar_lea.vmem %s20_s23, 512  ;;  %p7420_p6 = scmp.lt.s32.totalorder %s20_s23, %s20_s23 }
  0x12   :  { %p7416_p5 = scmp.ne.s32.totalorder %s20_s23, %s7415_s26  ;;  %p7421_p7 = scmp.lt.s32.totalorder %s7415_s26, %s7415_s26 }
  0x14   :  { %p7422_p8 = por %p7421_p7, %p7420_p6 }
  0x16   :  { %p7423_p9 = pnand %p7422_p8, %p7416_p5 }
  0x18   :  { %7426 = shalt.err (!%p7423_p9)
}
  0x19   :  { %22 = dma.hbm_to_vmem [thread:$0]  %s7683_s0, 512, %s20_s23, [#allocation3]  }
  0x1a   :  { %s7435_s29 = scalar_lea.vmem %s41_s25, 65536  ;;  %p7440_p11 = scmp.lt.s32.totalorder %s41_s25, %s41_s25 }
  0x1b   :  { %p7436_p10 = scmp.ne.s32.totalorder %s41_s25, %s7435_s29  ;;  %p7441_p12 = scmp.lt.s32.totalorder %s7435_s29, %s7435_s29 }
  0x1d   :  { %p7442_p13 = por %p7441_p12, %p7440_p11 }
  0x1f   :  { %p7443_p0 = pnand %p7442_p13, %p7436_p10 }
  0x21   :  { %7446 = shalt.err (!%p7443_p0)
}
  0x22   :  { %46 = dma.hbm_to_vmem [thread:$0]  %s7685_s2, 65536, %s41_s25, [#allocation6], %s7496_s18, %s7496_s18, %s7497_s19  }
  0x23   :  { %s7500_s5 = smov [#allocation8]  }
  0x24   :  { %s52_s6 = sshll.u32 %s7500_s5, 4  ;;  %s53_s6 = int_to_ptr.vmem [resolvable:$true] %s52_s6 }
  0x25   :  { %s7455_s7 = scalar_lea.vmem %s53_s6, 8192  ;;  %p7460_p2 = scmp.lt.s32.totalorder %s53_s6, %s53_s6 }
  0x26   :  { %p7456_p1 = scmp.ne.s32.totalorder %s53_s6, %s7455_s7  ;;  %p7461_p3 = scmp.lt.s32.totalorder %s7455_s7, %s7455_s7 }
  0x28   :  { %p7462_p4 = por %p7461_p3, %p7460_p2 }
  0x2a   :  { %p7463_p5 = pnand %p7462_p4, %p7456_p1 }
  0x2c   :  { %7466 = shalt.err (!%p7463_p5)
}
  0x2d   :  { %s7501_s0 = smov 64   ;;  %s7502_s8 = smov 4  }
  0x2e   :  { %58 = dma.hbm_to_vmem [thread:$0]  %s7686_s3, 8192, %s53_s6, [#allocation9], %s7501_s0, %s7501_s0, %s7502_s8  }
  0x2f   :  { %7487 = dma.done.wait [#allocation3], 512  }
  0x30   :  { %7488 = vsyncadd [#allocation3], 4294966784 }
  0x31   :  { %7489 = dma.done.wait [#allocation6], 98304  }
  0x32   :  { %7490 = vsyncadd [#allocation6], 4294868992 }
  0x33   :  { %7491 = dma.done.wait [#allocation9], 8192  }
  0x34   :  { %7492 = vsyncadd [#allocation9], 4294959104  ;;  %v136_v0 = vld [vmem:[#allocation5 + $0x1c0] sm:$0xff]  ;;  %v73_v53 = vld [vmem:[#allocation2 + $0x8] sm:$0xff]  ;;  %s7503_s2 = smov [#allocation10]  }
  0x35   :  { %v140_v1 = vld [vmem:[#allocation5 + $0x1e0] sm:$0xff]  ;;  %v75_v54 = vld [vmem:[#allocation2 + $0x18] sm:$0xff]  ;;  %v7541_v58 = vpack.c.bf16 %v73_v53, %v73_v53  ;;  %s6383_s3 = sshll.u32 %s7503_s2, 4  ;;  %s6384_s3 = int_to_ptr.vmem [resolvable:$true] %s6383_s3 }
  0x36   :  { %v264_v2 = vld [vmem:[#allocation5 + $0x5c0] sm:$0xff]  ;;  %v6451_v3 = vcombine.high %v136_v0, %v140_v1  ;;  %v6450_v5 = vcombine.low %v136_v0, %v140_v1  ;;  %v7543_v59 = vpack.c.bf16 %v75_v54, %v75_v54  ;;  %s7467_s11 = scalar_lea.vmem %s6384_s3, 128  ;;  %p7472_p7 = scmp.lt.s32.totalorder %s6384_s3, %s6384_s3 }
  0x37   :  { %v268_v4 = vld [vmem:[#allocation5 + $0x5e0] sm:$0xff]  ;;  %1648 = vmatprep.mubr.bf16.mxu0 %v7541_v58  ;;  %p7468_p6 = scmp.ne.s32.totalorder %s6384_s3, %s7467_s11  ;;  %p7473_p8 = scmp.lt.s32.totalorder %s7467_s11, %s7467_s11 }
  0x38   :  { %v128_v6 = vld [vmem:[#allocation5 + $0x180] sm:$0xff]  ;;  %v6579_v8 = vcombine.high %v264_v2, %v268_v4  ;;  %v6578_v9 = vcombine.low %v264_v2, %v268_v4  ;;  %1616 = vmatprep.subr.bf16.mxu0 %v6451_v3  ;;  %1689 = vmatprep.mubr.bf16.mxu1 %v7543_v59 }
  0x39   :  { %v132_v7 = vld [vmem:[#allocation5 + $0x1a0] sm:$0xff]  ;;  %1617 = vmatpush1.bf16.msra.mxu0 %v6450_v5  ;;  %p7474_p9 = por %p7473_p8, %p7472_p7 }
  0x3a   :  { %v6443_v10 = vcombine.high %v128_v6, %v132_v7  ;;  %v256_v11 = vld [vmem:[#allocation5 + $0x580] sm:$0xff]  ;;  %1657 = vmatprep.subr.bf16.mxu1 %v6579_v8  ;;  %v6442_v18 = vcombine.low %v128_v6, %v132_v7 }
  0x3b   :  { %v260_v12 = vld [vmem:[#allocation5 + $0x5a0] sm:$0xff]  ;;  %1658 = vmatpush1.bf16.msra.mxu1 %v6578_v9  ;;  %p7475_p10 = pnand %p7474_p9, %p7468_p6 }
  0x3c   :  { %v120_v13 = vld [vmem:[#allocation5 + $0x140] sm:$0xff]  ;;  %v6571_v14 = vcombine.high %v256_v11, %v260_v12  ;;  %1618 = vmatprep.subr.bf16.mxu0 %v6443_v10  ;;  %v6570_v19 = vcombine.low %v256_v11, %v260_v12 }
  0x3d   :  { %v124_v15 = vld [vmem:[#allocation5 + $0x160] sm:$0xff]  ;;  %1619 = vmatpush1.bf16.msra.mxu0 %v6442_v18 }
  0x3e   :  { %v248_v16 = vld [vmem:[#allocation5 + $0x540] sm:$0xff]  ;;  %v6435_v20 = vcombine.high %v120_v13, %v124_v15  ;;  %1659 = vmatprep.subr.bf16.mxu1 %v6571_v14  ;;  %v6434_v26 = vcombine.low %v120_v13, %v124_v15 }
  0x3f   :  { %v252_v17 = vld [vmem:[#allocation5 + $0x560] sm:$0xff]  ;;  %1660 = vmatpush1.bf16.msra.mxu1 %v6570_v19 }
  0x40   :  { %v6563_v21 = vcombine.high %v248_v16, %v252_v17  ;;  %v112_v22 = vld [vmem:[#allocation5 + $0x100] sm:$0xff]  ;;  %1620 = vmatprep.subr.bf16.mxu0 %v6435_v20  ;;  %v6562_v27 = vcombine.low %v248_v16, %v252_v17 }
  0x41   :  { %v116_v23 = vld [vmem:[#allocation5 + $0x120] sm:$0xff]  ;;  %1621 = vmatpush1.bf16.msra.mxu0 %v6434_v26 }
  0x42   :  { %v240_v24 = vld [vmem:[#allocation5 + $0x500] sm:$0xff]  ;;  %v6427_v28 = vcombine.high %v112_v22, %v116_v23  ;;  %1661 = vmatprep.subr.bf16.mxu1 %v6563_v21  ;;  %v6426_v34 = vcombine.low %v112_v22, %v116_v23 }
  0x43   :  { %v244_v25 = vld [vmem:[#allocation5 + $0x520] sm:$0xff]  ;;  %1662 = vmatpush1.bf16.msra.mxu1 %v6562_v27 }
  0x44   :  { %v6555_v29 = vcombine.high %v240_v24, %v244_v25  ;;  %v104_v30 = vld [vmem:[#allocation5 + $0xc0] sm:$0xff]  ;;  %1622 = vmatprep.subr.bf16.mxu0 %v6427_v28  ;;  %v6554_v35 = vcombine.low %v240_v24, %v244_v25 }
  0x45   :  { %v108_v31 = vld [vmem:[#allocation5 + $0xe0] sm:$0xff]  ;;  %1623 = vmatpush1.bf16.msra.mxu0 %v6426_v34 }
  0x46   :  { %v232_v32 = vld [vmem:[#allocation5 + $0x4c0] sm:$0xff]  ;;  %v6419_v36 = vcombine.high %v104_v30, %v108_v31  ;;  %1663 = vmatprep.subr.bf16.mxu1 %v6555_v29  ;;  %v6418_v42 = vcombine.low %v104_v30, %v108_v31 }
  0x47   :  { %v236_v33 = vld [vmem:[#allocation5 + $0x4e0] sm:$0xff]  ;;  %1664 = vmatpush1.bf16.msra.mxu1 %v6554_v35 }
  0x48   :  { %v6547_v37 = vcombine.high %v232_v32, %v236_v33  ;;  %v96_v38 = vld [vmem:[#allocation5 + $0x80] sm:$0xff]  ;;  %1624 = vmatprep.subr.bf16.mxu0 %v6419_v36  ;;  %v6546_v43 = vcombine.low %v232_v32, %v236_v33 }
  0x49   :  { %v100_v39 = vld [vmem:[#allocation5 + $0xa0] sm:$0xff]  ;;  %1625 = vmatpush1.bf16.msra.mxu0 %v6418_v42 }
  0x4a   :  { %v224_v40 = vld [vmem:[#allocation5 + $0x480] sm:$0xff]  ;;  %v6411_v44 = vcombine.high %v96_v38, %v100_v39  ;;  %1665 = vmatprep.subr.bf16.mxu1 %v6547_v37  ;;  %v6410_v50 = vcombine.low %v96_v38, %v100_v39 }
  0x4b   :  { %v228_v41 = vld [vmem:[#allocation5 + $0x4a0] sm:$0xff]  ;;  %1666 = vmatpush1.bf16.msra.mxu1 %v6546_v43 }
  0x4c   :  { %v6539_v45 = vcombine.high %v224_v40, %v228_v41  ;;  %v88_v46 = vld [vmem:[#allocation5 + $0x40] sm:$0xff]  ;;  %1626 = vmatprep.subr.bf16.mxu0 %v6411_v44  ;;  %v6538_v51 = vcombine.low %v224_v40, %v228_v41 }
  0x4d   :  { %v92_v47 = vld [vmem:[#allocation5 + $0x60] sm:$0xff]  ;;  %1627 = vmatpush1.bf16.msra.mxu0 %v6410_v50 }
  0x4e   :  { %v216_v48 = vld [vmem:[#allocation5 + $0x440] sm:$0xff]  ;;  %v6403_v52 = vcombine.high %v88_v46, %v92_v47  ;;  %1667 = vmatprep.subr.bf16.mxu1 %v6539_v45  ;;  %v6402_v62 = vcombine.low %v88_v46, %v92_v47 }
  0x4f   :  { %v220_v49 = vld [vmem:[#allocation5 + $0x460] sm:$0xff]  ;;  %1668 = vmatpush1.bf16.msra.mxu1 %v6538_v51 }
  0x50   :  { %v6531_v55 = vcombine.high %v216_v48, %v220_v49  ;;  %v80_v56 = vld [vmem:[#allocation5] sm:$0xff]  ;;  %1628 = vmatprep.subr.bf16.mxu0 %v6403_v52  ;;  %v6530_v63 = vcombine.low %v216_v48, %v220_v49 }
  0x51   :  { %v84_v57 = vld [vmem:[#allocation5 + $0x20] sm:$0xff]  ;;  %1629 = vmatpush1.bf16.msra.mxu0 %v6402_v62 }
  0x52   :  { %v208_v60 = vld [vmem:[#allocation5 + $0x400] sm:$0xff]  ;;  %v6395_v0 = vcombine.high %v80_v56, %v84_v57  ;;  %1669 = vmatprep.subr.bf16.mxu1 %v6531_v55  ;;  %v6394_v6 = vcombine.low %v80_v56, %v84_v57 }
  0x53   :  { %v212_v61 = vld [vmem:[#allocation5 + $0x420] sm:$0xff]  ;;  %1670 = vmatpush1.bf16.msra.mxu1 %v6530_v63 }
  0x54   :  { %v6523_v1 = vcombine.high %v208_v60, %v212_v61  ;;  %v200_v2 = vld [vmem:[#allocation5 + $0x3c0] sm:$0xff]  ;;  %1630 = vmatprep.subr.bf16.mxu0 %v6395_v0  ;;  %v6522_v7 = vcombine.low %v208_v60, %v212_v61 }
  0x55   :  { %v204_v3 = vld [vmem:[#allocation5 + $0x3e0] sm:$0xff]  ;;  %1631 = vmatpush1.bf16.msra.mxu0 %v6394_v6  ;;  %v265_v6 = vld [vmem:[#allocation5 + $0x5c8] sm:$0xff] }
  0x56   :  { %v328_v4 = vld [vmem:[#allocation5 + $0x7c0] sm:$0xff]  ;;  %v6515_v8 = vcombine.high %v200_v2, %v204_v3  ;;  %1671 = vmatprep.subr.bf16.mxu1 %v6523_v1  ;;  %v6514_v14 = vcombine.low %v200_v2, %v204_v3 }
  0x57   :  { %v332_v5 = vld [vmem:[#allocation5 + $0x7e0] sm:$0xff]  ;;  %1672 = vmatpush1.bf16.msra.mxu1 %v6522_v7  ;;  %v269_v7 = vld [vmem:[#allocation5 + $0x5e8] sm:$0xff] }
  0x58   :  { %v6643_v9 = vcombine.high %v328_v4, %v332_v5  ;;  %v192_v10 = vld [vmem:[#allocation5 + $0x380] sm:$0xff]  ;;  %1632 = vmatprep.subr.bf16.mxu0 %v6515_v8  ;;  %v6642_v15 = vcombine.low %v328_v4, %v332_v5  ;;  %v137_v4 = vld [vmem:[#allocation5 + $0x1c8] sm:$0xff] }
  0x59   :  { %v196_v11 = vld [vmem:[#allocation5 + $0x3a0] sm:$0xff]  ;;  %1633 = vmatpush2.bf16.msra.mxu0 %v6514_v14  ;;  %v141_v5 = vld [vmem:[#allocation5 + $0x1e8] sm:$0xff] }
  0x5a   :  { %v320_v12 = vld [vmem:[#allocation5 + $0x780] sm:$0xff]  ;;  %v6507_v16 = vcombine.high %v192_v10, %v196_v11  ;;  %1673 = vmatprep.subr.bf16.mxu1 %v6643_v9  ;;  %v6506_v22 = vcombine.low %v192_v10, %v196_v11  ;;  %v74_v11 = vld [vmem:[#allocation2 + $0x10] sm:$0xff]  ;;  %v129_v14 = vld [vmem:[#allocation5 + $0x188] sm:$0xff] }
  0x5b   :  { %v324_v13 = vld [vmem:[#allocation5 + $0x7a0] sm:$0xff]  ;;  %1674 = vmatpush2.bf16.msra.mxu1 %v6642_v15  ;;  %v133_v15 = vld [vmem:[#allocation5 + $0x1a8] sm:$0xff] }
  0x5c   :  { %v6635_v17 = vcombine.high %v320_v12, %v324_v13  ;;  %v184_v18 = vld [vmem:[#allocation5 + $0x340] sm:$0xff]  ;;  %1634 = vmatprep.subr.bf16.mxu0 %v6507_v16  ;;  %v6634_v23 = vcombine.low %v320_v12, %v324_v13  ;;  %v6453_v12 = vcombine.high %v137_v4, %v141_v5  ;;  %v6581_v13 = vcombine.high %v265_v6, %v269_v7 }
  0x5d   :  { %v188_v19 = vld [vmem:[#allocation5 + $0x360] sm:$0xff]  ;;  %1635 = vmatpush2.bf16.msra.mxu0 %v6506_v22  ;;  %v6445_v22 = vcombine.high %v129_v14, %v133_v15 }
  0x5e   :  { %v312_v20 = vld [vmem:[#allocation5 + $0x740] sm:$0xff]  ;;  %v6499_v24 = vcombine.high %v184_v18, %v188_v19  ;;  %1675 = vmatprep.subr.bf16.mxu1 %v6635_v17  ;;  %v6498_v30 = vcombine.low %v184_v18, %v188_v19  ;;  %v257_v17 = vld [vmem:[#allocation5 + $0x588] sm:$0xff]  ;;  %v7549_v19 = vpack.c.bf16 %v74_v11, %v74_v11 }
  0x5f   :  { %v316_v21 = vld [vmem:[#allocation5 + $0x760] sm:$0xff]  ;;  %1676 = vmatpush2.bf16.msra.mxu1 %v6634_v23  ;;  %v261_v18 = vld [vmem:[#allocation5 + $0x5a8] sm:$0xff] }
  0x60   :  { %v6627_v25 = vcombine.high %v312_v20, %v316_v21  ;;  %v176_v26 = vld [vmem:[#allocation5 + $0x300] sm:$0xff]  ;;  %1636 = vmatprep.subr.bf16.mxu0 %v6499_v24  ;;  %v6626_v31 = vcombine.low %v312_v20, %v316_v21  ;;  %v6452_v20 = vcombine.low %v137_v4, %v141_v5  ;;  %v6580_v21 = vcombine.low %v265_v6, %v269_v7  ;;  %v121_v23 = vld [vmem:[#allocation5 + $0x148] sm:$0xff] }
  0x61   :  { %v180_v27 = vld [vmem:[#allocation5 + $0x320] sm:$0xff]  ;;  %1637 = vmatpush2.bf16.msra.mxu0 %v6498_v30  ;;  %v125_v24 = vld [vmem:[#allocation5 + $0x168] sm:$0xff] }
  0x62   :  { %v304_v28 = vld [vmem:[#allocation5 + $0x700] sm:$0xff]  ;;  %v6491_v32 = vcombine.high %v176_v26, %v180_v27  ;;  %1677 = vmatprep.subr.bf16.mxu1 %v6627_v25  ;;  %v6490_v38 = vcombine.low %v176_v26, %v180_v27  ;;  %v6573_v25 = vcombine.high %v257_v17, %v261_v18  ;;  %v249_v26 = vld [vmem:[#allocation5 + $0x548] sm:$0xff]  ;;  %v6437_v30 = vcombine.high %v121_v23, %v125_v24 }
  0x63   :  { %v308_v29 = vld [vmem:[#allocation5 + $0x720] sm:$0xff]  ;;  %1678 = vmatpush2.bf16.msra.mxu1 %v6626_v31  ;;  %v253_v27 = vld [vmem:[#allocation5 + $0x568] sm:$0xff] }
  0x64   :  { %v6619_v33 = vcombine.high %v304_v28, %v308_v29  ;;  %v168_v34 = vld [vmem:[#allocation5 + $0x2c0] sm:$0xff]  ;;  %1638 = vmatprep.subr.bf16.mxu0 %v6491_v32  ;;  %v6618_v39 = vcombine.low %v304_v28, %v308_v29  ;;  %v6444_v28 = vcombine.low %v129_v14, %v133_v15  ;;  %v6572_v29 = vcombine.low %v257_v17, %v261_v18  ;;  %v113_v31 = vld [vmem:[#allocation5 + $0x108] sm:$0xff] }
  0x65   :  { %v172_v35 = vld [vmem:[#allocation5 + $0x2e0] sm:$0xff]  ;;  %1639 = vmatpush2.bf16.msra.mxu0 %v6490_v38  ;;  %v117_v32 = vld [vmem:[#allocation5 + $0x128] sm:$0xff] }
  0x66   :  { %v296_v36 = vld [vmem:[#allocation5 + $0x6c0] sm:$0xff]  ;;  %v6483_v40 = vcombine.high %v168_v34, %v172_v35  ;;  %1679 = vmatprep.subr.bf16.mxu1 %v6619_v33  ;;  %v6482_v46 = vcombine.low %v168_v34, %v172_v35  ;;  %v241_v33 = vld [vmem:[#allocation5 + $0x508] sm:$0xff]  ;;  %v6565_v34 = vcombine.high %v249_v26, %v253_v27  ;;  %v6429_v38 = vcombine.high %v113_v31, %v117_v32 }
  0x67   :  { %v300_v37 = vld [vmem:[#allocation5 + $0x6e0] sm:$0xff]  ;;  %1680 = vmatpush2.bf16.msra.mxu1 %v6618_v39  ;;  %v245_v35 = vld [vmem:[#allocation5 + $0x528] sm:$0xff] }
  0x68   :  { %v6611_v41 = vcombine.high %v296_v36, %v300_v37  ;;  %v160_v42 = vld [vmem:[#allocation5 + $0x280] sm:$0xff]  ;;  %1640 = vmatprep.subr.bf16.mxu0 %v6483_v40  ;;  %v6610_v47 = vcombine.low %v296_v36, %v300_v37  ;;  %v6436_v36 = vcombine.low %v121_v23, %v125_v24  ;;  %v6564_v37 = vcombine.low %v249_v26, %v253_v27  ;;  %v105_v39 = vld [vmem:[#allocation5 + $0xc8] sm:$0xff] }
  0x69   :  { %v164_v43 = vld [vmem:[#allocation5 + $0x2a0] sm:$0xff]  ;;  %1641 = vmatpush2.bf16.msra.mxu0 %v6482_v46  ;;  %v109_v40 = vld [vmem:[#allocation5 + $0xe8] sm:$0xff] }
  0x6a   :  { %v288_v44 = vld [vmem:[#allocation5 + $0x680] sm:$0xff]  ;;  %v6475_v48 = vcombine.high %v160_v42, %v164_v43  ;;  %1681 = vmatprep.subr.bf16.mxu1 %v6611_v41  ;;  %v6474_v54 = vcombine.low %v160_v42, %v164_v43  ;;  %v233_v41 = vld [vmem:[#allocation5 + $0x4c8] sm:$0xff]  ;;  %v6557_v42 = vcombine.high %v241_v33, %v245_v35  ;;  %v6421_v46 = vcombine.high %v105_v39, %v109_v40 }
  0x6b   :  { %v292_v45 = vld [vmem:[#allocation5 + $0x6a0] sm:$0xff]  ;;  %1682 = vmatpush2.bf16.msra.mxu1 %v6610_v47  ;;  %v237_v43 = vld [vmem:[#allocation5 + $0x4e8] sm:$0xff] }
  0x6c   :  { %v6603_v49 = vcombine.high %v288_v44, %v292_v45  ;;  %v152_v50 = vld [vmem:[#allocation5 + $0x240] sm:$0xff]  ;;  %1642 = vmatprep.subr.bf16.mxu0 %v6475_v48  ;;  %v6602_v55 = vcombine.low %v288_v44, %v292_v45  ;;  %v6428_v44 = vcombine.low %v113_v31, %v117_v32  ;;  %v6556_v45 = vcombine.low %v241_v33, %v245_v35  ;;  %v97_v47 = vld [vmem:[#allocation5 + $0x88] sm:$0xff] }
  0x6d   :  { %v156_v51 = vld [vmem:[#allocation5 + $0x260] sm:$0xff]  ;;  %1643 = vmatpush2.bf16.msra.mxu0 %v6474_v54  ;;  %v101_v48 = vld [vmem:[#allocation5 + $0xa8] sm:$0xff] }
  0x6e   :  { %v280_v52 = vld [vmem:[#allocation5 + $0x640] sm:$0xff]  ;;  %v6467_v56 = vcombine.high %v152_v50, %v156_v51  ;;  %1683 = vmatprep.subr.bf16.mxu1 %v6603_v49  ;;  %v6466_v0 = vcombine.low %v152_v50, %v156_v51  ;;  %v225_v49 = vld [vmem:[#allocation5 + $0x488] sm:$0xff]  ;;  %v6549_v50 = vcombine.high %v233_v41, %v237_v43  ;;  %v6413_v54 = vcombine.high %v97_v47, %v101_v48 }
  0x6f   :  { %v284_v53 = vld [vmem:[#allocation5 + $0x660] sm:$0xff]  ;;  %1684 = vmatpush2.bf16.msra.mxu1 %v6602_v55  ;;  %v229_v51 = vld [vmem:[#allocation5 + $0x4a8] sm:$0xff] }
  0x70   :  { %v6595_v57 = vcombine.high %v280_v52, %v284_v53  ;;  %v144_v60 = vld [vmem:[#allocation5 + $0x200] sm:$0xff]  ;;  %1644 = vmatprep.subr.bf16.mxu0 %v6467_v56  ;;  %v6594_v1 = vcombine.low %v280_v52, %v284_v53  ;;  %v6420_v52 = vcombine.low %v105_v39, %v109_v40  ;;  %v6548_v53 = vcombine.low %v233_v41, %v237_v43  ;;  %v89_v55 = vld [vmem:[#allocation5 + $0x48] sm:$0xff] }
  0x71   :  { %v148_v61 = vld [vmem:[#allocation5 + $0x220] sm:$0xff]  ;;  %1645 = vmatpush2.bf16.msra.mxu0 %v6466_v0  ;;  %v93_v56 = vld [vmem:[#allocation5 + $0x68] sm:$0xff] }
  0x72   :  { %v272_v62 = vld [vmem:[#allocation5 + $0x600] sm:$0xff]  ;;  %v6459_v2 = vcombine.high %v144_v60, %v148_v61  ;;  %1685 = vmatprep.subr.bf16.mxu1 %v6595_v57  ;;  %v6458_v8 = vcombine.low %v144_v60, %v148_v61  ;;  %v217_v57 = vld [vmem:[#allocation5 + $0x448] sm:$0xff]  ;;  %v6541_v60 = vcombine.high %v225_v49, %v229_v51  ;;  %v6405_v0 = vcombine.high %v89_v55, %v93_v56 }
  0x73   :  { %v276_v63 = vld [vmem:[#allocation5 + $0x620] sm:$0xff]  ;;  %1686 = vmatpush2.bf16.msra.mxu1 %v6594_v1  ;;  %v221_v61 = vld [vmem:[#allocation5 + $0x468] sm:$0xff]  ;;  %v6404_v6 = vcombine.low %v89_v55, %v93_v56 }
  0x74   :  { %v6587_v3 = vcombine.high %v272_v62, %v276_v63  ;;  %v72_v9 = vld [vmem:[#allocation2] sm:$0xff]  ;;  %1646 = vmatprep.subr.bf16.mxu0 %v6459_v2  ;;  %v6586_v10 = vcombine.low %v272_v62, %v276_v63  ;;  %v6412_v62 = vcombine.low %v97_v47, %v101_v48  ;;  %v6540_v63 = vcombine.low %v225_v49, %v229_v51  ;;  %v81_v1 = vld [vmem:[#allocation5 + $0x8] sm:$0xff] }
  0x75   :  { %v7547_v16 = vpack.c.bf16 %v72_v9, %v72_v9  ;;  %1647 = vmatpush2.bf16.msra.mxu0 %v6458_v8  ;;  %v85_v2 = vld [vmem:[#allocation5 + $0x28] sm:$0xff]  ;;  %v6533_v4 = vcombine.high %v217_v57, %v221_v61  ;;  %v6532_v7 = vcombine.low %v217_v57, %v221_v61 }
  0x76   :  { %1687 = vmatprep.subr.bf16.mxu1 %v6587_v3  ;;  %1698 = vmatprep.subr.bf16.mxu0 %v6453_v12  ;;  %v209_v3 = vld [vmem:[#allocation5 + $0x408] sm:$0xff]  ;;  %v6397_v8 = vcombine.high %v81_v1, %v85_v2  ;;  %v6396_v14 = vcombine.low %v81_v1, %v85_v2 }
  0x77   :  { %1688 = vmatpush2.bf16.msra.mxu1 %v6586_v10  ;;  %v213_v5 = vld [vmem:[#allocation5 + $0x428] sm:$0xff] }
  0x78   :  { %1739 = vmatprep.subr.bf16.mxu1 %v6581_v13  ;;  %1649 = vmatmul.mubr.bf16.vlgmr.msra.gmra.mxu0 %v7547_v16  ;;  %v201_v9 = vld [vmem:[#allocation5 + $0x3c8] sm:$0xff]  ;;  %v6525_v12 = vcombine.high %v209_v3, %v213_v5  ;;  %v6524_v15 = vcombine.low %v209_v3, %v213_v5 }
  0x79   :  { %1699 = vmatpush1.bf16.msra.mxu0 %v6452_v20  ;;  %1730 = vmatprep.mubr.bf16.mxu0 %v7541_v58  ;;  %v205_v10 = vld [vmem:[#allocation5 + $0x3e8] sm:$0xff] }
  0x7a   :  { %1690 = vmatmul.mubr.bf16.vlgmr.msra.gmra.mxu1 %v7549_v19  ;;  %1700 = vmatprep.subr.bf16.mxu0 %v6445_v22  ;;  %v329_v11 = vld [vmem:[#allocation5 + $0x7c8] sm:$0xff]  ;;  %v6517_v17 = vcombine.high %v201_v9, %v205_v10  ;;  %v6516_v24 = vcombine.low %v201_v9, %v205_v10 }
  0x7b   :  { %1740 = vmatpush1.bf16.msra.mxu1 %v6580_v21  ;;  %1771 = vmatprep.mubr.bf16.mxu1 %v7543_v59  ;;  %v333_v13 = vld [vmem:[#allocation5 + $0x7e8] sm:$0xff] }
  0x7c   :  { %1741 = vmatprep.subr.bf16.mxu1 %v6573_v25  ;;  %v193_v18 = vld [vmem:[#allocation5 + $0x388] sm:$0xff]  ;;  %v6645_v22 = vcombine.high %v329_v11, %v333_v13  ;;  %v6644_v25 = vcombine.low %v329_v11, %v333_v13  ;;  %v138_v13 = vld [vmem:[#allocation5 + $0x1d0] sm:$0xff] }
  0x7d   :  { %1701 = vmatpush1.bf16.msra.mxu0 %v6444_v28  ;;  %v197_v20 = vld [vmem:[#allocation5 + $0x3a8] sm:$0xff] }
  0x7e   :  { %1702 = vmatprep.subr.bf16.mxu0 %v6437_v30  ;;  %v321_v21 = vld [vmem:[#allocation5 + $0x788] sm:$0xff]  ;;  %v6509_v26 = vcombine.high %v193_v18, %v197_v20  ;;  %v6508_v32 = vcombine.low %v193_v18, %v197_v20  ;;  %v270_v18 = vld [vmem:[#allocation5 + $0x5f0] sm:$0xff] }
  0x7f   :  { %1742 = vmatpush1.bf16.msra.mxu1 %v6572_v29  ;;  %v325_v23 = vld [vmem:[#allocation5 + $0x7a8] sm:$0xff] }
  0x80   :  { %1743 = vmatprep.subr.bf16.mxu1 %v6565_v34  ;;  %v185_v27 = vld [vmem:[#allocation5 + $0x348] sm:$0xff]  ;;  %v6637_v30 = vcombine.high %v321_v21, %v325_v23  ;;  %v6636_v33 = vcombine.low %v321_v21, %v325_v23  ;;  %v130_v23 = vld [vmem:[#allocation5 + $0x190] sm:$0xff] }
  0x81   :  { %1703 = vmatpush1.bf16.msra.mxu0 %v6436_v36  ;;  %v189_v28 = vld [vmem:[#allocation5 + $0x368] sm:$0xff] }
  0x82   :  { %1704 = vmatprep.subr.bf16.mxu0 %v6429_v38  ;;  %v313_v29 = vld [vmem:[#allocation5 + $0x748] sm:$0xff]  ;;  %v6501_v34 = vcombine.high %v185_v27, %v189_v28  ;;  %v6500_v40 = vcombine.low %v185_v27, %v189_v28  ;;  %v262_v27 = vld [vmem:[#allocation5 + $0x5b0] sm:$0xff] }
  0x83   :  { %1744 = vmatpush1.bf16.msra.mxu1 %v6564_v37  ;;  %v317_v31 = vld [vmem:[#allocation5 + $0x768] sm:$0xff] }
  0x84   :  { %1745 = vmatprep.subr.bf16.mxu1 %v6557_v42  ;;  %v177_v35 = vld [vmem:[#allocation5 + $0x308] sm:$0xff]  ;;  %v6629_v38 = vcombine.high %v313_v29, %v317_v31  ;;  %v6628_v41 = vcombine.low %v313_v29, %v317_v31 }
  0x85   :  { %1705 = vmatpush1.bf16.msra.mxu0 %v6428_v44  ;;  %v181_v36 = vld [vmem:[#allocation5 + $0x328] sm:$0xff] }
  0x86   :  { %1706 = vmatprep.subr.bf16.mxu0 %v6421_v46  ;;  %v305_v37 = vld [vmem:[#allocation5 + $0x708] sm:$0xff]  ;;  %v6493_v42 = vcombine.high %v177_v35, %v181_v36  ;;  %v6492_v48 = vcombine.low %v177_v35, %v181_v36  ;;  %v254_v35 = vld [vmem:[#allocation5 + $0x570] sm:$0xff] }
  0x87   :  { %1746 = vmatpush1.bf16.msra.mxu1 %v6556_v45  ;;  %v309_v39 = vld [vmem:[#allocation5 + $0x728] sm:$0xff] }
  0x88   :  { %1747 = vmatprep.subr.bf16.mxu1 %v6549_v50  ;;  %v169_v43 = vld [vmem:[#allocation5 + $0x2c8] sm:$0xff]  ;;  %v6621_v46 = vcombine.high %v305_v37, %v309_v39  ;;  %v6620_v49 = vcombine.low %v305_v37, %v309_v39 }
  0x89   :  { %1707 = vmatpush1.bf16.msra.mxu0 %v6420_v52  ;;  %v173_v44 = vld [vmem:[#allocation5 + $0x2e8] sm:$0xff] }
  0x8a   :  { %1708 = vmatprep.subr.bf16.mxu0 %v6413_v54  ;;  %v297_v45 = vld [vmem:[#allocation5 + $0x6c8] sm:$0xff]  ;;  %v6485_v50 = vcombine.high %v169_v43, %v173_v44  ;;  %v6484_v56 = vcombine.low %v169_v43, %v173_v44  ;;  %v246_v43 = vld [vmem:[#allocation5 + $0x530] sm:$0xff] }
  0x8b   :  { %1748 = vmatpush1.bf16.msra.mxu1 %v6548_v53  ;;  %v301_v47 = vld [vmem:[#allocation5 + $0x6e8] sm:$0xff] }
  0x8c   :  { %1749 = vmatprep.subr.bf16.mxu1 %v6541_v60  ;;  %v161_v51 = vld [vmem:[#allocation5 + $0x288] sm:$0xff]  ;;  %v6613_v54 = vcombine.high %v297_v45, %v301_v47  ;;  %v6612_v57 = vcombine.low %v297_v45, %v301_v47 }
  0x8d   :  { %1709 = vmatpush1.bf16.msra.mxu0 %v6412_v62  ;;  %v165_v52 = vld [vmem:[#allocation5 + $0x2a8] sm:$0xff] }
  0x8e   :  { %1710 = vmatprep.subr.bf16.mxu0 %v6405_v0  ;;  %v289_v53 = vld [vmem:[#allocation5 + $0x688] sm:$0xff]  ;;  %v6477_v60 = vcombine.high %v161_v51, %v165_v52  ;;  %v6476_v2 = vcombine.low %v161_v51, %v165_v52  ;;  %v238_v51 = vld [vmem:[#allocation5 + $0x4f0] sm:$0xff] }
  0x8f   :  { %1750 = vmatpush1.bf16.msra.mxu1 %v6540_v63  ;;  %v293_v55 = vld [vmem:[#allocation5 + $0x6a8] sm:$0xff] }
  0x90   :  { %1751 = vmatprep.subr.bf16.mxu1 %v6533_v4  ;;  %v153_v61 = vld [vmem:[#allocation5 + $0x248] sm:$0xff]  ;;  %v6605_v0 = vcombine.high %v289_v53, %v293_v55  ;;  %v6604_v3 = vcombine.low %v289_v53, %v293_v55 }
  0x91   :  { %1711 = vmatpush1.bf16.msra.mxu0 %v6404_v6  ;;  %v157_v62 = vld [vmem:[#allocation5 + $0x268] sm:$0xff] }
  0x92   :  { %1712 = vmatprep.subr.bf16.mxu0 %v6397_v8  ;;  %v281_v63 = vld [vmem:[#allocation5 + $0x648] sm:$0xff]  ;;  %v6469_v4 = vcombine.high %v153_v61, %v157_v62  ;;  %v6468_v10 = vcombine.low %v153_v61, %v157_v62  ;;  %v230_v61 = vld [vmem:[#allocation5 + $0x4b0] sm:$0xff] }
  0x93   :  { %1752 = vmatpush1.bf16.msra.mxu1 %v6532_v7  ;;  %v285_v1 = vld [vmem:[#allocation5 + $0x668] sm:$0xff] }
  0x94   :  { %1753 = vmatprep.subr.bf16.mxu1 %v6525_v12  ;;  %v145_v5 = vld [vmem:[#allocation5 + $0x208] sm:$0xff]  ;;  %v6597_v8 = vcombine.high %v281_v63, %v285_v1  ;;  %v6596_v11 = vcombine.low %v281_v63, %v285_v1 }
  0x95   :  { %1713 = vmatpush1.bf16.msra.mxu0 %v6396_v14  ;;  %v149_v6 = vld [vmem:[#allocation5 + $0x228] sm:$0xff]  ;;  %v142_v14 = vld [vmem:[#allocation5 + $0x1f0] sm:$0xff] }
  0x96   :  { %1714 = vmatprep.subr.bf16.mxu0 %v6517_v17  ;;  %v273_v7 = vld [vmem:[#allocation5 + $0x608] sm:$0xff]  ;;  %v6461_v12 = vcombine.high %v145_v5, %v149_v6  ;;  %v6460_v20 = vcombine.low %v145_v5, %v149_v6  ;;  %v6454_v28 = vcombine.low %v138_v13, %v142_v14  ;;  %v222_v5 = vld [vmem:[#allocation5 + $0x470] sm:$0xff] }
  0x97   :  { %1754 = vmatpush1.bf16.msra.mxu1 %v6524_v15  ;;  %v277_v9 = vld [vmem:[#allocation5 + $0x628] sm:$0xff]  ;;  %v266_v15 = vld [vmem:[#allocation5 + $0x5d0] sm:$0xff] }
  0x98   :  { %1755 = vmatprep.subr.bf16.mxu1 %v6645_v22  ;;  %v6589_v17 = vcombine.high %v273_v7, %v277_v9  ;;  %v6588_v21 = vcombine.low %v273_v7, %v277_v9  ;;  %v6455_v22 = vcombine.high %v138_v13, %v142_v14  ;;  %v6582_v29 = vcombine.low %v266_v15, %v270_v18  ;;  %v214_v13 = vld [vmem:[#allocation5 + $0x430] sm:$0xff] }
  0x99   :  { %1715 = vmatpush2.bf16.msra.mxu0 %v6516_v24  ;;  %v134_v24 = vld [vmem:[#allocation5 + $0x1b0] sm:$0xff] }
  0x9a   :  { %1716 = vmatprep.subr.bf16.mxu0 %v6509_v26  ;;  %v6583_v26 = vcombine.high %v266_v15, %v270_v18  ;;  %v6446_v36 = vcombine.low %v130_v23, %v134_v24 }
  0x9b   :  { %1756 = vmatpush2.bf16.msra.mxu1 %v6644_v25  ;;  %v258_v25 = vld [vmem:[#allocation5 + $0x590] sm:$0xff] }
  0x9c   :  { %1757 = vmatprep.subr.bf16.mxu1 %v6637_v30  ;;  %v6447_v30 = vcombine.high %v130_v23, %v134_v24  ;;  %v6575_v31 = vcombine.high %v258_v25, %v262_v27  ;;  %v6574_v37 = vcombine.low %v258_v25, %v262_v27  ;;  %v334_v23 = vld [vmem:[#allocation5 + $0x7f0] sm:$0xff] }
  0x9d   :  { %1717 = vmatpush2.bf16.msra.mxu0 %v6508_v32  ;;  %v122_v32 = vld [vmem:[#allocation5 + $0x150] sm:$0xff] }
  0x9e   :  { %1718 = vmatprep.subr.bf16.mxu0 %v6501_v34  ;;  %v250_v34 = vld [vmem:[#allocation5 + $0x550] sm:$0xff] }
  0x9f   :  { %1758 = vmatpush2.bf16.msra.mxu1 %v6636_v33  ;;  %v126_v33 = vld [vmem:[#allocation5 + $0x170] sm:$0xff]  ;;  %v6567_v39 = vcombine.high %v250_v34, %v254_v35  ;;  %v6566_v45 = vcombine.low %v250_v34, %v254_v35 }
  0xa0   :  { %1759 = vmatprep.subr.bf16.mxu1 %v6629_v38  ;;  %v6439_v38 = vcombine.high %v122_v32, %v126_v33  ;;  %v6438_v44 = vcombine.low %v122_v32, %v126_v33 }
  0xa1   :  { %1719 = vmatpush2.bf16.msra.mxu0 %v6500_v40  ;;  %v114_v40 = vld [vmem:[#allocation5 + $0x110] sm:$0xff] }
  0xa2   :  { %1720 = vmatprep.subr.bf16.mxu0 %v6493_v42  ;;  %v242_v42 = vld [vmem:[#allocation5 + $0x510] sm:$0xff] }
  0xa3   :  { %1760 = vmatpush2.bf16.msra.mxu1 %v6628_v41  ;;  %v118_v41 = vld [vmem:[#allocation5 + $0x130] sm:$0xff]  ;;  %v6559_v47 = vcombine.high %v242_v42, %v246_v43  ;;  %v6558_v53 = vcombine.low %v242_v42, %v246_v43 }
  0xa4   :  { %1761 = vmatprep.subr.bf16.mxu1 %v6621_v46  ;;  %v6431_v46 = vcombine.high %v114_v40, %v118_v41  ;;  %v6430_v52 = vcombine.low %v114_v40, %v118_v41 }
  0xa5   :  { %1721 = vmatpush2.bf16.msra.mxu0 %v6492_v48  ;;  %v106_v48 = vld [vmem:[#allocation5 + $0xd0] sm:$0xff] }
  0xa6   :  { %1722 = vmatprep.subr.bf16.mxu0 %v6485_v50  ;;  %v234_v50 = vld [vmem:[#allocation5 + $0x4d0] sm:$0xff] }
  0xa7   :  { %1762 = vmatpush2.bf16.msra.mxu1 %v6620_v49  ;;  %v110_v49 = vld [vmem:[#allocation5 + $0xf0] sm:$0xff]  ;;  %v6551_v55 = vcombine.high %v234_v50, %v238_v51  ;;  %v6550_v63 = vcombine.low %v234_v50, %v238_v51 }
  0xa8   :  { %1763 = vmatprep.subr.bf16.mxu1 %v6613_v54  ;;  %v6423_v54 = vcombine.high %v106_v48, %v110_v49  ;;  %v6422_v62 = vcombine.low %v106_v48, %v110_v49 }
  0xa9   :  { %1723 = vmatpush2.bf16.msra.mxu0 %v6484_v56  ;;  %v98_v56 = vld [vmem:[#allocation5 + $0x90] sm:$0xff] }
  0xaa   :  { %1724 = vmatprep.subr.bf16.mxu0 %v6477_v60  ;;  %v226_v60 = vld [vmem:[#allocation5 + $0x490] sm:$0xff] }
  0xab   :  { %1764 = vmatpush2.bf16.msra.mxu1 %v6612_v57  ;;  %v102_v57 = vld [vmem:[#allocation5 + $0xb0] sm:$0xff]  ;;  %v6543_v1 = vcombine.high %v226_v60, %v230_v61  ;;  %v6542_v7 = vcombine.low %v226_v60, %v230_v61 }
  0xac   :  { %1765 = vmatprep.subr.bf16.mxu1 %v6605_v0  ;;  %v6415_v0 = vcombine.high %v98_v56, %v102_v57  ;;  %v6414_v6 = vcombine.low %v98_v56, %v102_v57 }
  0xad   :  { %1725 = vmatpush2.bf16.msra.mxu0 %v6476_v2  ;;  %v90_v2 = vld [vmem:[#allocation5 + $0x50] sm:$0xff] }
  0xae   :  { %1726 = vmatprep.subr.bf16.mxu0 %v6469_v4  ;;  %v218_v4 = vld [vmem:[#allocation5 + $0x450] sm:$0xff] }
  0xaf   :  { %1766 = vmatpush2.bf16.msra.mxu1 %v6604_v3  ;;  %v94_v3 = vld [vmem:[#allocation5 + $0x70] sm:$0xff]  ;;  %v6535_v9 = vcombine.high %v218_v4, %v222_v5  ;;  %v6534_v15 = vcombine.low %v218_v4, %v222_v5 }
  0xb0   :  { %1767 = vmatprep.subr.bf16.mxu1 %v6597_v8  ;;  %v6407_v8 = vcombine.high %v90_v2, %v94_v3  ;;  %v6406_v14 = vcombine.low %v90_v2, %v94_v3 }
  0xb1   :  { %1727 = vmatpush2.bf16.msra.mxu0 %v6468_v10  ;;  %v82_v10 = vld [vmem:[#allocation5 + $0x10] sm:$0xff] }
  0xb2   :  { %1728 = vmatprep.subr.bf16.mxu0 %v6461_v12  ;;  %v210_v12 = vld [vmem:[#allocation5 + $0x410] sm:$0xff] }
  0xb3   :  { %1768 = vmatpush2.bf16.msra.mxu1 %v6596_v11  ;;  %v86_v11 = vld [vmem:[#allocation5 + $0x30] sm:$0xff]  ;;  %v6527_v18 = vcombine.high %v210_v12, %v214_v13  ;;  %v6526_v25 = vcombine.low %v210_v12, %v214_v13 }
  0xb4   :  { %1769 = vmatprep.subr.bf16.mxu1 %v6589_v17  ;;  %v6399_v17 = vcombine.high %v82_v10, %v86_v11  ;;  %v6398_v24 = vcombine.low %v82_v10, %v86_v11 }
  0xb5   :  { %1729 = vmatpush2.bf16.msra.mxu0 %v6460_v20  ;;  %v202_v20 = vld [vmem:[#allocation5 + $0x3d0] sm:$0xff] }
  0xb6   :  { %1780 = vmatprep.subr.bf16.mxu0 %v6455_v22  ;;  %v330_v22 = vld [vmem:[#allocation5 + $0x7d0] sm:$0xff] }
  0xb7   :  { %1770 = vmatpush2.bf16.msra.mxu1 %v6588_v21  ;;  %v206_v21 = vld [vmem:[#allocation5 + $0x3f0] sm:$0xff]  ;;  %v6647_v27 = vcombine.high %v330_v22, %v334_v23  ;;  %v6646_v33 = vcombine.low %v330_v22, %v334_v23 }
  0xb8   :  { %1821 = vmatprep.subr.bf16.mxu1 %v6583_v26  ;;  %1731 = vmatmul.mubr.bf16.vlgmr.msra.gmra.mxu0 %v7547_v16  ;;  %v6519_v26 = vcombine.high %v202_v20, %v206_v21  ;;  %v6518_v32 = vcombine.low %v202_v20, %v206_v21 }
  0xb9   :  { %1781 = vmatpush1.bf16.msra.mxu0 %v6454_v28  ;;  %1812 = vmatprep.mubr.bf16.mxu0 %v7541_v58  ;;  %v194_v28 = vld [vmem:[#allocation5 + $0x390] sm:$0xff] }
  0xba   :  { %1772 = vmatmul.mubr.bf16.vlgmr.msra.gmra.mxu1 %v7549_v19  ;;  %1782 = vmatprep.subr.bf16.mxu0 %v6447_v30  ;;  %v322_v30 = vld [vmem:[#allocation5 + $0x790] sm:$0xff] }
  0xbb   :  { %1822 = vmatpush1.bf16.msra.mxu1 %v6582_v29  ;;  %1853 = vmatprep.mubr.bf16.mxu1 %v7543_v59  ;;  %v198_v29 = vld [vmem:[#allocation5 + $0x3b0] sm:$0xff] }
  0xbc   :  { %1823 = vmatprep.subr.bf16.mxu1 %v6575_v31  ;;  %v326_v31 = vld [vmem:[#allocation5 + $0x7b0] sm:$0xff]  ;;  %v6511_v34 = vcombine.high %v194_v28, %v198_v29  ;;  %v6510_v40 = vcombine.low %v194_v28, %v198_v29 }
  0xbd   :  { %1783 = vmatpush1.bf16.msra.mxu0 %v6446_v36  ;;  %v6639_v35 = vcombine.high %v322_v30, %v326_v31  ;;  %v186_v36 = vld [vmem:[#allocation5 + $0x350] sm:$0xff]  ;;  %v6638_v41 = vcombine.low %v322_v30, %v326_v31 }
  0xbe   :  { %1784 = vmatprep.subr.bf16.mxu0 %v6439_v38  ;;  %v314_v38 = vld [vmem:[#allocation5 + $0x750] sm:$0xff] }
  0xbf   :  { %1824 = vmatpush1.bf16.msra.mxu1 %v6574_v37  ;;  %v190_v37 = vld [vmem:[#allocation5 + $0x370] sm:$0xff] }
  0xc0   :  { %1825 = vmatprep.subr.bf16.mxu1 %v6567_v39  ;;  %v318_v39 = vld [vmem:[#allocation5 + $0x770] sm:$0xff]  ;;  %v6503_v42 = vcombine.high %v186_v36, %v190_v37  ;;  %v6502_v48 = vcombine.low %v186_v36, %v190_v37 }
  0xc1   :  { %1785 = vmatpush1.bf16.msra.mxu0 %v6438_v44  ;;  %v6631_v43 = vcombine.high %v314_v38, %v318_v39  ;;  %v178_v44 = vld [vmem:[#allocation5 + $0x310] sm:$0xff]  ;;  %v6630_v49 = vcombine.low %v314_v38, %v318_v39 }
  0xc2   :  { %1786 = vmatprep.subr.bf16.mxu0 %v6431_v46  ;;  %v306_v46 = vld [vmem:[#allocation5 + $0x710] sm:$0xff] }
  0xc3   :  { %1826 = vmatpush1.bf16.msra.mxu1 %v6566_v45  ;;  %v182_v45 = vld [vmem:[#allocation5 + $0x330] sm:$0xff] }
  0xc4   :  { %1827 = vmatprep.subr.bf16.mxu1 %v6559_v47  ;;  %v310_v47 = vld [vmem:[#allocation5 + $0x730] sm:$0xff]  ;;  %v6495_v50 = vcombine.high %v178_v44, %v182_v45  ;;  %v6494_v56 = vcombine.low %v178_v44, %v182_v45 }
  0xc5   :  { %1787 = vmatpush1.bf16.msra.mxu0 %v6430_v52  ;;  %v6623_v51 = vcombine.high %v306_v46, %v310_v47  ;;  %v170_v52 = vld [vmem:[#allocation5 + $0x2d0] sm:$0xff]  ;;  %v6622_v57 = vcombine.low %v306_v46, %v310_v47 }
  0xc6   :  { %1788 = vmatprep.subr.bf16.mxu0 %v6423_v54  ;;  %v298_v54 = vld [vmem:[#allocation5 + $0x6d0] sm:$0xff] }
  0xc7   :  { %1828 = vmatpush1.bf16.msra.mxu1 %v6558_v53  ;;  %v174_v53 = vld [vmem:[#allocation5 + $0x2f0] sm:$0xff] }
  0xc8   :  { %1829 = vmatprep.subr.bf16.mxu1 %v6551_v55  ;;  %v302_v55 = vld [vmem:[#allocation5 + $0x6f0] sm:$0xff]  ;;  %v6487_v60 = vcombine.high %v170_v52, %v174_v53  ;;  %v6486_v2 = vcombine.low %v170_v52, %v174_v53 }
  0xc9   :  { %1789 = vmatpush1.bf16.msra.mxu0 %v6422_v62  ;;  %v6615_v61 = vcombine.high %v298_v54, %v302_v55  ;;  %v162_v62 = vld [vmem:[#allocation5 + $0x290] sm:$0xff]  ;;  %v6614_v3 = vcombine.low %v298_v54, %v302_v55 }
  0xca   :  { %1790 = vmatprep.subr.bf16.mxu0 %v6415_v0  ;;  %v290_v0 = vld [vmem:[#allocation5 + $0x690] sm:$0xff] }
  0xcb   :  { %1830 = vmatpush1.bf16.msra.mxu1 %v6550_v63  ;;  %v166_v63 = vld [vmem:[#allocation5 + $0x2b0] sm:$0xff] }
  0xcc   :  { %1831 = vmatprep.subr.bf16.mxu1 %v6543_v1  ;;  %v294_v1 = vld [vmem:[#allocation5 + $0x6b0] sm:$0xff]  ;;  %v6479_v4 = vcombine.high %v162_v62, %v166_v63  ;;  %v6478_v10 = vcombine.low %v162_v62, %v166_v63 }
  0xcd   :  { %1791 = vmatpush1.bf16.msra.mxu0 %v6414_v6  ;;  %v6607_v5 = vcombine.high %v290_v0, %v294_v1  ;;  %v154_v6 = vld [vmem:[#allocation5 + $0x250] sm:$0xff]  ;;  %v6606_v11 = vcombine.low %v290_v0, %v294_v1  ;;  %v99_v0 = vld [vmem:[#allocation5 + $0x98] sm:$0xff] }
  0xce   :  { %1792 = vmatprep.subr.bf16.mxu0 %v6407_v8  ;;  %v282_v8 = vld [vmem:[#allocation5 + $0x650] sm:$0xff]  ;;  %v103_v1 = vld [vmem:[#allocation5 + $0xb8] sm:$0xff] }
  0xcf   :  { %1832 = vmatpush1.bf16.msra.mxu1 %v6542_v7  ;;  %v158_v7 = vld [vmem:[#allocation5 + $0x270] sm:$0xff] }
  0xd0   :  { %1833 = vmatprep.subr.bf16.mxu1 %v6535_v9  ;;  %v286_v9 = vld [vmem:[#allocation5 + $0x670] sm:$0xff]  ;;  %v6471_v12 = vcombine.high %v154_v6, %v158_v7  ;;  %v6470_v20 = vcombine.low %v154_v6, %v158_v7  ;;  %v6417_v6 = vcombine.high %v99_v0, %v103_v1 }
  0xd1   :  { %1793 = vmatpush1.bf16.msra.mxu0 %v6406_v14  ;;  %v6599_v13 = vcombine.high %v282_v8, %v286_v9  ;;  %v146_v14 = vld [vmem:[#allocation5 + $0x210] sm:$0xff]  ;;  %v6598_v21 = vcombine.low %v282_v8, %v286_v9  ;;  %v91_v8 = vld [vmem:[#allocation5 + $0x58] sm:$0xff] }
  0xd2   :  { %1794 = vmatprep.subr.bf16.mxu0 %v6399_v17  ;;  %v274_v17 = vld [vmem:[#allocation5 + $0x610] sm:$0xff]  ;;  %v95_v9 = vld [vmem:[#allocation5 + $0x78] sm:$0xff] }
  0xd3   :  { %1834 = vmatpush1.bf16.msra.mxu1 %v6534_v15  ;;  %v150_v15 = vld [vmem:[#allocation5 + $0x230] sm:$0xff] }
  0xd4   :  { %1835 = vmatprep.subr.bf16.mxu1 %v6527_v18  ;;  %v278_v18 = vld [vmem:[#allocation5 + $0x630] sm:$0xff]  ;;  %v6463_v22 = vcombine.high %v146_v14, %v150_v15  ;;  %v6462_v28 = vcombine.low %v146_v14, %v150_v15  ;;  %v6409_v14 = vcombine.high %v91_v8, %v95_v9 }
  0xd5   :  { %1795 = vmatpush1.bf16.msra.mxu0 %v6398_v24  ;;  %v6591_v23 = vcombine.high %v274_v17, %v278_v18  ;;  %v139_v24 = vld [vmem:[#allocation5 + $0x1d8] sm:$0xff]  ;;  %v6590_v29 = vcombine.low %v274_v17, %v278_v18 }
  0xd6   :  { %1796 = vmatprep.subr.bf16.mxu0 %v6519_v26  ;;  %v267_v26 = vld [vmem:[#allocation5 + $0x5d8] sm:$0xff] }
  0xd7   :  { %1836 = vmatpush1.bf16.msra.mxu1 %v6526_v25  ;;  %v143_v25 = vld [vmem:[#allocation5 + $0x1f8] sm:$0xff] }
  0xd8   :  { %1837 = vmatprep.subr.bf16.mxu1 %v6647_v27  ;;  %v271_v27 = vld [vmem:[#allocation5 + $0x5f8] sm:$0xff]  ;;  %v6457_v30 = vcombine.high %v139_v24, %v143_v25  ;;  %v6456_v36 = vcombine.low %v139_v24, %v143_v25 }
  0xd9   :  { %1797 = vmatpush2.bf16.msra.mxu0 %v6518_v32  ;;  %v6585_v31 = vcombine.high %v267_v26, %v271_v27  ;;  %v131_v32 = vld [vmem:[#allocation5 + $0x198] sm:$0xff]  ;;  %v6584_v37 = vcombine.low %v267_v26, %v271_v27 }
  0xda   :  { %1798 = vmatprep.subr.bf16.mxu0 %v6511_v34  ;;  %v259_v34 = vld [vmem:[#allocation5 + $0x598] sm:$0xff] }
  0xdb   :  { %1838 = vmatpush2.bf16.msra.mxu1 %v6646_v33  ;;  %v135_v33 = vld [vmem:[#allocation5 + $0x1b8] sm:$0xff] }
  0xdc   :  { %1839 = vmatprep.subr.bf16.mxu1 %v6639_v35  ;;  %v263_v35 = vld [vmem:[#allocation5 + $0x5b8] sm:$0xff]  ;;  %v6449_v38 = vcombine.high %v131_v32, %v135_v33  ;;  %v6448_v44 = vcombine.low %v131_v32, %v135_v33 }
  0xdd   :  { %1799 = vmatpush2.bf16.msra.mxu0 %v6510_v40  ;;  %v6577_v39 = vcombine.high %v259_v34, %v263_v35  ;;  %v123_v40 = vld [vmem:[#allocation5 + $0x158] sm:$0xff]  ;;  %v6576_v45 = vcombine.low %v259_v34, %v263_v35 }
  0xde   :  { %1800 = vmatprep.subr.bf16.mxu0 %v6503_v42  ;;  %v251_v42 = vld [vmem:[#allocation5 + $0x558] sm:$0xff] }
  0xdf   :  { %1840 = vmatpush2.bf16.msra.mxu1 %v6638_v41  ;;  %v127_v41 = vld [vmem:[#allocation5 + $0x178] sm:$0xff] }
  0xe0   :  { %1841 = vmatprep.subr.bf16.mxu1 %v6631_v43  ;;  %v255_v43 = vld [vmem:[#allocation5 + $0x578] sm:$0xff]  ;;  %v6441_v46 = vcombine.high %v123_v40, %v127_v41  ;;  %v6440_v52 = vcombine.low %v123_v40, %v127_v41 }
  0xe1   :  { %1801 = vmatpush2.bf16.msra.mxu0 %v6502_v48  ;;  %v6569_v47 = vcombine.high %v251_v42, %v255_v43  ;;  %v115_v48 = vld [vmem:[#allocation5 + $0x118] sm:$0xff]  ;;  %v6568_v53 = vcombine.low %v251_v42, %v255_v43 }
  0xe2   :  { %1802 = vmatprep.subr.bf16.mxu0 %v6495_v50  ;;  %v243_v50 = vld [vmem:[#allocation5 + $0x518] sm:$0xff] }
  0xe3   :  { %1842 = vmatpush2.bf16.msra.mxu1 %v6630_v49  ;;  %v119_v49 = vld [vmem:[#allocation5 + $0x138] sm:$0xff] }
  0xe4   :  { %1843 = vmatprep.subr.bf16.mxu1 %v6623_v51  ;;  %v247_v51 = vld [vmem:[#allocation5 + $0x538] sm:$0xff]  ;;  %v6433_v54 = vcombine.high %v115_v48, %v119_v49  ;;  %v6432_v62 = vcombine.low %v115_v48, %v119_v49 }
  0xe5   :  { %1803 = vmatpush2.bf16.msra.mxu0 %v6494_v56  ;;  %v6561_v55 = vcombine.high %v243_v50, %v247_v51  ;;  %v107_v56 = vld [vmem:[#allocation5 + $0xd8] sm:$0xff] }
  0xe6   :  { %1804 = vmatprep.subr.bf16.mxu0 %v6487_v60  ;;  %v235_v60 = vld [vmem:[#allocation5 + $0x4d8] sm:$0xff] }
  0xe7   :  { %1844 = vmatpush2.bf16.msra.mxu1 %v6622_v57  ;;  %v111_v57 = vld [vmem:[#allocation5 + $0xf8] sm:$0xff] }
  0xe8   :  { %1845 = vmatprep.subr.bf16.mxu1 %v6615_v61  ;;  %v239_v61 = vld [vmem:[#allocation5 + $0x4f8] sm:$0xff]  ;;  %v6425_v63 = vcombine.high %v107_v56, %v111_v57 }
  0xe9   :  { %1805 = vmatpush2.bf16.msra.mxu0 %v6486_v2  ;;  %v227_v2 = vld [vmem:[#allocation5 + $0x498] sm:$0xff] }
  0xea   :  { %1806 = vmatprep.subr.bf16.mxu0 %v6479_v4  ;;  %v6424_v4 = vcombine.low %v107_v56, %v111_v57  ;;  %v83_v17 = vld [vmem:[#allocation5 + $0x18] sm:$0xff] }
  0xeb   :  { %1846 = vmatpush2.bf16.msra.mxu1 %v6614_v3  ;;  %v231_v3 = vld [vmem:[#allocation5 + $0x4b8] sm:$0xff] }
  0xec   :  { %1847 = vmatprep.subr.bf16.mxu1 %v6607_v5  ;;  %v6552_v5 = vcombine.low %v235_v60, %v239_v61  ;;  %v6545_v7 = vcombine.high %v227_v2, %v231_v3  ;;  %v87_v18 = vld [vmem:[#allocation5 + $0x38] sm:$0xff] }
  0xed   :  { %1807 = vmatpush2.bf16.msra.mxu0 %v6478_v10  ;;  %v219_v10 = vld [vmem:[#allocation5 + $0x458] sm:$0xff]  ;;  %v6401_v24 = vcombine.high %v83_v17, %v87_v18 }
  0xee   :  { %1808 = vmatprep.subr.bf16.mxu0 %v6471_v12  ;;  %v6416_v12 = vcombine.low %v99_v0, %v103_v1  ;;  %v203_v26 = vld [vmem:[#allocation5 + $0x3d8] sm:$0xff] }
  0xef   :  { %1848 = vmatpush2.bf16.msra.mxu1 %v6606_v11  ;;  %v223_v11 = vld [vmem:[#allocation5 + $0x478] sm:$0xff] }
  0xf0   :  { %1849 = vmatprep.subr.bf16.mxu1 %v6599_v13  ;;  %v6544_v13 = vcombine.low %v227_v2, %v231_v3  ;;  %v6537_v15 = vcombine.high %v219_v10, %v223_v11  ;;  %v207_v27 = vld [vmem:[#allocation5 + $0x3f8] sm:$0xff] }
  0xf1   :  { %1809 = vmatpush2.bf16.msra.mxu0 %v6470_v20  ;;  %v211_v20 = vld [vmem:[#allocation5 + $0x418] sm:$0xff]  ;;  %v6521_v32 = vcombine.high %v203_v26, %v207_v27 }
  0xf2   :  { %1810 = vmatprep.subr.bf16.mxu0 %v6463_v22  ;;  %v6408_v22 = vcombine.low %v91_v8, %v95_v9  ;;  %v195_v34 = vld [vmem:[#allocation5 + $0x398] sm:$0xff] }
  0xf3   :  { %1850 = vmatpush2.bf16.msra.mxu1 %v6598_v21  ;;  %v215_v21 = vld [vmem:[#allocation5 + $0x438] sm:$0xff] }
  0xf4   :  { %1851 = vmatprep.subr.bf16.mxu1 %v6591_v23  ;;  %v6536_v23 = vcombine.low %v219_v10, %v223_v11  ;;  %v6529_v25 = vcombine.high %v211_v20, %v215_v21  ;;  %v199_v35 = vld [vmem:[#allocation5 + $0x3b8] sm:$0xff] }
  0xf5   :  { %1811 = vmatpush2.bf16.msra.mxu0 %v6462_v28  ;;  %v331_v28 = vld [vmem:[#allocation5 + $0x7d8] sm:$0xff]  ;;  %v6513_v40 = vcombine.high %v195_v34, %v199_v35 }
  0xf6   :  { %1862 = vmatprep.subr.bf16.mxu0 %v6457_v30  ;;  %v6400_v30 = vcombine.low %v83_v17, %v87_v18  ;;  %v187_v42 = vld [vmem:[#allocation5 + $0x358] sm:$0xff] }
  0xf7   :  { %1852 = vmatpush2.bf16.msra.mxu1 %v6590_v29  ;;  %v335_v29 = vld [vmem:[#allocation5 + $0x7f8] sm:$0xff] }
  0xf8   :  { %1903 = vmatprep.subr.bf16.mxu1 %v6585_v31  ;;  %1813 = vmatmul.mubr.bf16.vlgmr.msra.gmra.mxu0 %v7547_v16  ;;  %v6528_v31 = vcombine.low %v211_v20, %v215_v21  ;;  %v6649_v33 = vcombine.high %v331_v28, %v335_v29  ;;  %v191_v43 = vld [vmem:[#allocation5 + $0x378] sm:$0xff] }
  0xf9   :  { %1863 = vmatpush1.bf16.msra.mxu0 %v6456_v36  ;;  %1894 = vmatprep.mubr.bf16.mxu0 %v7541_v58  ;;  %v6560_v58 = vcombine.low %v243_v50, %v247_v51  ;;  %v323_v36 = vld [vmem:[#allocation5 + $0x798] sm:$0xff]  ;;  %v6505_v48 = vcombine.high %v187_v42, %v191_v43 }
  0xfa   :  { %1854 = vmatmul.mubr.bf16.vlgmr.msra.gmra.mxu1 %v7549_v19  ;;  %1864 = vmatprep.subr.bf16.mxu0 %v6449_v38  ;;  %v6520_v38 = vcombine.low %v203_v26, %v207_v27  ;;  %v179_v50 = vld [vmem:[#allocation5 + $0x318] sm:$0xff] }
  0xfb   :  { %1904 = vmatpush1.bf16.msra.mxu1 %v6584_v37  ;;  %1935 = vmatprep.mubr.bf16.mxu1 %v7543_v59  ;;  %v6553_v59 = vcombine.high %v235_v60, %v239_v61  ;;  %v327_v37 = vld [vmem:[#allocation5 + $0x7b8] sm:$0xff] }
  0xfc   :  { %1905 = vmatprep.subr.bf16.mxu1 %v6577_v39  ;;  %v6648_v39 = vcombine.low %v331_v28, %v335_v29  ;;  %v6641_v41 = vcombine.high %v323_v36, %v327_v37  ;;  %v183_v51 = vld [vmem:[#allocation5 + $0x338] sm:$0xff]  ;;  %v2016_v28 = vld [vmem:[#allocation7 + $0x1c0] sm:$0xff] }
  0xfd   :  { %1865 = vmatpush1.bf16.msra.mxu0 %v6448_v44  ;;  %v315_v44 = vld [vmem:[#allocation5 + $0x758] sm:$0xff]  ;;  %v6497_v56 = vcombine.high %v179_v50, %v183_v51  ;;  %v2020_v29 = vld [vmem:[#allocation7 + $0x1e0] sm:$0xff] }
  0xfe   :  { %1866 = vmatprep.subr.bf16.mxu0 %v6441_v46  ;;  %v6512_v46 = vcombine.low %v195_v34, %v199_v35  ;;  %v171_v60 = vld [vmem:[#allocation5 + $0x2d8] sm:$0xff]  ;;  %v6707_v34 = vcombine.high %v2016_v28, %v2020_v29  ;;  %v2008_v35 = vld [vmem:[#allocation7 + $0x180] sm:$0xff] }
  0xff   :  { %1906 = vmatpush1.bf16.msra.mxu1 %v6576_v45  ;;  %v319_v45 = vld [vmem:[#allocation5 + $0x778] sm:$0xff] }
 0x100   :  { %1907 = vmatprep.subr.bf16.mxu1 %v6569_v47  ;;  %v6640_v47 = vcombine.low %v323_v36, %v327_v37  ;;  %v6633_v49 = vcombine.high %v315_v44, %v319_v45  ;;  %v175_v61 = vld [vmem:[#allocation5 + $0x2f8] sm:$0xff]  ;;  %v2012_v36 = vld [vmem:[#allocation7 + $0x1a0] sm:$0xff] }
 0x101   :  { %1867 = vmatpush1.bf16.msra.mxu0 %v6440_v52  ;;  %v307_v52 = vld [vmem:[#allocation5 + $0x718] sm:$0xff]  ;;  %v6489_v0 = vcombine.high %v171_v60, %v175_v61 }
 0x102   :  { %1868 = vmatprep.subr.bf16.mxu0 %v6433_v54  ;;  %v6504_v54 = vcombine.low %v187_v42, %v191_v43  ;;  %v163_v2 = vld [vmem:[#allocation5 + $0x298] sm:$0xff]  ;;  %v2000_v43 = vld [vmem:[#allocation7 + $0x140] sm:$0xff] }
 0x103   :  { %1908 = vmatpush1.bf16.msra.mxu1 %v6568_v53  ;;  %v311_v53 = vld [vmem:[#allocation5 + $0x738] sm:$0xff] }
 0x104   :  { %1909 = vmatprep.subr.bf16.mxu1 %v6561_v55  ;;  %v6632_v55 = vcombine.low %v315_v44, %v319_v45  ;;  %v6625_v57 = vcombine.high %v307_v52, %v311_v53  ;;  %v167_v3 = vld [vmem:[#allocation5 + $0x2b8] sm:$0xff]  ;;  %v2004_v44 = vld [vmem:[#allocation7 + $0x160] sm:$0xff] }
 0x105   :  { %1869 = vmatpush1.bf16.msra.mxu0 %v6432_v62  ;;  %v299_v62 = vld [vmem:[#allocation5 + $0x6d8] sm:$0xff]  ;;  %v6481_v8 = vcombine.high %v163_v2, %v167_v3 }
 0x106   :  { %1870 = vmatprep.subr.bf16.mxu0 %v6425_v63  ;;  %v6496_v63 = vcombine.low %v179_v50, %v183_v51  ;;  %v155_v10 = vld [vmem:[#allocation5 + $0x258] sm:$0xff]  ;;  %v6698_v50 = vcombine.low %v2008_v35, %v2012_v36 }
 0x107   :  { %1910 = vmatpush1.bf16.msra.mxu1 %v6560_v58  ;;  %v303_v58 = vld [vmem:[#allocation5 + $0x6f8] sm:$0xff] }
 0x108   :  { %1911 = vmatprep.subr.bf16.mxu1 %v6553_v59  ;;  %v6624_v59 = vcombine.low %v307_v52, %v311_v53  ;;  %v6617_v1 = vcombine.high %v299_v62, %v303_v58  ;;  %v159_v11 = vld [vmem:[#allocation5 + $0x278] sm:$0xff]  ;;  %v6691_v52 = vcombine.high %v2000_v43, %v2004_v44 }
 0x109   :  { %1871 = vmatpush1.bf16.msra.mxu0 %v6424_v4  ;;  %v291_v4 = vld [vmem:[#allocation5 + $0x698] sm:$0xff]  ;;  %v6473_v17 = vcombine.high %v155_v10, %v159_v11 }
 0x10a   :  { %1872 = vmatprep.subr.bf16.mxu0 %v6417_v6  ;;  %v6488_v6 = vcombine.low %v171_v60, %v175_v61  ;;  %v147_v20 = vld [vmem:[#allocation5 + $0x218] sm:$0xff] }
 0x10b   :  { %1912 = vmatpush1.bf16.msra.mxu1 %v6552_v5  ;;  %v295_v5 = vld [vmem:[#allocation5 + $0x6b8] sm:$0xff] }
 0x10c   :  { %1913 = vmatprep.subr.bf16.mxu1 %v6545_v7  ;;  %v6616_v7 = vcombine.low %v299_v62, %v303_v58  ;;  %v6609_v9 = vcombine.high %v291_v4, %v295_v5  ;;  %v151_v21 = vld [vmem:[#allocation5 + $0x238] sm:$0xff]  ;;  %v6690_v62 = vcombine.low %v2000_v43, %v2004_v44  ;;  %v2120_v58 = vld [vmem:[#allocation7 + $0x500] sm:$0xff] }
 0x10d   :  { %1873 = vmatpush1.bf16.msra.mxu0 %v6416_v12  ;;  %v283_v12 = vld [vmem:[#allocation5 + $0x658] sm:$0xff]  ;;  %v6465_v26 = vcombine.high %v147_v20, %v151_v21  ;;  %v2212_v43 = vld [vmem:[#allocation7 + $0x7e0] sm:$0xff] }
 0x10e   :  { %1874 = vmatprep.subr.bf16.mxu0 %v6409_v14  ;;  %v6480_v14 = vcombine.low %v163_v2, %v167_v3  ;;  %v1984_v2 = vld [vmem:[#allocation7 + $0xc0] sm:$0xff] }
 0x10f   :  { %1914 = vmatpush1.bf16.msra.mxu1 %v6544_v13  ;;  %v287_v13 = vld [vmem:[#allocation5 + $0x678] sm:$0xff]  ;;  %v1988_v3 = vld [vmem:[#allocation7 + $0xe0] sm:$0xff] }
 0x110   :  { %1915 = vmatprep.subr.bf16.mxu1 %v6537_v15  ;;  %v6608_v15 = vcombine.low %v291_v4, %v295_v5  ;;  %v6601_v18 = vcombine.high %v283_v12, %v287_v13 }
 0x111   :  { %1875 = vmatpush1.bf16.msra.mxu0 %v6408_v22  ;;  %v275_v22 = vld [vmem:[#allocation5 + $0x618] sm:$0xff] }
 0x112   :  { %1876 = vmatprep.subr.bf16.mxu0 %v6401_v24  ;;  %v6472_v24 = vcombine.low %v155_v10, %v159_v11  ;;  %v6675_v10 = vcombine.high %v1984_v2, %v1988_v3  ;;  %v1976_v11 = vld [vmem:[#allocation7 + $0x80] sm:$0xff] }
 0x113   :  { %1916 = vmatpush1.bf16.msra.mxu1 %v6536_v23  ;;  %v279_v23 = vld [vmem:[#allocation5 + $0x638] sm:$0xff] }
 0x114   :  { %1917 = vmatprep.subr.bf16.mxu1 %v6529_v25  ;;  %v6600_v25 = vcombine.low %v283_v12, %v287_v13  ;;  %v6593_v27 = vcombine.high %v275_v22, %v279_v23  ;;  %v1980_v12 = vld [vmem:[#allocation7 + $0xa0] sm:$0xff] }
 0x115   :  { %1877 = vmatpush1.bf16.msra.mxu0 %v6400_v30  ;;  %v2144_v30 = vld [vmem:[#allocation7 + $0x5c0] sm:$0xff] }
 0x116   :  { %1878 = vmatprep.subr.bf16.mxu0 %v6521_v32  ;;  %v6464_v32 = vcombine.low %v147_v20, %v151_v21  ;;  %v6667_v20 = vcombine.high %v1976_v11, %v1980_v12  ;;  %v1968_v21 = vld [vmem:[#allocation7 + $0x40] sm:$0xff] }
 0x117   :  { %1918 = vmatpush1.bf16.msra.mxu1 %v6528_v31  ;;  %v2148_v31 = vld [vmem:[#allocation7 + $0x5e0] sm:$0xff] }
 0x118   :  { %1919 = vmatprep.subr.bf16.mxu1 %v6649_v33  ;;  %v6592_v33 = vcombine.low %v275_v22, %v279_v23  ;;  %v6835_v37 = vcombine.high %v2144_v30, %v2148_v31  ;;  %v6834_v42 = vcombine.low %v2144_v30, %v2148_v31  ;;  %v1972_v22 = vld [vmem:[#allocation7 + $0x60] sm:$0xff] }
 0x119   :  { %1879 = vmatpush2.bf16.msra.mxu0 %v6520_v38  ;;  %v2136_v38 = vld [vmem:[#allocation7 + $0x580] sm:$0xff] }
 0x11a   :  { %1880 = vmatprep.subr.bf16.mxu0 %v6513_v40  ;;  %v6706_v40 = vcombine.low %v2016_v28, %v2020_v29  ;;  %v6659_v28 = vcombine.high %v1968_v21, %v1972_v22  ;;  %v1960_v29 = vld [vmem:[#allocation7] sm:$0xff] }
 0x11b   :  { %1920 = vmatpush2.bf16.msra.mxu1 %v6648_v39  ;;  %v2140_v39 = vld [vmem:[#allocation7 + $0x5a0] sm:$0xff] }
 0x11c   :  { %1921 = vmatprep.subr.bf16.mxu1 %v6641_v41  ;;  %v6699_v41 = vcombine.high %v2008_v35, %v2012_v36  ;;  %v6827_v45 = vcombine.high %v2136_v38, %v2140_v39  ;;  %v6826_v53 = vcombine.low %v2136_v38, %v2140_v39  ;;  %v1964_v30 = vld [vmem:[#allocation7 + $0x20] sm:$0xff] }
 0x11d   :  { %1881 = vmatpush2.bf16.msra.mxu0 %v6512_v46  ;;  %v2092_v35 = vld [vmem:[#allocation7 + $0x420] sm:$0xff]  ;;  %v6651_v36 = vcombine.high %v1960_v29, %v1964_v30 }
 0x11e   :  { %1882 = vmatprep.subr.bf16.mxu0 %v6505_v48  ;;  %v2132_v48 = vld [vmem:[#allocation7 + $0x560] sm:$0xff] }
 0x11f   :  { %1922 = vmatpush2.bf16.msra.mxu1 %v6640_v47  ;;  %v2128_v47 = vld [vmem:[#allocation7 + $0x540] sm:$0xff] }
 0x120   :  { %1923 = vmatprep.subr.bf16.mxu1 %v6633_v49  ;;  %v6818_v4 = vcombine.low %v2128_v47, %v2132_v48  ;;  %v2084_v38 = vld [vmem:[#allocation7 + $0x3e0] sm:$0xff] }
 0x121   :  { %1883 = vmatpush2.bf16.msra.mxu0 %v6504_v54 }
 0x122   :  { %1884 = vmatprep.subr.bf16.mxu0 %v6497_v56  ;;  %v1996_v56 = vld [vmem:[#allocation7 + $0x120] sm:$0xff] }
 0x123   :  { %1924 = vmatpush2.bf16.msra.mxu1 %v6632_v55  ;;  %v1992_v55 = vld [vmem:[#allocation7 + $0x100] sm:$0xff] }
 0x124   :  { %1925 = vmatprep.subr.bf16.mxu1 %v6625_v57  ;;  %v6819_v57 = vcombine.high %v2128_v47, %v2132_v48  ;;  %v2076_v47 = vld [vmem:[#allocation7 + $0x3a0] sm:$0xff] }
 0x125   :  { %1885 = vmatpush2.bf16.msra.mxu0 %v6496_v63  ;;  %v2124_v63 = vld [vmem:[#allocation7 + $0x520] sm:$0xff] }
 0x126   :  { %1886 = vmatprep.subr.bf16.mxu0 %v6489_v0  ;;  %v6683_v0 = vcombine.high %v1992_v55, %v1996_v56  ;;  %v6810_v13 = vcombine.low %v2120_v58, %v2124_v63 }
 0x127   :  { %1926 = vmatpush2.bf16.msra.mxu1 %v6624_v59 }
 0x128   :  { %1927 = vmatprep.subr.bf16.mxu1 %v6617_v1 }
 0x129   :  { %1887 = vmatpush2.bf16.msra.mxu0 %v6488_v6  ;;  %v6811_v6 = vcombine.high %v2120_v58, %v2124_v63  ;;  %v2056_v63 = vld [vmem:[#allocation7 + $0x300] sm:$0xff] }
 0x12a   :  { %1888 = vmatprep.subr.bf16.mxu0 %v6481_v8  ;;  %v2112_v8 = vld [vmem:[#allocation7 + $0x4c0] sm:$0xff] }
 0x12b   :  { %1928 = vmatpush2.bf16.msra.mxu1 %v6616_v7  ;;  %v6682_v7 = vcombine.low %v1992_v55, %v1996_v56  ;;  %v2064_v55 = vld [vmem:[#allocation7 + $0x340] sm:$0xff] }
 0x12c   :  { %1929 = vmatprep.subr.bf16.mxu1 %v6609_v9  ;;  %v2116_v9 = vld [vmem:[#allocation7 + $0x4e0] sm:$0xff] }
 0x12d   :  { %1889 = vmatpush2.bf16.msra.mxu0 %v6480_v14  ;;  %v6803_v14 = vcombine.high %v2112_v8, %v2116_v9  ;;  %v6802_v23 = vcombine.low %v2112_v8, %v2116_v9  ;;  %v2068_v56 = vld [vmem:[#allocation7 + $0x360] sm:$0xff] }
 0x12e   :  { %1890 = vmatprep.subr.bf16.mxu0 %v6473_v17  ;;  %v2104_v17 = vld [vmem:[#allocation7 + $0x480] sm:$0xff]  ;;  %v6755_v58 = vcombine.high %v2064_v55, %v2068_v56 }
 0x12f   :  { %1930 = vmatpush2.bf16.msra.mxu1 %v6608_v15  ;;  %v6674_v15 = vcombine.low %v1984_v2, %v1988_v3  ;;  %v2184_v2 = vld [vmem:[#allocation7 + $0x700] sm:$0xff] }
 0x130   :  { %1931 = vmatprep.subr.bf16.mxu1 %v6601_v18  ;;  %v2108_v18 = vld [vmem:[#allocation7 + $0x4a0] sm:$0xff] }
 0x131   :  { %1891 = vmatpush2.bf16.msra.mxu0 %v6472_v24  ;;  %v6795_v24 = vcombine.high %v2104_v17, %v2108_v18  ;;  %v6794_v31 = vcombine.low %v2104_v17, %v2108_v18  ;;  %v2188_v3 = vld [vmem:[#allocation7 + $0x720] sm:$0xff] }
 0x132   :  { %1892 = vmatprep.subr.bf16.mxu0 %v6465_v26  ;;  %v2096_v26 = vld [vmem:[#allocation7 + $0x440] sm:$0xff]  ;;  %v6875_v9 = vcombine.high %v2184_v2, %v2188_v3  ;;  %v6874_v17 = vcombine.low %v2184_v2, %v2188_v3 }
 0x133   :  { %1932 = vmatpush2.bf16.msra.mxu1 %v6600_v25  ;;  %v6666_v25 = vcombine.low %v1976_v11, %v1980_v12  ;;  %v2176_v11 = vld [vmem:[#allocation7 + $0x6c0] sm:$0xff] }
 0x134   :  { %1933 = vmatprep.subr.bf16.mxu1 %v6593_v27  ;;  %v2100_v27 = vld [vmem:[#allocation7 + $0x460] sm:$0xff] }
 0x135   :  { %1893 = vmatpush2.bf16.msra.mxu0 %v6464_v32  ;;  %v6787_v32 = vcombine.high %v2096_v26, %v2100_v27  ;;  %v6786_v39 = vcombine.low %v2096_v26, %v2100_v27  ;;  %v2180_v12 = vld [vmem:[#allocation7 + $0x6e0] sm:$0xff] }
 0x136   :  { %5032 = vmatprep.subr.bf16.mxu0 %v6707_v34  ;;  %v2088_v34 = vld [vmem:[#allocation7 + $0x400] sm:$0xff]  ;;  %v6867_v18 = vcombine.high %v2176_v11, %v2180_v12  ;;  %v6866_v26 = vcombine.low %v2176_v11, %v2180_v12 }
 0x137   :  { %1934 = vmatpush2.bf16.msra.mxu1 %v6592_v33  ;;  %v6658_v33 = vcombine.low %v1968_v21, %v1972_v22  ;;  %v6778_v48 = vcombine.low %v2088_v34, %v2092_v35  ;;  %v2168_v21 = vld [vmem:[#allocation7 + $0x680] sm:$0xff] }
 0x138   :  { %5073 = vmatprep.subr.bf16.mxu1 %v6835_v37  ;;  %v7563_v46 = vpop.f32.mrf.mxu0  ;;  %1895 = vmatmul.mubr.bf16.vlgmr.msra.gmra.mxu0 %v7547_v16  ;;  %v2080_v37 = vld [vmem:[#allocation7 + $0x3c0] sm:$0xff] }
 0x139   :  { %5033 = vmatpush1.bf16.msra.mxu0 %v6706_v40  ;;  %v6779_v40 = vcombine.high %v2088_v34, %v2092_v35  ;;  %v6771_v44 = vcombine.high %v2080_v37, %v2084_v38  ;;  %v2172_v22 = vld [vmem:[#allocation7 + $0x6a0] sm:$0xff] }
 0x13a   :  { %v7566_v49 = vpop.f32.mrf.mxu1  ;;  %1936 = vmatmul.mubr.bf16.vlgmr.msra.gmra.mxu1 %v7549_v19  ;;  %v1652_v51 = vpop.f32.mrf.mxu0  ;;  %5034 = vmatprep.subr.bf16.mxu0 %v6699_v41  ;;  %v6650_v41 = vcombine.low %v1960_v29, %v1964_v30  ;;  %v6859_v27 = vcombine.high %v2168_v21, %v2172_v22  ;;  %v2160_v29 = vld [vmem:[#allocation7 + $0x640] sm:$0xff]  ;;  %v6858_v34 = vcombine.low %v2168_v21, %v2172_v22  ;;  %v7589_v21 = vld [vmem:[#allocation7 + $0x5e8] sm:$0xff] }
 0x13b   :  { %5074 = vmatpush1.bf16.msra.mxu1 %v6834_v42  ;;  %v2208_v42 = vld [vmem:[#allocation7 + $0x7c0] sm:$0xff] }
 0x13c   :  { %v1693_v54 = vpop.f32.mrf.mxu1  ;;  %5075 = vmatprep.subr.bf16.mxu1 %v6827_v45  ;;  %v1654_v16 = vpop.f32.mrf.mxu0  ;;  %v2072_v45 = vld [vmem:[#allocation7 + $0x380] sm:$0xff] }
 0x13d   :  { %v1694_v60 = vadd.f32 %v1693_v54, %v1652_v51  ;;  %5035 = vmatpush1.bf16.msra.mxu0 %v6698_v50  ;;  %v6899_v50 = vcombine.high %v2208_v42, %v2212_v43  ;;  %v6770_v51 = vcombine.low %v2080_v37, %v2084_v38  ;;  %v6763_v54 = vcombine.high %v2072_v45, %v2076_v47  ;;  %v2164_v30 = vld [vmem:[#allocation7 + $0x660] sm:$0xff] }
 0x13e   :  { %v1695_v61 = vpop.f32.mrf.mxu1  ;;  %v1655_v59 = vpop.f32.mrf.mxu0  ;;  %5036 = vmatprep.subr.bf16.mxu0 %v6691_v52  ;;  %v2200_v52 = vld [vmem:[#allocation7 + $0x780] sm:$0xff]  ;;  %v6762_v16 = vcombine.low %v2072_v45, %v2076_v47  ;;  %v6851_v35 = vcombine.high %v2160_v29, %v2164_v30 }
 0x13f   :  { %v1945_v19 = vmax.f32 %v1694_v60, 0.0  ;;  %5076 = vmatpush1.bf16.msra.mxu1 %v6826_v53  ;;  %v2204_v53 = vld [vmem:[#allocation7 + $0x7a0] sm:$0xff] }
 0x140   :  { %v1696_v1 = vpop.f32.mrf.mxu1  ;;  %5077 = vmatprep.subr.bf16.mxu1 %v6819_v57  ;;  %v6898_v57 = vcombine.low %v2208_v42, %v2212_v43  ;;  %v6891_v60 = vcombine.high %v2200_v52, %v2204_v53  ;;  %v2192_v61 = vld [vmem:[#allocation7 + $0x740] sm:$0xff]  ;;  %v6890_v59 = vcombine.low %v2200_v52, %v2204_v53 }
 0x141   :  { %v7569_v5 = vpack.c.bf16 %v1945_v19, %v1945_v19  ;;  %5037 = vmatpush1.bf16.msra.mxu0 %v6690_v62  ;;  %v2196_v62 = vld [vmem:[#allocation7 + $0x760] sm:$0xff]  ;;  %v6754_v1 = vcombine.low %v2064_v55, %v2068_v56 }
 0x142   :  { %5038 = vmatprep.subr.bf16.mxu0 %v6683_v0  ;;  %v2060_v19 = vld [vmem:[#allocation7 + $0x320] sm:$0xff]  ;;  %v6883_v0 = vcombine.high %v2192_v61, %v2196_v62  ;;  %v6882_v8 = vcombine.low %v2192_v61, %v2196_v62 }
 0x143   :  { %5064 = vmatprep.mubr.bf16.mxu0 %v7569_v5  ;;  %5078 = vmatpush1.bf16.msra.mxu1 %v6818_v4  ;;  %v6747_v4 = vcombine.high %v2056_v63, %v2060_v19  ;;  %v2152_v37 = vld [vmem:[#allocation7 + $0x600] sm:$0xff] }
 0x144   :  { %5079 = vmatprep.subr.bf16.mxu1 %v6811_v6  ;;  %v2048_v6 = vld [vmem:[#allocation7 + $0x2c0] sm:$0xff] }
 0x145   :  { %5039 = vmatpush1.bf16.msra.mxu0 %v6682_v7  ;;  %v2052_v7 = vld [vmem:[#allocation7 + $0x2e0] sm:$0xff] }
 0x146   :  { %5040 = vmatprep.subr.bf16.mxu0 %v6675_v10  ;;  %v6746_v10 = vcombine.low %v2056_v63, %v2060_v19  ;;  %v2156_v38 = vld [vmem:[#allocation7 + $0x620] sm:$0xff] }
 0x147   :  { %5080 = vmatpush1.bf16.msra.mxu1 %v6810_v13  ;;  %v6739_v13 = vcombine.high %v2048_v6, %v2052_v7  ;;  %v2272_v42 = vld [vmem:[#allocation7 + $0x9c0] sm:$0xff]  ;;  %v6842_v52 = vcombine.low %v2152_v37, %v2156_v38 }
 0x148   :  { %5081 = vmatprep.subr.bf16.mxu1 %v6803_v14  ;;  %v2040_v14 = vld [vmem:[#allocation7 + $0x280] sm:$0xff] }
 0x149   :  { %5041 = vmatpush1.bf16.msra.mxu0 %v6674_v15  ;;  %v2044_v15 = vld [vmem:[#allocation7 + $0x2a0] sm:$0xff] }
 0x14a   :  { %5042 = vmatprep.subr.bf16.mxu0 %v6667_v20  ;;  %v6738_v20 = vcombine.low %v2048_v6, %v2052_v7  ;;  %v2276_v43 = vld [vmem:[#allocation7 + $0x9e0] sm:$0xff] }
 0x14b   :  { %5082 = vmatpush1.bf16.msra.mxu1 %v6802_v23  ;;  %v6731_v23 = vcombine.high %v2040_v14, %v2044_v15  ;;  %v7574_v47 = vld [vmem:[#allocation7 + $0xdc0] sm:$0xff] }
 0x14c   :  { %5083 = vmatprep.subr.bf16.mxu1 %v6795_v24  ;;  %v2032_v24 = vld [vmem:[#allocation7 + $0x240] sm:$0xff] }
 0x14d   :  { %5043 = vmatpush1.bf16.msra.mxu0 %v6666_v25  ;;  %v2036_v25 = vld [vmem:[#allocation7 + $0x260] sm:$0xff] }
 0x14e   :  { %5044 = vmatprep.subr.bf16.mxu0 %v6659_v28  ;;  %v6730_v28 = vcombine.low %v2040_v14, %v2044_v15  ;;  %v2392_v11 = vld [vmem:[#allocation7 + $0xd80] sm:$0xff] }
 0x14f   :  { %5084 = vmatpush1.bf16.msra.mxu1 %v6794_v31  ;;  %v6723_v31 = vcombine.high %v2032_v24, %v2036_v25  ;;  %v2396_v12 = vld [vmem:[#allocation7 + $0xda0] sm:$0xff] }
 0x150   :  { %5085 = vmatprep.subr.bf16.mxu1 %v6787_v32  ;;  %v2024_v32 = vld [vmem:[#allocation7 + $0x200] sm:$0xff] }
 0x151   :  { %5045 = vmatpush1.bf16.msra.mxu0 %v6658_v33  ;;  %v2028_v33 = vld [vmem:[#allocation7 + $0x220] sm:$0xff] }
 0x152   :  { %5046 = vmatprep.subr.bf16.mxu0 %v6651_v36  ;;  %v6722_v36 = vcombine.low %v2032_v24, %v2036_v25  ;;  %v6714_v45 = vcombine.low %v2024_v32, %v2028_v33  ;;  %v2240_v14 = vld [vmem:[#allocation7 + $0x8c0] sm:$0xff]  ;;  %v7083_v24 = vcombine.high %v2392_v11, %v2396_v12 }
 0x153   :  { %5086 = vmatpush1.bf16.msra.mxu1 %v6786_v39  ;;  %v1692_v39 = vadd.f32 %v7566_v49, %v7563_v46  ;;  %v2264_v46 = vld [vmem:[#allocation7 + $0x980] sm:$0xff] }
 0x154   :  { %5087 = vmatprep.subr.bf16.mxu1 %v6779_v40  ;;  %v6715_v40 = vcombine.high %v2024_v32, %v2028_v33  ;;  %v2268_v49 = vld [vmem:[#allocation7 + $0x9a0] sm:$0xff] }
 0x155   :  { %5047 = vmatpush1.bf16.msra.mxu0 %v6650_v41  ;;  %v6850_v41 = vcombine.low %v2160_v29, %v2164_v30  ;;  %v6955_v56 = vcombine.high %v2264_v46, %v2268_v49  ;;  %v6954_v62 = vcombine.low %v2264_v46, %v2268_v49  ;;  %v2244_v15 = vld [vmem:[#allocation7 + $0x8e0] sm:$0xff] }
 0x156   :  { %5048 = vmatprep.subr.bf16.mxu0 %v6771_v44  ;;  %v6843_v44 = vcombine.high %v2152_v37, %v2156_v38  ;;  %v6931_v25 = vcombine.high %v2240_v14, %v2244_v15  ;;  %v2232_v29 = vld [vmem:[#allocation7 + $0x880] sm:$0xff]  ;;  %v6930_v32 = vcombine.low %v2240_v14, %v2244_v15 }
 0x157   :  { %5088 = vmatpush1.bf16.msra.mxu1 %v6778_v48  ;;  %v7576_v48 = vld [vmem:[#allocation7 + $0xde0] sm:$0xff] }
 0x158   :  { %5089 = vmatprep.subr.bf16.mxu1 %v6899_v50  ;;  %v1944_v50 = vmax.f32 %v1692_v39, 0.0  ;;  %v7091_v53 = vcombine.high %v7574_v47, %v7576_v48  ;;  %v2236_v30 = vld [vmem:[#allocation7 + $0x8a0] sm:$0xff] }
 0x159   :  { %5049 = vmatpush2.bf16.msra.mxu0 %v6770_v51  ;;  %v6963_v51 = vcombine.high %v2272_v42, %v2276_v43  ;;  %v2224_v37 = vld [vmem:[#allocation7 + $0x840] sm:$0xff] }
 0x15a   :  { %5050 = vmatprep.subr.bf16.mxu0 %v6763_v54  ;;  %v6962_v54 = vcombine.low %v2272_v42, %v2276_v43  ;;  %v7580_v55 = vpack.c.bf16 %v1944_v50, %v1944_v50  ;;  %v2228_v38 = vld [vmem:[#allocation7 + $0x860] sm:$0xff] }
 0x15b   :  { %5090 = vmatpush2.bf16.msra.mxu1 %v6898_v57  ;;  %v2256_v57 = vld [vmem:[#allocation7 + $0x940] sm:$0xff]  ;;  %v6915_v42 = vcombine.high %v2224_v37, %v2228_v38  ;;  %v6914_v50 = vcombine.low %v2224_v37, %v2228_v38 }
 0x15c   :  { %5091 = vmatprep.subr.bf16.mxu1 %v6891_v60  ;;  %v2260_v60 = vld [vmem:[#allocation7 + $0x960] sm:$0xff] }
 0x15d   :  { %5051 = vmatpush2.bf16.msra.mxu0 %v6762_v16  ;;  %v6947_v19 = vcombine.high %v2256_v57, %v2260_v60  ;;  %v6946_v7 = vcombine.low %v2256_v57, %v2260_v60  ;;  %v2368_v43 = vld [vmem:[#allocation7 + $0xcc0] sm:$0xff] }
 0x15e   :  { %5052 = vmatprep.subr.bf16.mxu0 %v6755_v58  ;;  %v2360_v46 = vld [vmem:[#allocation7 + $0xc80] sm:$0xff] }
 0x15f   :  { %5092 = vmatpush2.bf16.msra.mxu1 %v6890_v59  ;;  %v2364_v49 = vld [vmem:[#allocation7 + $0xca0] sm:$0xff] }
 0x160   :  { %5093 = vmatprep.subr.bf16.mxu1 %v6883_v0  ;;  %v2248_v0 = vld [vmem:[#allocation7 + $0x900] sm:$0xff]  ;;  %v7051_v60 = vcombine.high %v2360_v46, %v2364_v49 }
 0x161   :  { %5053 = vmatpush2.bf16.msra.mxu0 %v6754_v1  ;;  %v2252_v1 = vld [vmem:[#allocation7 + $0x920] sm:$0xff] }
 0x162   :  { %5054 = vmatprep.subr.bf16.mxu0 %v6747_v4  ;;  %v2316_v14 = vld [vmem:[#allocation7 + $0xb20] sm:$0xff] }
 0x163   :  { %5094 = vmatpush2.bf16.msra.mxu1 %v6882_v8  ;;  %v2300_v37 = vld [vmem:[#allocation7 + $0xaa0] sm:$0xff] }
 0x164   :  { %5095 = vmatprep.subr.bf16.mxu1 %v6875_v9 }
 0x165   :  { %5055 = vmatpush2.bf16.msra.mxu0 %v6746_v10  ;;  %v6939_v10 = vcombine.high %v2248_v0, %v2252_v1 }
 0x166   :  { %5056 = vmatprep.subr.bf16.mxu0 %v6739_v13 }
 0x167   :  { %5096 = vmatpush2.bf16.msra.mxu1 %v6874_v17 }
 0x168   :  { %5097 = vmatprep.subr.bf16.mxu1 %v6867_v18  ;;  %v7090_v18 = vcombine.low %v7574_v47, %v7576_v48  ;;  %v2220_v47 = vld [vmem:[#allocation7 + $0x820] sm:$0xff] }
 0x169   :  { %5057 = vmatpush2.bf16.msra.mxu0 %v6738_v20  ;;  %v7587_v20 = vld [vmem:[#allocation7 + $0x5c8] sm:$0xff] }
 0x16a   :  { %5058 = vmatprep.subr.bf16.mxu0 %v6731_v23  ;;  %v6938_v23 = vcombine.low %v2248_v0, %v2252_v1 }
 0x16b   :  { %5098 = vmatpush2.bf16.msra.mxu1 %v6866_v26  ;;  %v2384_v26 = vld [vmem:[#allocation7 + $0xd40] sm:$0xff] }
 0x16c   :  { %5099 = vmatprep.subr.bf16.mxu1 %v6859_v27  ;;  %v2388_v27 = vld [vmem:[#allocation7 + $0xd60] sm:$0xff] }
 0x16d   :  { %5059 = vmatpush2.bf16.msra.mxu0 %v6730_v28  ;;  %v6836_v28 = vcombine.low %v7587_v20, %v7589_v21  ;;  %v7075_v33 = vcombine.high %v2384_v26, %v2388_v27  ;;  %v7074_v39 = vcombine.low %v2384_v26, %v2388_v27  ;;  %v2460_v26 = vld [vmem:[#allocation7 + $0xfa0] sm:$0xff] }
 0x16e   :  { %5060 = vmatprep.subr.bf16.mxu0 %v6723_v31  ;;  %v7082_v31 = vcombine.low %v2392_v11, %v2396_v12  ;;  %v2464_v11 = vld [vmem:[#allocation7 + $0xfc0] sm:$0xff] }
 0x16f   :  { %5100 = vmatpush2.bf16.msra.mxu1 %v6858_v34  ;;  %v6923_v34 = vcombine.high %v2232_v29, %v2236_v30  ;;  %v2468_v12 = vld [vmem:[#allocation7 + $0xfe0] sm:$0xff] }
 0x170   :  { %5101 = vmatprep.subr.bf16.mxu1 %v6851_v35  ;;  %v2376_v35 = vld [vmem:[#allocation7 + $0xd00] sm:$0xff] }
 0x171   :  { %5061 = vmatpush2.bf16.msra.mxu0 %v6722_v36  ;;  %v2380_v36 = vld [vmem:[#allocation7 + $0xd20] sm:$0xff] }
 0x172   :  { %5062 = vmatprep.subr.bf16.mxu0 %v6715_v40  ;;  %v6922_v40 = vcombine.low %v2232_v29, %v2236_v30  ;;  %v7066_v48 = vcombine.low %v2376_v35, %v2380_v36  ;;  %v2304_v27 = vld [vmem:[#allocation7 + $0xac0] sm:$0xff]  ;;  %v7154_v30 = vcombine.low %v2464_v11, %v2468_v12 }
 0x173   :  { %5102 = vmatpush2.bf16.msra.mxu1 %v6850_v41  ;;  %v7067_v41 = vcombine.high %v2376_v35, %v2380_v36  ;;  %v2308_v29 = vld [vmem:[#allocation7 + $0xae0] sm:$0xff] }
 0x174   :  { %5103 = vmatprep.subr.bf16.mxu1 %v6843_v44  ;;  %v2372_v44 = vld [vmem:[#allocation7 + $0xce0] sm:$0xff] }
 0x175   :  { %5063 = vmatpush2.bf16.msra.mxu0 %v6714_v45  ;;  %v2216_v45 = vld [vmem:[#allocation7 + $0x800] sm:$0xff] }
 0x176   :  { %5114 = vmatprep.subr.bf16.mxu0 %v6963_v51  ;;  %v7059_v51 = vcombine.high %v2368_v43, %v2372_v44  ;;  %v6906_v57 = vcombine.low %v2216_v45, %v2220_v47  ;;  %v2452_v35 = vld [vmem:[#allocation7 + $0xf60] sm:$0xff] }
 0x177   :  { %5104 = vmatpush2.bf16.msra.mxu1 %v6842_v52  ;;  %v6907_v52 = vcombine.high %v2216_v45, %v2220_v47  ;;  %v2296_v36 = vld [vmem:[#allocation7 + $0xa80] sm:$0xff] }
 0x178   :  { %v1732_v16 = vpop.f32.mrf.mxu0  ;;  %5065 = vmatmul.mubr.bf16.vlgmr.msra.gmra.mxu0 %v7580_v55  ;;  %5155 = vmatprep.subr.bf16.mxu1 %v7091_v53  ;;  %v2336_v53 = vld [vmem:[#allocation7 + $0xbc0] sm:$0xff] }
 0x179   :  { %5115 = vmatpush1.bf16.msra.mxu0 %v6962_v54  ;;  %v2340_v54 = vld [vmem:[#allocation7 + $0xbe0] sm:$0xff] }
 0x17a   :  { %v1773_v61 = vpop.f32.mrf.mxu1  ;;  %v1734_v63 = vpop.f32.mrf.mxu0  ;;  %5116 = vmatprep.subr.bf16.mxu0 %v6955_v56  ;;  %v7058_v56 = vcombine.low %v2368_v43, %v2372_v44  ;;  %v2444_v43 = vld [vmem:[#allocation7 + $0xf20] sm:$0xff] }
 0x17b   :  { %v1774_v58 = vadd.f32 %v1773_v61, %v1732_v16  ;;  %v7027_v16 = vcombine.high %v2336_v53, %v2340_v54  ;;  %v2352_v61 = vld [vmem:[#allocation7 + $0xc40] sm:$0xff] }
 0x17c   :  { %v1775_v59 = vpop.f32.mrf.mxu1  ;;  %v1736_v3 = vpop.f32.mrf.mxu0  ;;  %v2288_v44 = vld [vmem:[#allocation7 + $0xa40] sm:$0xff] }
 0x17d   :  { %v1776_v2 = vadd.f32 %v1775_v59, %v1734_v63  ;;  %v1946_v4 = vmax.f32 %v1774_v58, 0.0  ;;  %5117 = vmatpush1.bf16.msra.mxu0 %v6954_v62  ;;  %v2356_v62 = vld [vmem:[#allocation7 + $0xc60] sm:$0xff]  ;;  %v7026_v59 = vcombine.low %v2336_v53, %v2340_v54 }
 0x17e   :  { %v1777_v6 = vpop.f32.mrf.mxu1  ;;  %v1737_v9 = vpop.f32.mrf.mxu0  ;;  %5118 = vmatprep.subr.bf16.mxu0 %v6947_v19  ;;  %v2328_v58 = vld [vmem:[#allocation7 + $0xb80] sm:$0xff]  ;;  %v7050_v19 = vcombine.low %v2360_v46, %v2364_v49  ;;  %v7043_v0 = vcombine.high %v2352_v61, %v2356_v62 }
 0x17f   :  { %v1947_v8 = vmax.f32 %v1776_v2, 0.0  ;;  %v7591_v22 = vpack.c.bf16 %v1946_v4, %v1946_v4  ;;  %v2332_v63 = vld [vmem:[#allocation7 + $0xba0] sm:$0xff] }
 0x180   :  { %v1778_v13 = vpop.f32.mrf.mxu1  ;;  %v7019_v1 = vcombine.high %v2328_v58, %v2332_v63  ;;  %v2344_v2 = vld [vmem:[#allocation7 + $0xc00] sm:$0xff] }
 0x181   :  { %v7583_v17 = vpack.c.bf16 %v1947_v8, %v1947_v8  ;;  %5119 = vmatpush1.bf16.msra.mxu0 %v6946_v7  ;;  %v2348_v3 = vld [vmem:[#allocation7 + $0xc20] sm:$0xff]  ;;  %v7042_v7 = vcombine.low %v2352_v61, %v2356_v62  ;;  %v7018_v8 = vcombine.low %v2328_v58, %v2332_v63  ;;  %v2017_v62 = vld [vmem:[#allocation7 + $0x1c8] sm:$0xff] }
 0x182   :  { %5120 = vmatprep.subr.bf16.mxu0 %v6939_v10  ;;  %v2320_v4 = vld [vmem:[#allocation7 + $0xb40] sm:$0xff]  ;;  %v7035_v9 = vcombine.high %v2344_v2, %v2348_v3  ;;  %v7034_v15 = vcombine.low %v2344_v2, %v2348_v3  ;;  %v2021_v58 = vld [vmem:[#allocation7 + $0x1e8] sm:$0xff] }
 0x183   :  { %5105 = vmatprep.mubr.bf16.mxu1 %v7583_v17  ;;  %v2324_v6 = vld [vmem:[#allocation7 + $0xb60] sm:$0xff] }
 0x184   :  { %5106 = vmatmul.mubr.bf16.vlgmr.msra.gmra.mxu1 %v7591_v22  ;;  %v7011_v10 = vcombine.high %v2320_v4, %v2324_v6  ;;  %v2312_v13 = vld [vmem:[#allocation7 + $0xb00] sm:$0xff] }
 0x185   :  { %5156 = vmatpush1.bf16.msra.mxu1 %v7090_v18  ;;  %5121 = vmatpush1.bf16.msra.mxu0 %v6938_v23  ;;  %v7010_v18 = vcombine.low %v2320_v4, %v2324_v6  ;;  %v7155_v23 = vcombine.high %v2464_v11, %v2468_v12  ;;  %v2292_v45 = vld [vmem:[#allocation7 + $0xa60] sm:$0xff] }
 0x186   :  { %5157 = vmatprep.subr.bf16.mxu1 %v7083_v24  ;;  %5122 = vmatprep.subr.bf16.mxu0 %v6931_v25  ;;  %v7003_v24 = vcombine.high %v2312_v13, %v2316_v14  ;;  %v2456_v25 = vld [vmem:[#allocation7 + $0xf80] sm:$0xff] }
 0x187   :  { %v7146_v38 = vcombine.low %v2456_v25, %v2460_v26  ;;  %v2436_v46 = vld [vmem:[#allocation7 + $0xee0] sm:$0xff] }
 0x188   :  { %v2280_v49 = vld [vmem:[#allocation7 + $0xa00] sm:$0xff] }
 0x189   :  { %5158 = vmatpush1.bf16.msra.mxu1 %v7082_v31  ;;  %5123 = vmatpush1.bf16.msra.mxu0 %v6930_v32  ;;  %v7002_v31 = vcombine.low %v2312_v13, %v2316_v14  ;;  %v7147_v32 = vcombine.high %v2456_v25, %v2460_v26  ;;  %v2284_v53 = vld [vmem:[#allocation7 + $0xa20] sm:$0xff]  ;;  %v6837_v26 = vcombine.high %v7587_v20, %v7589_v21 }
 0x18a   :  { %5159 = vmatprep.subr.bf16.mxu1 %v7075_v33  ;;  %5124 = vmatprep.subr.bf16.mxu0 %v6923_v34  ;;  %v6995_v33 = vcombine.high %v2304_v27, %v2308_v29  ;;  %v2448_v34 = vld [vmem:[#allocation7 + $0xf40] sm:$0xff] }
 0x18b   :  { %v7138_v47 = vcombine.low %v2448_v34, %v2452_v35  ;;  %v2428_v61 = vld [vmem:[#allocation7 + $0xea0] sm:$0xff] }
 0x18c   :  { %v2420_v2 = vld [vmem:[#allocation7 + $0xe60] sm:$0xff] }
 0x18d   :  { %5160 = vmatpush1.bf16.msra.mxu1 %v7074_v39  ;;  %5125 = vmatpush1.bf16.msra.mxu0 %v6922_v40  ;;  %v6994_v39 = vcombine.low %v2304_v27, %v2308_v29  ;;  %v7139_v40 = vcombine.high %v2448_v34, %v2452_v35  ;;  %v2408_v6 = vld [vmem:[#allocation7 + $0xe00] sm:$0xff]  ;;  %v6708_v34 = vcombine.low %v2017_v62, %v2021_v58 }
 0x18e   :  { %5161 = vmatprep.subr.bf16.mxu1 %v7067_v41  ;;  %5126 = vmatprep.subr.bf16.mxu0 %v6915_v42  ;;  %v6987_v41 = vcombine.high %v2296_v36, %v2300_v37  ;;  %v2440_v42 = vld [vmem:[#allocation7 + $0xf00] sm:$0xff] }
 0x18f   :  { %v7130_v54 = vcombine.low %v2440_v42, %v2444_v43 }
 0x191   :  { %5162 = vmatpush1.bf16.msra.mxu1 %v7066_v48  ;;  %5127 = vmatpush1.bf16.msra.mxu0 %v6914_v50  ;;  %v6986_v48 = vcombine.low %v2296_v36, %v2300_v37  ;;  %v7131_v50 = vcombine.high %v2440_v42, %v2444_v43  ;;  %v2001_v37 = vld [vmem:[#allocation7 + $0x148] sm:$0xff] }
 0x192   :  { %5163 = vmatprep.subr.bf16.mxu1 %v7059_v51  ;;  %5128 = vmatprep.subr.bf16.mxu0 %v6907_v52  ;;  %v6979_v51 = vcombine.high %v2288_v44, %v2292_v45  ;;  %v2432_v52 = vld [vmem:[#allocation7 + $0xec0] sm:$0xff]  ;;  %v1997_v42 = vld [vmem:[#allocation7 + $0x128] sm:$0xff] }
 0x193   :  { %v7122_v63 = vcombine.low %v2432_v52, %v2436_v46 }
 0x195   :  { %5164 = vmatpush1.bf16.msra.mxu1 %v7058_v56  ;;  %5129 = vmatpush1.bf16.msra.mxu0 %v6906_v57  ;;  %v6978_v56 = vcombine.low %v2288_v44, %v2292_v45  ;;  %v7123_v57 = vcombine.high %v2432_v52, %v2436_v46  ;;  %v1985_v45 = vld [vmem:[#allocation7 + $0xc8] sm:$0xff] }
 0x196   :  { %5165 = vmatprep.subr.bf16.mxu1 %v7051_v60  ;;  %5130 = vmatprep.subr.bf16.mxu0 %v7027_v16  ;;  %v6971_v60 = vcombine.high %v2280_v49, %v2284_v53  ;;  %v2424_v16 = vld [vmem:[#allocation7 + $0xe80] sm:$0xff]  ;;  %v1981_v52 = vld [vmem:[#allocation7 + $0xa8] sm:$0xff] }
 0x197   :  { %v7114_v3 = vcombine.low %v2424_v16, %v2428_v61 }
 0x199   :  { %5166 = vmatpush1.bf16.msra.mxu1 %v7050_v19  ;;  %5131 = vmatpush2.bf16.msra.mxu0 %v7026_v59  ;;  %v6970_v19 = vcombine.low %v2280_v49, %v2284_v53  ;;  %v7115_v59 = vcombine.high %v2424_v16, %v2428_v61  ;;  %v1969_v53 = vld [vmem:[#allocation7 + $0x48] sm:$0xff] }
 0x19a   :  { %5167 = vmatprep.subr.bf16.mxu1 %v7043_v0  ;;  %5132 = vmatprep.subr.bf16.mxu0 %v7019_v1  ;;  %v6709_v0 = vcombine.high %v2017_v62, %v2021_v58  ;;  %v2416_v1 = vld [vmem:[#allocation7 + $0xe40] sm:$0xff]  ;;  %v1965_v16 = vld [vmem:[#allocation7 + $0x28] sm:$0xff] }
 0x19b   :  { %v7107_v4 = vcombine.high %v2416_v1, %v2420_v2  ;;  %v2081_v58 = vld [vmem:[#allocation7 + $0x3c8] sm:$0xff] }
 0x19d   :  { %5168 = vmatpush1.bf16.msra.mxu1 %v7042_v7  ;;  %5133 = vmatpush2.bf16.msra.mxu0 %v7018_v8  ;;  %v2412_v7 = vld [vmem:[#allocation7 + $0xe20] sm:$0xff] }
 0x19e   :  { %5169 = vmatprep.subr.bf16.mxu1 %v7035_v9  ;;  %5134 = vmatprep.subr.bf16.mxu0 %v7011_v10  ;;  %v7106_v9 = vcombine.low %v2416_v1, %v2420_v2  ;;  %v7099_v11 = vcombine.high %v2408_v6, %v2412_v7  ;;  %v2077_v1 = vld [vmem:[#allocation7 + $0x3a8] sm:$0xff] }
 0x1a1   :  { %5170 = vmatpush1.bf16.msra.mxu1 %v7034_v15  ;;  %5135 = vmatpush2.bf16.msra.mxu0 %v7010_v18 }
 0x1a2   :  { %5171 = vmatprep.subr.bf16.mxu1 %v7155_v23  ;;  %5136 = vmatprep.subr.bf16.mxu0 %v7003_v24  ;;  %v7098_v23 = vcombine.low %v2408_v6, %v2412_v7  ;;  %v2069_v6 = vld [vmem:[#allocation7 + $0x368] sm:$0xff] }
 0x1a5   :  { %5172 = vmatpush2.bf16.msra.mxu1 %v7154_v30  ;;  %5137 = vmatpush2.bf16.msra.mxu0 %v7002_v31  ;;  %v2009_v30 = vld [vmem:[#allocation7 + $0x188] sm:$0xff] }
 0x1a6   :  { %5173 = vmatprep.subr.bf16.mxu1 %v7147_v32  ;;  %5138 = vmatprep.subr.bf16.mxu0 %v6995_v33  ;;  %v2013_v31 = vld [vmem:[#allocation7 + $0x1a8] sm:$0xff] }
 0x1a7   :  { %v6701_v36 = vcombine.high %v2009_v30, %v2013_v31 }
 0x1a9   :  { %5174 = vmatpush2.bf16.msra.mxu1 %v7146_v38  ;;  %5139 = vmatpush2.bf16.msra.mxu0 %v6994_v39  ;;  %v2005_v38 = vld [vmem:[#allocation7 + $0x168] sm:$0xff]  ;;  %v6700_v39 = vcombine.low %v2009_v30, %v2013_v31 }
 0x1aa   :  { %5175 = vmatprep.subr.bf16.mxu1 %v7139_v40  ;;  %5140 = vmatprep.subr.bf16.mxu0 %v6987_v41  ;;  %v6693_v40 = vcombine.high %v2001_v37, %v2005_v38  ;;  %v1993_v41 = vld [vmem:[#allocation7 + $0x108] sm:$0xff]  ;;  %v6692_v43 = vcombine.low %v2001_v37, %v2005_v38 }
 0x1ab   :  { %v6685_v44 = vcombine.high %v1993_v41, %v1997_v42 }
 0x1ad   :  { %5176 = vmatpush2.bf16.msra.mxu1 %v7138_v47  ;;  %5141 = vmatpush2.bf16.msra.mxu0 %v6986_v48  ;;  %v1989_v47 = vld [vmem:[#allocation7 + $0xe8] sm:$0xff]  ;;  %v6684_v48 = vcombine.low %v1993_v41, %v1997_v42 }
 0x1ae   :  { %5177 = vmatprep.subr.bf16.mxu1 %v7131_v50  ;;  %5142 = vmatprep.subr.bf16.mxu0 %v6979_v51  ;;  %v6677_v50 = vcombine.high %v1985_v45, %v1989_v47  ;;  %v1977_v51 = vld [vmem:[#allocation7 + $0x88] sm:$0xff]  ;;  %v6676_v46 = vcombine.low %v1985_v45, %v1989_v47 }
 0x1af   :  { %v6669_v49 = vcombine.high %v1977_v51, %v1981_v52  ;;  %v2273_v42 = vld [vmem:[#allocation7 + $0x9c8] sm:$0xff] }
 0x1b1   :  { %5178 = vmatpush2.bf16.msra.mxu1 %v7130_v54  ;;  %5143 = vmatpush2.bf16.msra.mxu0 %v6978_v56  ;;  %v1973_v54 = vld [vmem:[#allocation7 + $0x68] sm:$0xff]  ;;  %v6668_v56 = vcombine.low %v1977_v51, %v1981_v52 }
 0x1b2   :  { %5179 = vmatprep.subr.bf16.mxu1 %v7123_v57  ;;  %5144 = vmatprep.subr.bf16.mxu0 %v6971_v60  ;;  %v6661_v57 = vcombine.high %v1969_v53, %v1973_v54  ;;  %v1961_v60 = vld [vmem:[#allocation7 + $0x8] sm:$0xff]  ;;  %v6660_v61 = vcombine.low %v1969_v53, %v1973_v54 }
 0x1b3   :  { %v6653_v62 = vcombine.high %v1961_v60, %v1965_v16  ;;  %v2137_v53 = vld [vmem:[#allocation7 + $0x588] sm:$0xff] }
 0x1b5   :  { %5180 = vmatpush2.bf16.msra.mxu1 %v7122_v63  ;;  %5145 = vmatpush2.bf16.msra.mxu0 %v6970_v19  ;;  %v2085_v63 = vld [vmem:[#allocation7 + $0x3e8] sm:$0xff]  ;;  %v6652_v19 = vcombine.low %v1961_v60, %v1965_v16 }
 0x1b6   :  { %5181 = vmatprep.subr.bf16.mxu1 %v7115_v59  ;;  %5196 = vmatprep.subr.bf16.mxu0 %v6709_v0  ;;  %v6773_v59 = vcombine.high %v2081_v58, %v2085_v63  ;;  %v2073_v0 = vld [vmem:[#allocation7 + $0x388] sm:$0xff]  ;;  %v6772_v2 = vcombine.low %v2081_v58, %v2085_v63 }
 0x1b7   :  { %v6764_v7 = vcombine.low %v2073_v0, %v2077_v1  ;;  %v2269_v60 = vld [vmem:[#allocation7 + $0x9a8] sm:$0xff] }
 0x1b8   :  { %v1814_v8 = vpop.f32.mrf.mxu0  ;;  %v2129_v58 = vld [vmem:[#allocation7 + $0x548] sm:$0xff] }
 0x1b9   :  { %5182 = vmatpush2.bf16.msra.mxu1 %v7114_v3  ;;  %v6765_v3 = vcombine.high %v2073_v0, %v2077_v1  ;;  %v2257_v0 = vld [vmem:[#allocation7 + $0x948] sm:$0xff] }
 0x1ba   :  { %v1855_v10 = vpop.f32.mrf.mxu1  ;;  %5183 = vmatprep.subr.bf16.mxu1 %v7107_v4  ;;  %v1816_v13 = vpop.f32.mrf.mxu0  ;;  %v2065_v4 = vld [vmem:[#allocation7 + $0x348] sm:$0xff] }
 0x1bb   :  { %v1856_v12 = vadd.f32 %v1855_v10, %v1814_v8  ;;  %v6757_v8 = vcombine.high %v2065_v4, %v2069_v6  ;;  %v2061_v10 = vld [vmem:[#allocation7 + $0x328] sm:$0xff] }
 0x1bc   :  { %v1857_v14 = vpop.f32.mrf.mxu1  ;;  %v1818_v18 = vpop.f32.mrf.mxu0  ;;  %v2261_v1 = vld [vmem:[#allocation7 + $0x968] sm:$0xff] }
 0x1bd   :  { %v1858_v15 = vadd.f32 %v1857_v14, %v1816_v13  ;;  %5184 = vmatpush2.bf16.msra.mxu1 %v7106_v9  ;;  %v1948_v24 = vmax.f32 %v1856_v12, 0.0  ;;  %v2057_v9 = vld [vmem:[#allocation7 + $0x308] sm:$0xff]  ;;  %v6948_v20 = vcombine.low %v2257_v0, %v2261_v1 }
 0x1be   :  { %v1859_v25 = vpop.f32.mrf.mxu1  ;;  %5185 = vmatprep.subr.bf16.mxu1 %v7099_v11  ;;  %v1819_v29 = vpop.f32.mrf.mxu0  ;;  %v6756_v11 = vcombine.low %v2065_v4, %v2069_v6  ;;  %v6749_v12 = vcombine.high %v2057_v9, %v2061_v10  ;;  %v2049_v13 = vld [vmem:[#allocation7 + $0x2c8] sm:$0xff]  ;;  %v6949_v6 = vcombine.high %v2257_v0, %v2261_v1 }
 0x1bf   :  { %v1949_v27 = vmax.f32 %v1858_v15, 0.0  ;;  %v7601_v35 = vpack.c.bf16 %v1948_v24, %v1948_v24  ;;  %v2053_v14 = vld [vmem:[#allocation7 + $0x2e8] sm:$0xff]  ;;  %v6748_v15 = vcombine.low %v2057_v9, %v2061_v10 }
 0x1c0   :  { %v1860_v32 = vpop.f32.mrf.mxu1  ;;  %v6741_v18 = vcombine.high %v2049_v13, %v2053_v14  ;;  %v2045_v24 = vld [vmem:[#allocation7 + $0x2a8] sm:$0xff]  ;;  %v6740_v25 = vcombine.low %v2049_v13, %v2053_v14 }
 0x1c1   :  { %v7599_v33 = vpack.c.bf16 %v1949_v27, %v1949_v27  ;;  %5186 = vmatpush2.bf16.msra.mxu1 %v7098_v23  ;;  %v2041_v23 = vld [vmem:[#allocation7 + $0x288] sm:$0xff] }
 0x1c2   :  { %5237 = vmatprep.subr.bf16.mxu1 %v6837_v26  ;;  %v6733_v26 = vcombine.high %v2041_v23, %v2045_v24  ;;  %v2033_v27 = vld [vmem:[#allocation7 + $0x248] sm:$0xff]  ;;  %v6732_v30 = vcombine.low %v2041_v23, %v2045_v24 }
 0x1c3   :  { %5146 = vmatprep.mubr.bf16.mxu0 %v7599_v33  ;;  %v2037_v29 = vld [vmem:[#allocation7 + $0x268] sm:$0xff] }
 0x1c4   :  { %5147 = vmatmul.mubr.bf16.vlgmr.msra.gmra.mxu0 %v7601_v35  ;;  %v6725_v31 = vcombine.high %v2033_v27, %v2037_v29  ;;  %v2025_v32 = vld [vmem:[#allocation7 + $0x208] sm:$0xff]  ;;  %v6724_v37 = vcombine.low %v2033_v27, %v2037_v29 }
 0x1c5   :  { %5197 = vmatpush1.bf16.msra.mxu0 %v6708_v34  ;;  %5228 = vmatprep.mubr.bf16.mxu0 %v7569_v5  ;;  %v2029_v34 = vld [vmem:[#allocation7 + $0x228] sm:$0xff] }
 0x1c6   :  { %5198 = vmatprep.subr.bf16.mxu0 %v6701_v36  ;;  %v2249_v9 = vld [vmem:[#allocation7 + $0x908] sm:$0xff] }
 0x1c7   :  { %v2253_v10 = vld [vmem:[#allocation7 + $0x928] sm:$0xff] }
 0x1c8   :  { %v2117_v13 = vld [vmem:[#allocation7 + $0x4e8] sm:$0xff]  ;;  %v6940_v23 = vcombine.low %v2249_v9, %v2253_v10 }
 0x1c9   :  { %5199 = vmatpush1.bf16.msra.mxu0 %v6700_v39  ;;  %v6717_v39 = vcombine.high %v2025_v32, %v2029_v34  ;;  %v2241_v14 = vld [vmem:[#allocation7 + $0x8c8] sm:$0xff] }
 0x1ca   :  { %5200 = vmatprep.subr.bf16.mxu0 %v6693_v40  ;;  %v2109_v27 = vld [vmem:[#allocation7 + $0x4a8] sm:$0xff] }
 0x1cb   :  { %v2233_v29 = vld [vmem:[#allocation7 + $0x888] sm:$0xff] }
 0x1cc   :  { %v2329_v0 = vld [vmem:[#allocation7 + $0xb88] sm:$0xff] }
 0x1cd   :  { %5201 = vmatpush1.bf16.msra.mxu0 %v6692_v43  ;;  %v2277_v43 = vld [vmem:[#allocation7 + $0x9e8] sm:$0xff] }
 0x1ce   :  { %5202 = vmatprep.subr.bf16.mxu0 %v6685_v44  ;;  %v6965_v52 = vcombine.high %v2273_v42, %v2277_v43  ;;  %v2333_v1 = vld [vmem:[#allocation7 + $0xba8] sm:$0xff] }
 0x1d1   :  { %5203 = vmatpush1.bf16.msra.mxu0 %v6684_v48  ;;  %v6716_v48 = vcombine.low %v2025_v32, %v2029_v34 }
 0x1d2   :  { %5204 = vmatprep.subr.bf16.mxu0 %v6677_v50 }
 0x1d5   :  { %5205 = vmatpush1.bf16.msra.mxu0 %v6676_v46 }
 0x1d6   :  { %5206 = vmatprep.subr.bf16.mxu0 %v6669_v49 }
 0x1d9   :  { %5207 = vmatpush1.bf16.msra.mxu0 %v6668_v56  ;;  %v2141_v56 = vld [vmem:[#allocation7 + $0x5a8] sm:$0xff] }
 0x1da   :  { %5208 = vmatprep.subr.bf16.mxu0 %v6661_v57  ;;  %v2265_v57 = vld [vmem:[#allocation7 + $0x988] sm:$0xff]  ;;  %v6829_v63 = vcombine.high %v2137_v53, %v2141_v56 }
 0x1dd   :  { %5209 = vmatpush1.bf16.msra.mxu0 %v6660_v61  ;;  %v6964_v61 = vcombine.low %v2273_v42, %v2277_v43 }
 0x1de   :  { %5210 = vmatprep.subr.bf16.mxu0 %v6653_v62 }
 0x1e1   :  { %5211 = vmatpush1.bf16.msra.mxu0 %v6652_v19  ;;  %v6957_v19 = vcombine.high %v2265_v57, %v2269_v60 }
 0x1e2   :  { %5212 = vmatprep.subr.bf16.mxu0 %v6773_v59  ;;  %v2133_v59 = vld [vmem:[#allocation7 + $0x568] sm:$0xff] }
 0x1e3   :  { %v6821_v4 = vcombine.high %v2129_v58, %v2133_v59 }
 0x1e5   :  { %5213 = vmatpush2.bf16.msra.mxu0 %v6772_v2  ;;  %v6828_v2 = vcombine.low %v2137_v53, %v2141_v56  ;;  %v2209_v53 = vld [vmem:[#allocation7 + $0x7c8] sm:$0xff] }
 0x1e6   :  { %5214 = vmatprep.subr.bf16.mxu0 %v6765_v3  ;;  %v6956_v3 = vcombine.low %v2265_v57, %v2269_v60  ;;  %v2337_v56 = vld [vmem:[#allocation7 + $0xbc8] sm:$0xff] }
 0x1e7   :  { %v2341_v57 = vld [vmem:[#allocation7 + $0xbe8] sm:$0xff] }
 0x1e9   :  { %5215 = vmatpush2.bf16.msra.mxu0 %v6764_v7  ;;  %v2121_v7 = vld [vmem:[#allocation7 + $0x508] sm:$0xff] }
 0x1ea   :  { %5216 = vmatprep.subr.bf16.mxu0 %v6757_v8  ;;  %v2125_v8 = vld [vmem:[#allocation7 + $0x528] sm:$0xff] }
 0x1eb   :  { %v6813_v21 = vcombine.high %v2121_v7, %v2125_v8 }
 0x1ed   :  { %5217 = vmatpush2.bf16.msra.mxu0 %v6756_v11  ;;  %v6820_v11 = vcombine.low %v2129_v58, %v2133_v59  ;;  %v2205_v59 = vld [vmem:[#allocation7 + $0x7a8] sm:$0xff] }
 0x1ee   :  { %5218 = vmatprep.subr.bf16.mxu0 %v6749_v12  ;;  %v2113_v12 = vld [vmem:[#allocation7 + $0x4c8] sm:$0xff] }
 0x1ef   :  { %v6805_v24 = vcombine.high %v2113_v12, %v2117_v13 }
 0x1f1   :  { %5219 = vmatpush2.bf16.msra.mxu0 %v6748_v15  ;;  %v2245_v15 = vld [vmem:[#allocation7 + $0x8e8] sm:$0xff] }
 0x1f2   :  { %5220 = vmatprep.subr.bf16.mxu0 %v6741_v18  ;;  %v6812_v18 = vcombine.low %v2121_v7, %v2125_v8  ;;  %v6932_v32 = vcombine.low %v2241_v14, %v2245_v15  ;;  %v2193_v7 = vld [vmem:[#allocation7 + $0x748] sm:$0xff] }
 0x1f3   :  { %v2197_v8 = vld [vmem:[#allocation7 + $0x768] sm:$0xff] }
 0x1f5   :  { %5221 = vmatpush2.bf16.msra.mxu0 %v6740_v25  ;;  %v6933_v25 = vcombine.high %v2241_v14, %v2245_v15  ;;  %v2313_v14 = vld [vmem:[#allocation7 + $0xb08] sm:$0xff] }
 0x1f6   :  { %5222 = vmatprep.subr.bf16.mxu0 %v6733_v26  ;;  %v2105_v26 = vld [vmem:[#allocation7 + $0x488] sm:$0xff] }
 0x1f7   :  { %v6797_v34 = vcombine.high %v2105_v26, %v2109_v27  ;;  %v2317_v15 = vld [vmem:[#allocation7 + $0xb28] sm:$0xff] }
 0x1f8   :  { %v1896_v36 = vpop.f32.mrf.mxu0 }
 0x1f9   :  { %5223 = vmatpush2.bf16.msra.mxu0 %v6732_v30  ;;  %v2237_v30 = vld [vmem:[#allocation7 + $0x8a8] sm:$0xff] }
 0x1fa   :  { %v1937_v38 = vpop.f32.mrf.mxu1  ;;  %5224 = vmatprep.subr.bf16.mxu0 %v6725_v31  ;;  %v1898_v41 = vpop.f32.mrf.mxu0  ;;  %v6804_v31 = vcombine.low %v2113_v12, %v2117_v13  ;;  %v6924_v42 = vcombine.low %v2233_v29, %v2237_v30  ;;  %v2185_v12 = vld [vmem:[#allocation7 + $0x708] sm:$0xff] }
 0x1fb   :  { %v1938_v40 = vadd.f32 %v1937_v38, %v1896_v36  ;;  %v6925_v36 = vcombine.high %v2233_v29, %v2237_v30  ;;  %v2101_v38 = vld [vmem:[#allocation7 + $0x468] sm:$0xff] }
 0x1fc   :  { %v1939_v44 = vpop.f32.mrf.mxu1  ;;  %v1900_v47 = vpop.f32.mrf.mxu0  ;;  %v2189_v13 = vld [vmem:[#allocation7 + $0x728] sm:$0xff] }
 0x1fd   :  { %v1940_v45 = vadd.f32 %v1939_v44, %v1898_v41  ;;  %5225 = vmatpush2.bf16.msra.mxu0 %v6724_v37  ;;  %v1950_v50 = vmax.f32 %v1938_v40, 0.0  ;;  %v2097_v37 = vld [vmem:[#allocation7 + $0x448] sm:$0xff]  ;;  %v6796_v41 = vcombine.low %v2105_v26, %v2109_v27 }
 0x1fe   :  { %v1941_v51 = vpop.f32.mrf.mxu1  ;;  %5226 = vmatprep.subr.bf16.mxu0 %v6717_v39  ;;  %v1901_v49 = vpop.f32.mrf.mxu0  ;;  %v2225_v39 = vld [vmem:[#allocation7 + $0x848] sm:$0xff]  ;;  %v6789_v43 = vcombine.high %v2097_v37, %v2101_v38 }
 0x1ff   :  { %v1951_v46 = vmax.f32 %v1940_v45, 0.0  ;;  %v7608_v62 = vpack.c.bf16 %v1950_v50, %v1950_v50  ;;  %v2229_v40 = vld [vmem:[#allocation7 + $0x868] sm:$0xff]  ;;  %v6788_v51 = vcombine.low %v2097_v37, %v2101_v38 }
 0x200   :  { %v1942_v54 = vpop.f32.mrf.mxu1  ;;  %v6917_v44 = vcombine.high %v2225_v39, %v2229_v40  ;;  %v2089_v45 = vld [vmem:[#allocation7 + $0x408] sm:$0xff] }
 0x201   :  { %v7606_v16 = vpack.c.bf16 %v1951_v46, %v1951_v46  ;;  %5227 = vmatpush2.bf16.msra.mxu0 %v6716_v48  ;;  %v2093_v47 = vld [vmem:[#allocation7 + $0x428] sm:$0xff] }
 0x202   :  { %5278 = vmatprep.subr.bf16.mxu0 %v6965_v52  ;;  %v2217_v48 = vld [vmem:[#allocation7 + $0x808] sm:$0xff]  ;;  %v6916_v52 = vcombine.low %v2225_v39, %v2229_v40  ;;  %v6781_v46 = vcombine.high %v2089_v45, %v2093_v47  ;;  %v6780_v60 = vcombine.low %v2089_v45, %v2093_v47 }
 0x203   :  { %5187 = vmatprep.mubr.bf16.mxu1 %v7606_v16  ;;  %v2221_v50 = vld [vmem:[#allocation7 + $0x828] sm:$0xff] }
 0x204   :  { %5229 = vmatmul.mubr.bf16.vlgmr.msra.gmra.mxu0 %v7580_v55  ;;  %5188 = vmatmul.mubr.bf16.vlgmr.msra.gmra.mxu1 %v7608_v62  ;;  %v6909_v49 = vcombine.high %v2217_v48, %v2221_v50  ;;  %v2213_v54 = vld [vmem:[#allocation7 + $0x7e8] sm:$0xff] }
 0x205   :  { %5238 = vmatpush1.bf16.msra.mxu1 %v6836_v28  ;;  %5279 = vmatpush1.bf16.msra.mxu0 %v6964_v61  ;;  %v6941_v28 = vcombine.high %v2249_v9, %v2253_v10  ;;  %v6908_v61 = vcombine.low %v2217_v48, %v2221_v50  ;;  %v6901_v58 = vcombine.high %v2209_v53, %v2213_v54  ;;  %v2321_v9 = vld [vmem:[#allocation7 + $0xb48] sm:$0xff] }
 0x206   :  { %5310 = vmatprep.mubr.bf16.mxu0 %v7599_v33  ;;  %5269 = vmatprep.mubr.bf16.mxu1 %v7583_v17  ;;  %v2325_v10 = vld [vmem:[#allocation7 + $0xb68] sm:$0xff] }
 0x207   :  { %5239 = vmatprep.subr.bf16.mxu1 %v6829_v63  ;;  %5280 = vmatprep.subr.bf16.mxu0 %v6957_v19  ;;  %v7029_v63 = vcombine.high %v2337_v56, %v2341_v57  ;;  %v2201_v19 = vld [vmem:[#allocation7 + $0x788] sm:$0xff] }
 0x208   :  { %v2177_v26 = vld [vmem:[#allocation7 + $0x6c8] sm:$0xff] }
 0x209   :  { %5240 = vmatpush1.bf16.msra.mxu1 %v6828_v2  ;;  %5281 = vmatpush1.bf16.msra.mxu0 %v6956_v3  ;;  %v6900_v2 = vcombine.low %v2209_v53, %v2213_v54  ;;  %v7028_v3 = vcombine.low %v2337_v56, %v2341_v57  ;;  %v2181_v27 = vld [vmem:[#allocation7 + $0x6e8] sm:$0xff] }
 0x20a   :  { %5241 = vmatprep.subr.bf16.mxu1 %v6821_v4  ;;  %5282 = vmatprep.subr.bf16.mxu0 %v6949_v6  ;;  %v6893_v4 = vcombine.high %v2201_v19, %v2205_v59  ;;  %v7021_v6 = vcombine.high %v2329_v0, %v2333_v1  ;;  %v2305_v29 = vld [vmem:[#allocation7 + $0xac8] sm:$0xff] }
 0x20b   :  { %v2309_v30 = vld [vmem:[#allocation7 + $0xae8] sm:$0xff] }
 0x20c   :  { %v2169_v37 = vld [vmem:[#allocation7 + $0x688] sm:$0xff] }
 0x20d   :  { %5242 = vmatpush1.bf16.msra.mxu1 %v6820_v11  ;;  %5283 = vmatpush1.bf16.msra.mxu0 %v6948_v20  ;;  %v6892_v11 = vcombine.low %v2201_v19, %v2205_v59  ;;  %v7020_v20 = vcombine.low %v2329_v0, %v2333_v1  ;;  %v2173_v38 = vld [vmem:[#allocation7 + $0x6a8] sm:$0xff] }
 0x20e   :  { %5243 = vmatprep.subr.bf16.mxu1 %v6813_v21  ;;  %5284 = vmatprep.subr.bf16.mxu0 %v6941_v28  ;;  %v6885_v21 = vcombine.high %v2193_v7, %v2197_v8  ;;  %v7013_v28 = vcombine.high %v2321_v9, %v2325_v10  ;;  %v2297_v39 = vld [vmem:[#allocation7 + $0xa88] sm:$0xff] }
 0x20f   :  { %v2301_v40 = vld [vmem:[#allocation7 + $0xaa8] sm:$0xff] }
 0x210   :  { %v2161_v45 = vld [vmem:[#allocation7 + $0x648] sm:$0xff] }
 0x211   :  { %5244 = vmatpush1.bf16.msra.mxu1 %v6812_v18  ;;  %5285 = vmatpush1.bf16.msra.mxu0 %v6940_v23  ;;  %v6884_v18 = vcombine.low %v2193_v7, %v2197_v8  ;;  %v7012_v23 = vcombine.low %v2321_v9, %v2325_v10  ;;  %v2165_v47 = vld [vmem:[#allocation7 + $0x668] sm:$0xff] }
 0x212   :  { %5245 = vmatprep.subr.bf16.mxu1 %v6805_v24  ;;  %5286 = vmatprep.subr.bf16.mxu0 %v6933_v25  ;;  %v6877_v24 = vcombine.high %v2185_v12, %v2189_v13  ;;  %v7005_v25 = vcombine.high %v2313_v14, %v2317_v15  ;;  %v2289_v48 = vld [vmem:[#allocation7 + $0xa48] sm:$0xff] }
 0x213   :  { %v2293_v50 = vld [vmem:[#allocation7 + $0xa68] sm:$0xff] }
 0x214   :  { %v2153_v53 = vld [vmem:[#allocation7 + $0x608] sm:$0xff] }
 0x215   :  { %5246 = vmatpush1.bf16.msra.mxu1 %v6804_v31  ;;  %5287 = vmatpush1.bf16.msra.mxu0 %v6932_v32  ;;  %v6876_v31 = vcombine.low %v2185_v12, %v2189_v13  ;;  %v7004_v32 = vcombine.low %v2313_v14, %v2317_v15  ;;  %v2157_v54 = vld [vmem:[#allocation7 + $0x628] sm:$0xff] }
 0x216   :  { %5247 = vmatprep.subr.bf16.mxu1 %v6797_v34  ;;  %5288 = vmatprep.subr.bf16.mxu0 %v6925_v36  ;;  %v6869_v34 = vcombine.high %v2177_v26, %v2181_v27  ;;  %v6997_v36 = vcombine.high %v2305_v29, %v2309_v30  ;;  %v2281_v56 = vld [vmem:[#allocation7 + $0xa08] sm:$0xff] }
 0x217   :  { %v2285_v57 = vld [vmem:[#allocation7 + $0xa28] sm:$0xff] }
 0x218   :  { %v6973_v19 = vcombine.high %v2281_v56, %v2285_v57  ;;  %v2401_v59 = vld [vmem:[#allocation7 + $0xdc8] sm:$0xff]  ;;  %v6972_v7 = vcombine.low %v2281_v56, %v2285_v57 }
 0x219   :  { %5248 = vmatpush1.bf16.msra.mxu1 %v6796_v41  ;;  %5289 = vmatpush1.bf16.msra.mxu0 %v6924_v42  ;;  %v6868_v41 = vcombine.low %v2177_v26, %v2181_v27  ;;  %v6996_v42 = vcombine.low %v2305_v29, %v2309_v30  ;;  %v2405_v1 = vld [vmem:[#allocation7 + $0xde8] sm:$0xff]  ;;  %v2006_v26 = vld [vmem:[#allocation7 + $0x170] sm:$0xff] }
 0x21a   :  { %5249 = vmatprep.subr.bf16.mxu1 %v6789_v43  ;;  %5290 = vmatprep.subr.bf16.mxu0 %v6917_v44  ;;  %v6861_v43 = vcombine.high %v2169_v37, %v2173_v38  ;;  %v6989_v44 = vcombine.high %v2297_v39, %v2301_v40  ;;  %v7093_v8 = vcombine.high %v2401_v59, %v2405_v1  ;;  %v2361_v56 = vld [vmem:[#allocation7 + $0xc88] sm:$0xff] }
 0x21b   :  { %v7092_v12 = vcombine.low %v2401_v59, %v2405_v1  ;;  %v2365_v57 = vld [vmem:[#allocation7 + $0xca8] sm:$0xff] }
 0x21c   :  { %v2357_v1 = vld [vmem:[#allocation7 + $0xc68] sm:$0xff] }
 0x21d   :  { %5250 = vmatpush1.bf16.msra.mxu1 %v6788_v51  ;;  %5291 = vmatpush1.bf16.msra.mxu0 %v6916_v52  ;;  %v6860_v51 = vcombine.low %v2169_v37, %v2173_v38  ;;  %v6988_v52 = vcombine.low %v2297_v39, %v2301_v40  ;;  %v2377_v37 = vld [vmem:[#allocation7 + $0xd08] sm:$0xff]  ;;  %v1994_v40 = vld [vmem:[#allocation7 + $0x110] sm:$0xff] }
 0x21e   :  { %5251 = vmatprep.subr.bf16.mxu1 %v6781_v46  ;;  %5292 = vmatprep.subr.bf16.mxu0 %v6909_v49  ;;  %v6853_v46 = vcombine.high %v2161_v45, %v2165_v47  ;;  %v6981_v49 = vcombine.high %v2289_v48, %v2293_v50  ;;  %v2381_v38 = vld [vmem:[#allocation7 + $0xd28] sm:$0xff] }
 0x221   :  { %5252 = vmatpush1.bf16.msra.mxu1 %v6780_v60  ;;  %5293 = vmatpush1.bf16.msra.mxu0 %v6908_v61  ;;  %v6852_v61 = vcombine.low %v2161_v45, %v2165_v47  ;;  %v7069_v45 = vcombine.high %v2377_v37, %v2381_v38 }
 0x222   :  { %5253 = vmatprep.subr.bf16.mxu1 %v6901_v58  ;;  %5294 = vmatprep.subr.bf16.mxu0 %v7029_v63  ;;  %v6980_v58 = vcombine.low %v2289_v48, %v2293_v50  ;;  %v6845_v63 = vcombine.high %v2153_v53, %v2157_v54  ;;  %v2369_v48 = vld [vmem:[#allocation7 + $0xcc8] sm:$0xff] }
 0x223   :  { %v2373_v50 = vld [vmem:[#allocation7 + $0xce8] sm:$0xff] }
 0x225   :  { %5254 = vmatpush2.bf16.msra.mxu1 %v6900_v2  ;;  %5295 = vmatpush2.bf16.msra.mxu0 %v7028_v3  ;;  %v2018_v2 = vld [vmem:[#allocation7 + $0x1d0] sm:$0xff] }
 0x226   :  { %5255 = vmatprep.subr.bf16.mxu1 %v6893_v4  ;;  %5296 = vmatprep.subr.bf16.mxu0 %v7021_v6  ;;  %v2022_v3 = vld [vmem:[#allocation7 + $0x1f0] sm:$0xff]  ;;  %v6844_v6 = vcombine.low %v2153_v53, %v2157_v54  ;;  %v7061_v53 = vcombine.high %v2369_v48, %v2373_v50 }
 0x227   :  { %v6711_v9 = vcombine.high %v2018_v2, %v2022_v3  ;;  %v6710_v13 = vcombine.low %v2018_v2, %v2022_v3  ;;  %v1970_v2 = vld [vmem:[#allocation7 + $0x50] sm:$0xff] }
 0x228   :  { %v1974_v3 = vld [vmem:[#allocation7 + $0x70] sm:$0xff] }
 0x229   :  { %5256 = vmatpush2.bf16.msra.mxu1 %v6892_v11  ;;  %5297 = vmatpush2.bf16.msra.mxu0 %v7020_v20  ;;  %v2393_v11 = vld [vmem:[#allocation7 + $0xd88] sm:$0xff] }
 0x22a   :  { %5257 = vmatprep.subr.bf16.mxu1 %v6885_v21  ;;  %5298 = vmatprep.subr.bf16.mxu0 %v7013_v28  ;;  %v2397_v20 = vld [vmem:[#allocation7 + $0xda8] sm:$0xff]  ;;  %v2010_v21 = vld [vmem:[#allocation7 + $0x190] sm:$0xff] }
 0x22b   :  { %v2014_v28 = vld [vmem:[#allocation7 + $0x1b0] sm:$0xff]  ;;  %v7085_v14 = vcombine.high %v2393_v11, %v2397_v20  ;;  %v7084_v29 = vcombine.low %v2393_v11, %v2397_v20 }
 0x22c   :  { %v6703_v15 = vcombine.high %v2010_v21, %v2014_v28  ;;  %v1962_v11 = vld [vmem:[#allocation7 + $0x10] sm:$0xff] }
 0x22d   :  { %5258 = vmatpush2.bf16.msra.mxu1 %v6884_v18  ;;  %5299 = vmatpush2.bf16.msra.mxu0 %v7012_v23  ;;  %v2385_v18 = vld [vmem:[#allocation7 + $0xd48] sm:$0xff]  ;;  %v1966_v20 = vld [vmem:[#allocation7 + $0x30] sm:$0xff] }
 0x22e   :  { %5259 = vmatprep.subr.bf16.mxu1 %v6877_v24  ;;  %5300 = vmatprep.subr.bf16.mxu0 %v7005_v25  ;;  %v2389_v23 = vld [vmem:[#allocation7 + $0xd68] sm:$0xff]  ;;  %v2002_v25 = vld [vmem:[#allocation7 + $0x150] sm:$0xff] }
 0x231   :  { %5260 = vmatpush2.bf16.msra.mxu1 %v6876_v31  ;;  %5301 = vmatpush2.bf16.msra.mxu0 %v7004_v32  ;;  %v6702_v31 = vcombine.low %v2010_v21, %v2014_v28  ;;  %v7077_v32 = vcombine.high %v2385_v18, %v2389_v23  ;;  %v6662_v28 = vcombine.low %v1970_v2, %v1974_v3 }
 0x232   :  { %5261 = vmatprep.subr.bf16.mxu1 %v6869_v34  ;;  %5302 = vmatprep.subr.bf16.mxu0 %v6997_v36  ;;  %v6695_v36 = vcombine.high %v2002_v25, %v2006_v26 }
 0x235   :  { %5262 = vmatpush2.bf16.msra.mxu1 %v6868_v41  ;;  %5303 = vmatpush2.bf16.msra.mxu0 %v6996_v42  ;;  %v1998_v41 = vld [vmem:[#allocation7 + $0x130] sm:$0xff]  ;;  %v7076_v42 = vcombine.low %v2385_v18, %v2389_v23 }
 0x236   :  { %5263 = vmatprep.subr.bf16.mxu1 %v6861_v43  ;;  %5304 = vmatprep.subr.bf16.mxu0 %v6989_v44  ;;  %v6694_v44 = vcombine.low %v2002_v25, %v2006_v26  ;;  %v6687_v47 = vcombine.high %v1994_v40, %v1998_v41  ;;  %v2082_v18 = vld [vmem:[#allocation7 + $0x3d0] sm:$0xff]  ;;  %v6654_v25 = vcombine.low %v1962_v11, %v1966_v20 }
 0x237   :  { %v2086_v23 = vld [vmem:[#allocation7 + $0x3f0] sm:$0xff] }
 0x238   :  { %v5066_v60 = vpop.f32.mrf.mxu0 }
 0x239   :  { %5264 = vmatpush2.bf16.msra.mxu1 %v6860_v51  ;;  %5305 = vmatpush2.bf16.msra.mxu0 %v6988_v52  ;;  %v1986_v51 = vld [vmem:[#allocation7 + $0xd0] sm:$0xff] }
 0x23a   :  { %5265 = vmatprep.subr.bf16.mxu1 %v6853_v46  ;;  %5306 = vmatprep.subr.bf16.mxu0 %v6981_v49  ;;  %v5068_v0 = vpop.f32.mrf.mxu0  ;;  %v1990_v52 = vld [vmem:[#allocation7 + $0xf0] sm:$0xff]  ;;  %v7068_v46 = vcombine.low %v2377_v37, %v2381_v38  ;;  %v6686_v49 = vcombine.low %v1994_v40, %v1998_v41  ;;  %v6774_v38 = vcombine.low %v2082_v18, %v2086_v23  ;;  %v2449_v41 = vld [vmem:[#allocation7 + $0xf48] sm:$0xff] }
 0x23b   :  { %v6679_v54 = vcombine.high %v1986_v51, %v1990_v52 }
 0x23c   :  { %v5070_v4 = vpop.f32.mrf.mxu0 }
 0x23d   :  { %5266 = vmatpush2.bf16.msra.mxu1 %v6852_v61  ;;  %5307 = vmatpush2.bf16.msra.mxu0 %v6980_v58  ;;  %v1982_v61 = vld [vmem:[#allocation7 + $0xb0] sm:$0xff]  ;;  %v7060_v58 = vcombine.low %v2369_v48, %v2373_v50  ;;  %v7052_v4 = vcombine.low %v2361_v56, %v2365_v57 }
 0x23e   :  { %5267 = vmatprep.subr.bf16.mxu1 %v6845_v63  ;;  %5308 = vmatprep.subr.bf16.mxu0 %v6973_v19  ;;  %v5071_v10 = vpop.f32.mrf.mxu0  ;;  %v6678_v63 = vcombine.low %v1986_v51, %v1990_v52  ;;  %v7053_v19 = vcombine.high %v2361_v56, %v2365_v57  ;;  %v2441_v51 = vld [vmem:[#allocation7 + $0xf08] sm:$0xff] }
 0x23f   :  { %v2349_v10 = vld [vmem:[#allocation7 + $0xc28] sm:$0xff] }
 0x240   :  { %v2445_v52 = vld [vmem:[#allocation7 + $0xf28] sm:$0xff] }
 0x241   :  { %5268 = vmatpush2.bf16.msra.mxu1 %v6844_v6  ;;  %5309 = vmatpush2.bf16.msra.mxu0 %v6972_v7  ;;  %v7133_v56 = vcombine.high %v2441_v51, %v2445_v52 }
 0x242   :  { %5319 = vmatprep.subr.bf16.mxu1 %v7093_v8  ;;  %5360 = vmatprep.subr.bf16.mxu0 %v6711_v9  ;;  %v6663_v8 = vcombine.high %v1970_v2, %v1974_v3  ;;  %v2345_v9 = vld [vmem:[#allocation7 + $0xc08] sm:$0xff] }
 0x243   :  { %v2425_v2 = vld [vmem:[#allocation7 + $0xe88] sm:$0xff] }
 0x244   :  { %5270 = vmatmul.mubr.bf16.vlgmr.msra.gmra.mxu1 %v7591_v22  ;;  %5311 = vmatmul.mubr.bf16.vlgmr.msra.gmra.mxu0 %v7601_v35  ;;  %v5107_v24 = vpop.f32.mrf.mxu1  ;;  %v2429_v3 = vld [vmem:[#allocation7 + $0xea8] sm:$0xff] }
 0x245   :  { %v7620_v27 = vadd.f32 %v5107_v24, %v5066_v60  ;;  %5320 = vmatpush1.bf16.msra.mxu1 %v7092_v12  ;;  %5351 = vmatprep.mubr.bf16.mxu1 %v7606_v16  ;;  %v1978_v60 = vld [vmem:[#allocation7 + $0x90] sm:$0xff]  ;;  %v7037_v12 = vcombine.high %v2345_v9, %v2349_v10  ;;  %v7036_v24 = vcombine.low %v2345_v9, %v2349_v10 }
 0x246   :  { %5361 = vmatpush1.bf16.msra.mxu0 %v6710_v13  ;;  %5392 = vmatprep.mubr.bf16.mxu0 %v7569_v5  ;;  %v5109_v30 = vpop.f32.mrf.mxu1  ;;  %v6671_v59 = vcombine.high %v1978_v60, %v1982_v61  ;;  %v6670_v6 = vcombine.low %v1978_v60, %v1982_v61  ;;  %v6655_v13 = vcombine.high %v1962_v11, %v1966_v20  ;;  %v2433_v60 = vld [vmem:[#allocation7 + $0xec8] sm:$0xff] }
 0x247   :  { %v7624_v34 = vadd.f32 %v5109_v30, %v5068_v0  ;;  %5321 = vmatprep.subr.bf16.mxu1 %v7085_v14  ;;  %5362 = vmatprep.subr.bf16.mxu0 %v6703_v15  ;;  %v2353_v0 = vld [vmem:[#allocation7 + $0xc48] sm:$0xff]  ;;  %v7117_v9 = vcombine.high %v2425_v2, %v2429_v3 }
 0x248   :  { %v5111_v39 = vpop.f32.mrf.mxu1  ;;  %v7045_v7 = vcombine.high %v2353_v0, %v2357_v1  ;;  %v7044_v21 = vcombine.low %v2353_v0, %v2357_v1  ;;  %v2465_v14 = vld [vmem:[#allocation7 + $0xfc8] sm:$0xff] }
 0x249   :  { %5322 = vmatpush1.bf16.msra.mxu1 %v7084_v29  ;;  %v2469_v15 = vld [vmem:[#allocation7 + $0xfe8] sm:$0xff]  ;;  %v6775_v29 = vcombine.high %v2082_v18, %v2086_v23 }
 0x24a   :  { %5363 = vmatpush1.bf16.msra.mxu0 %v6702_v31  ;;  %v5112_v43 = vpop.f32.mrf.mxu1  ;;  %5323 = vmatprep.subr.bf16.mxu1 %v7077_v32  ;;  %v7157_v26 = vcombine.high %v2465_v14, %v2469_v15  ;;  %v2457_v30 = vld [vmem:[#allocation7 + $0xf88] sm:$0xff]  ;;  %v2074_v32 = vld [vmem:[#allocation7 + $0x390] sm:$0xff]  ;;  %v7156_v37 = vcombine.low %v2465_v14, %v2469_v15 }
 0x24b   :  { %5364 = vmatprep.subr.bf16.mxu0 %v6695_v36  ;;  %v2461_v31 = vld [vmem:[#allocation7 + $0xfa8] sm:$0xff]  ;;  %v2078_v36 = vld [vmem:[#allocation7 + $0x3b0] sm:$0xff] }
 0x24c   :  { %v7149_v39 = vcombine.high %v2457_v30, %v2461_v31  ;;  %v6767_v40 = vcombine.high %v2074_v32, %v2078_v36  ;;  %v2066_v43 = vld [vmem:[#allocation7 + $0x350] sm:$0xff]  ;;  %v2437_v61 = vld [vmem:[#allocation7 + $0xee8] sm:$0xff] }
 0x24d   :  { %5324 = vmatpush1.bf16.msra.mxu1 %v7076_v42  ;;  %v2453_v42 = vld [vmem:[#allocation7 + $0xf68] sm:$0xff]  ;;  %v7125_v0 = vcombine.high %v2433_v60, %v2437_v61 }
 0x24e   :  { %5365 = vmatpush1.bf16.msra.mxu0 %v6694_v44  ;;  %5325 = vmatprep.subr.bf16.mxu1 %v7069_v45  ;;  %v2070_v44 = vld [vmem:[#allocation7 + $0x370] sm:$0xff]  ;;  %v7148_v45 = vcombine.low %v2457_v30, %v2461_v31  ;;  %v7141_v48 = vcombine.high %v2449_v41, %v2453_v42  ;;  %v2417_v11 = vld [vmem:[#allocation7 + $0xe48] sm:$0xff] }
 0x24f   :  { %5366 = vmatprep.subr.bf16.mxu0 %v6687_v47  ;;  %v6766_v47 = vcombine.low %v2074_v32, %v2078_v36  ;;  %v6759_v50 = vcombine.high %v2066_v43, %v2070_v44  ;;  %v2421_v20 = vld [vmem:[#allocation7 + $0xe68] sm:$0xff]  ;;  %v2146_v32 = vld [vmem:[#allocation7 + $0x5d0] sm:$0xff] }
 0x250   :  { %v7109_v14 = vcombine.high %v2417_v11, %v2421_v20  ;;  %v2409_v18 = vld [vmem:[#allocation7 + $0xe08] sm:$0xff]  ;;  %v2150_v36 = vld [vmem:[#allocation7 + $0x5f0] sm:$0xff] }
 0x251   :  { %5326 = vmatpush1.bf16.msra.mxu1 %v7068_v46  ;;  %v2058_v46 = vld [vmem:[#allocation7 + $0x310] sm:$0xff]  ;;  %v2413_v23 = vld [vmem:[#allocation7 + $0xe28] sm:$0xff] }
 0x252   :  { %5367 = vmatpush1.bf16.msra.mxu0 %v6686_v49  ;;  %5327 = vmatprep.subr.bf16.mxu1 %v7061_v53  ;;  %v2062_v49 = vld [vmem:[#allocation7 + $0x330] sm:$0xff]  ;;  %v7140_v53 = vcombine.low %v2449_v41, %v2453_v42  ;;  %v7101_v30 = vcombine.high %v2409_v18, %v2413_v23  ;;  %v6839_v41 = vcombine.high %v2146_v32, %v2150_v36 }
 0x253   :  { %5368 = vmatprep.subr.bf16.mxu0 %v6679_v54  ;;  %v6758_v54 = vcombine.low %v2066_v43, %v2070_v44  ;;  %v6751_v57 = vcombine.high %v2058_v46, %v2062_v49  ;;  %v2138_v43 = vld [vmem:[#allocation7 + $0x590] sm:$0xff] }
 0x254   :  { %v2142_v44 = vld [vmem:[#allocation7 + $0x5b0] sm:$0xff] }
 0x255   :  { %5328 = vmatpush1.bf16.msra.mxu1 %v7060_v58  ;;  %v2050_v58 = vld [vmem:[#allocation7 + $0x2d0] sm:$0xff] }
 0x256   :  { %5369 = vmatpush1.bf16.msra.mxu0 %v6678_v63  ;;  %5329 = vmatprep.subr.bf16.mxu1 %v7053_v19  ;;  %v2054_v63 = vld [vmem:[#allocation7 + $0x2f0] sm:$0xff]  ;;  %v7132_v19 = vcombine.low %v2441_v51, %v2445_v52  ;;  %v6831_v51 = vcombine.high %v2138_v43, %v2142_v44 }
 0x257   :  { %5370 = vmatprep.subr.bf16.mxu0 %v6671_v59  ;;  %v6750_v59 = vcombine.low %v2058_v46, %v2062_v49  ;;  %v6743_v1 = vcombine.high %v2050_v58, %v2054_v63  ;;  %v2130_v52 = vld [vmem:[#allocation7 + $0x550] sm:$0xff] }
 0x258   :  { %v2134_v46 = vld [vmem:[#allocation7 + $0x570] sm:$0xff] }
 0x259   :  { %5330 = vmatpush1.bf16.msra.mxu1 %v7052_v4  ;;  %v2042_v4 = vld [vmem:[#allocation7 + $0x290] sm:$0xff] }
 0x25a   :  { %5371 = vmatpush1.bf16.msra.mxu0 %v6670_v6  ;;  %5331 = vmatprep.subr.bf16.mxu1 %v7045_v7  ;;  %v2046_v6 = vld [vmem:[#allocation7 + $0x2b0] sm:$0xff]  ;;  %v7124_v7 = vcombine.low %v2433_v60, %v2437_v61  ;;  %v6830_v60 = vcombine.low %v2138_v43, %v2142_v44 }
 0x25b   :  { %5372 = vmatprep.subr.bf16.mxu0 %v6663_v8  ;;  %v6742_v8 = vcombine.low %v2050_v58, %v2054_v63  ;;  %v6735_v10 = vcombine.high %v2042_v4, %v2046_v6  ;;  %v6823_v63 = vcombine.high %v2130_v52, %v2134_v46  ;;  %v2218_v43 = vld [vmem:[#allocation7 + $0x810] sm:$0xff] }
 0x25c   :  { %v2222_v44 = vld [vmem:[#allocation7 + $0x830] sm:$0xff] }
 0x25d   :  { %5332 = vmatpush1.bf16.msra.mxu1 %v7044_v21  ;;  %v2034_v21 = vld [vmem:[#allocation7 + $0x250] sm:$0xff] }
 0x25e   :  { %5373 = vmatpush1.bf16.msra.mxu0 %v6662_v28  ;;  %5333 = vmatprep.subr.bf16.mxu1 %v7037_v12  ;;  %v2038_v28 = vld [vmem:[#allocation7 + $0x270] sm:$0xff]  ;;  %v7116_v12 = vcombine.low %v2425_v2, %v2429_v3 }
 0x25f   :  { %5374 = vmatprep.subr.bf16.mxu0 %v6655_v13  ;;  %v6734_v13 = vcombine.low %v2042_v4, %v2046_v6  ;;  %v6727_v15 = vcombine.high %v2034_v21, %v2038_v28  ;;  %v2250_v2 = vld [vmem:[#allocation7 + $0x910] sm:$0xff]  ;;  %v6822_v4 = vcombine.low %v2130_v52, %v2134_v46 }
 0x260   :  { %v2254_v3 = vld [vmem:[#allocation7 + $0x930] sm:$0xff] }
 0x261   :  { %5334 = vmatpush1.bf16.msra.mxu1 %v7036_v24  ;;  %v2026_v24 = vld [vmem:[#allocation7 + $0x210] sm:$0xff] }
 0x262   :  { %5375 = vmatpush1.bf16.msra.mxu0 %v6654_v25  ;;  %5335 = vmatprep.subr.bf16.mxu1 %v7157_v26  ;;  %v2030_v25 = vld [vmem:[#allocation7 + $0x230] sm:$0xff]  ;;  %v7108_v26 = vcombine.low %v2417_v11, %v2421_v20 }
 0x263   :  { %5376 = vmatprep.subr.bf16.mxu0 %v6775_v29  ;;  %v6726_v29 = vcombine.low %v2034_v21, %v2038_v28  ;;  %v6719_v31 = vcombine.high %v2026_v24, %v2030_v25  ;;  %v2242_v11 = vld [vmem:[#allocation7 + $0x8d0] sm:$0xff]  ;;  %v6942_v28 = vcombine.low %v2250_v2, %v2254_v3 }
 0x264   :  { %v2246_v20 = vld [vmem:[#allocation7 + $0x8f0] sm:$0xff] }
 0x265   :  { %5336 = vmatpush2.bf16.msra.mxu1 %v7156_v37  ;;  %v2274_v37 = vld [vmem:[#allocation7 + $0x9d0] sm:$0xff] }
 0x266   :  { %5377 = vmatpush2.bf16.msra.mxu0 %v6774_v38  ;;  %5337 = vmatprep.subr.bf16.mxu1 %v7149_v39  ;;  %v2278_v38 = vld [vmem:[#allocation7 + $0x9f0] sm:$0xff]  ;;  %v7100_v39 = vcombine.low %v2409_v18, %v2413_v23 }
 0x267   :  { %5378 = vmatprep.subr.bf16.mxu0 %v6767_v40  ;;  %v6718_v40 = vcombine.low %v2026_v24, %v2030_v25  ;;  %v6967_v42 = vcombine.high %v2274_v37, %v2278_v38  ;;  %v2234_v18 = vld [vmem:[#allocation7 + $0x890] sm:$0xff]  ;;  %v6934_v25 = vcombine.low %v2242_v11, %v2246_v20 }
 0x268   :  { %v2238_v23 = vld [vmem:[#allocation7 + $0x8b0] sm:$0xff] }
 0x269   :  { %5338 = vmatpush2.bf16.msra.mxu1 %v7148_v45  ;;  %v6838_v45 = vcombine.low %v2146_v32, %v2150_v36  ;;  %v2226_v32 = vld [vmem:[#allocation7 + $0x850] sm:$0xff] }
 0x26a   :  { %5379 = vmatpush2.bf16.msra.mxu0 %v6766_v47  ;;  %5339 = vmatprep.subr.bf16.mxu1 %v7141_v48  ;;  %v2266_v47 = vld [vmem:[#allocation7 + $0x990] sm:$0xff] }
 0x26b   :  { %5380 = vmatprep.subr.bf16.mxu0 %v6759_v50  ;;  %v2270_v48 = vld [vmem:[#allocation7 + $0x9b0] sm:$0xff]  ;;  %v6966_v50 = vcombine.low %v2274_v37, %v2278_v38  ;;  %v6926_v38 = vcombine.low %v2234_v18, %v2238_v23 }
 0x26c   :  { %v6958_v58 = vcombine.low %v2266_v47, %v2270_v48  ;;  %v2230_v36 = vld [vmem:[#allocation7 + $0x870] sm:$0xff] }
 0x26d   :  { %5340 = vmatpush2.bf16.msra.mxu1 %v7140_v53  ;;  %v6959_v53 = vcombine.high %v2266_v47, %v2270_v48  ;;  %v6918_v47 = vcombine.low %v2226_v32, %v2230_v36  ;;  %v2214_v52 = vld [vmem:[#allocation7 + $0x7f0] sm:$0xff] }
 0x26e   :  { %5381 = vmatpush2.bf16.msra.mxu0 %v6758_v54  ;;  %5341 = vmatprep.subr.bf16.mxu1 %v7133_v56  ;;  %v2258_v54 = vld [vmem:[#allocation7 + $0x950] sm:$0xff] }
 0x26f   :  { %5382 = vmatprep.subr.bf16.mxu0 %v6751_v57  ;;  %v2262_v56 = vld [vmem:[#allocation7 + $0x970] sm:$0xff] }
 0x270   :  { %v2338_v46 = vld [vmem:[#allocation7 + $0xbd0] sm:$0xff] }
 0x271   :  { %5342 = vmatpush2.bf16.msra.mxu1 %v7132_v19 }
 0x272   :  { %5383 = vmatpush2.bf16.msra.mxu0 %v6750_v59  ;;  %5343 = vmatprep.subr.bf16.mxu1 %v7125_v0  ;;  %v6951_v59 = vcombine.high %v2258_v54, %v2262_v56  ;;  %v2122_v0 = vld [vmem:[#allocation7 + $0x510] sm:$0xff] }
 0x273   :  { %5384 = vmatprep.subr.bf16.mxu0 %v6743_v1  ;;  %v2126_v1 = vld [vmem:[#allocation7 + $0x530] sm:$0xff] }
 0x274   :  { %v6814_v21 = vcombine.low %v2122_v0, %v2126_v1 }
 0x275   :  { %5344 = vmatpush2.bf16.msra.mxu1 %v7124_v7  ;;  %v6950_v7 = vcombine.low %v2258_v54, %v2262_v56  ;;  %v6910_v54 = vcombine.low %v2218_v43, %v2222_v44 }
 0x276   :  { %5385 = vmatpush2.bf16.msra.mxu0 %v6742_v8  ;;  %5345 = vmatprep.subr.bf16.mxu1 %v7117_v9  ;;  %v6815_v8 = vcombine.high %v2122_v0, %v2126_v1  ;;  %v6943_v9 = vcombine.high %v2250_v2, %v2254_v3  ;;  %v2194_v3 = vld [vmem:[#allocation7 + $0x750] sm:$0xff] }
 0x277   :  { %5386 = vmatprep.subr.bf16.mxu0 %v6735_v10  ;;  %v2114_v10 = vld [vmem:[#allocation7 + $0x4d0] sm:$0xff] }
 0x279   :  { %5346 = vmatpush2.bf16.msra.mxu1 %v7116_v12 }
 0x27a   :  { %5387 = vmatpush2.bf16.msra.mxu0 %v6734_v13  ;;  %5347 = vmatprep.subr.bf16.mxu1 %v7109_v14  ;;  %v6935_v13 = vcombine.high %v2242_v11, %v2246_v20  ;;  %v2106_v14 = vld [vmem:[#allocation7 + $0x490] sm:$0xff] }
 0x27b   :  { %5388 = vmatprep.subr.bf16.mxu0 %v6727_v15  ;;  %v2110_v15 = vld [vmem:[#allocation7 + $0x4b0] sm:$0xff] }
 0x27c   :  { %v6798_v37 = vcombine.low %v2106_v14, %v2110_v15  ;;  %v2186_v11 = vld [vmem:[#allocation7 + $0x710] sm:$0xff] }
 0x27d   :  { %5348 = vmatpush2.bf16.msra.mxu1 %v7108_v26  ;;  %v6799_v26 = vcombine.high %v2106_v14, %v2110_v15  ;;  %v2190_v20 = vld [vmem:[#allocation7 + $0x730] sm:$0xff] }
 0x27e   :  { %5389 = vmatpush2.bf16.msra.mxu0 %v6726_v29  ;;  %5349 = vmatprep.subr.bf16.mxu1 %v7101_v30  ;;  %v6927_v29 = vcombine.high %v2234_v18, %v2238_v23  ;;  %v2098_v30 = vld [vmem:[#allocation7 + $0x450] sm:$0xff]  ;;  %v6879_v14 = vcombine.high %v2186_v11, %v2190_v20 }
 0x27f   :  { %5390 = vmatprep.subr.bf16.mxu0 %v6719_v31  ;;  %v2102_v31 = vld [vmem:[#allocation7 + $0x470] sm:$0xff] }
 0x280   :  { %v2178_v18 = vld [vmem:[#allocation7 + $0x6d0] sm:$0xff] }
 0x281   :  { %5350 = vmatpush2.bf16.msra.mxu1 %v7100_v39  ;;  %v6791_v39 = vcombine.high %v2098_v30, %v2102_v31  ;;  %v2182_v23 = vld [vmem:[#allocation7 + $0x6f0] sm:$0xff] }
 0x282   :  { %5391 = vmatpush2.bf16.msra.mxu0 %v6718_v40  ;;  %5401 = vmatprep.subr.bf16.mxu1 %v6839_v41  ;;  %v6919_v40 = vcombine.high %v2226_v32, %v2230_v36  ;;  %v2090_v41 = vld [vmem:[#allocation7 + $0x410] sm:$0xff] }
 0x283   :  { %5442 = vmatprep.subr.bf16.mxu0 %v6967_v42  ;;  %v2094_v42 = vld [vmem:[#allocation7 + $0x430] sm:$0xff] }
 0x284   :  { %5352 = vmatmul.mubr.bf16.vlgmr.msra.gmra.mxu1 %v7608_v62  ;;  %v5148_v49 = vpop.f32.mrf.mxu0  ;;  %v6783_v48 = vcombine.high %v2090_v41, %v2094_v42  ;;  %v2170_v32 = vld [vmem:[#allocation7 + $0x690] sm:$0xff] }
 0x285   :  { %5393 = vmatmul.mubr.bf16.vlgmr.msra.gmra.mxu0 %v7580_v55  ;;  %v7629_v57 = vadd.f32 %v5148_v49, %v7620_v27  ;;  %5402 = vmatpush1.bf16.msra.mxu1 %v6838_v45  ;;  %v6790_v45 = vcombine.low %v2098_v30, %v2102_v31  ;;  %v2342_v49 = vld [vmem:[#allocation7 + $0xbf0] sm:$0xff]  ;;  %v6871_v30 = vcombine.high %v2178_v18, %v2182_v23 }
 0x286   :  { %5433 = vmatprep.mubr.bf16.mxu1 %v7583_v17  ;;  %5443 = vmatpush1.bf16.msra.mxu0 %v6966_v50  ;;  %v5150_v61 = vpop.f32.mrf.mxu0  ;;  %v6911_v50 = vcombine.high %v2218_v43, %v2222_v44  ;;  %v7030_v1 = vcombine.low %v2338_v46, %v2342_v49  ;;  %v2174_v36 = vld [vmem:[#allocation7 + $0x6b0] sm:$0xff] }
 0x287   :  { %5474 = vmatprep.mubr.bf16.mxu0 %v7599_v33  ;;  %v7634_v19 = vadd.f32 %v5150_v61, %v7624_v34  ;;  %5403 = vmatprep.subr.bf16.mxu1 %v6831_v51  ;;  %v2118_v34 = vld [vmem:[#allocation7 + $0x4f0] sm:$0xff] }
 0x288   :  { %5444 = vmatprep.subr.bf16.mxu0 %v6959_v53  ;;  %v5152_v27 = vpop.f32.mrf.mxu0  ;;  %v6807_v12 = vcombine.high %v2114_v10, %v2118_v34  ;;  %v6806_v24 = vcombine.low %v2114_v10, %v2118_v34  ;;  %v2210_v51 = vld [vmem:[#allocation7 + $0x7d0] sm:$0xff]  ;;  %v6782_v53 = vcombine.low %v2090_v41, %v2094_v42  ;;  %v6863_v41 = vcombine.high %v2170_v32, %v2174_v36 }
 0x289   :  { %5404 = vmatpush1.bf16.msra.mxu1 %v6830_v60  ;;  %v6903_v56 = vcombine.high %v2210_v51, %v2214_v52  ;;  %v7031_v60 = vcombine.high %v2338_v46, %v2342_v49  ;;  %v2202_v61 = vld [vmem:[#allocation7 + $0x790] sm:$0xff]  ;;  %v6902_v0 = vcombine.low %v2210_v51, %v2214_v52 }
 0x28a   :  { %5445 = vmatpush1.bf16.msra.mxu0 %v6958_v58  ;;  %v5153_v6 = vpop.f32.mrf.mxu0  ;;  %5405 = vmatprep.subr.bf16.mxu1 %v6823_v63  ;;  %v2206_v58 = vld [vmem:[#allocation7 + $0x7b0] sm:$0xff] }
 0x28b   :  { %5446 = vmatprep.subr.bf16.mxu0 %v6951_v59  ;;  %v2330_v63 = vld [vmem:[#allocation7 + $0xb90] sm:$0xff]  ;;  %v6895_v27 = vcombine.high %v2202_v61, %v2206_v58 }
 0x28c   :  { %v2334_v59 = vld [vmem:[#allocation7 + $0xbb0] sm:$0xff] }
 0x28d   :  { %5406 = vmatpush1.bf16.msra.mxu1 %v6822_v4  ;;  %v7023_v2 = vcombine.high %v2330_v63, %v2334_v59  ;;  %v2198_v4 = vld [vmem:[#allocation7 + $0x770] sm:$0xff] }
 0x28e   :  { %5447 = vmatpush1.bf16.msra.mxu0 %v6950_v7  ;;  %5407 = vmatprep.subr.bf16.mxu1 %v6815_v8  ;;  %v2322_v6 = vld [vmem:[#allocation7 + $0xb50] sm:$0xff]  ;;  %v6894_v8 = vcombine.low %v2202_v61, %v2206_v58  ;;  %v6887_v10 = vcombine.high %v2194_v3, %v2198_v4 }
 0x28f   :  { %5448 = vmatprep.subr.bf16.mxu0 %v6943_v9  ;;  %v2326_v7 = vld [vmem:[#allocation7 + $0xb70] sm:$0xff]  ;;  %v7022_v9 = vcombine.low %v2330_v63, %v2334_v59 }
 0x290   :  { %v7015_v34 = vcombine.high %v2322_v6, %v2326_v7  ;;  %v2162_v43 = vld [vmem:[#allocation7 + $0x650] sm:$0xff] }
 0x291   :  { %5408 = vmatpush1.bf16.msra.mxu1 %v6814_v21  ;;  %v2314_v21 = vld [vmem:[#allocation7 + $0xb10] sm:$0xff] }
 0x292   :  { %5449 = vmatpush1.bf16.msra.mxu0 %v6942_v28  ;;  %5409 = vmatprep.subr.bf16.mxu1 %v6807_v12  ;;  %v2318_v28 = vld [vmem:[#allocation7 + $0xb30] sm:$0xff]  ;;  %v6886_v12 = vcombine.low %v2194_v3, %v2198_v4 }
 0x293   :  { %5450 = vmatprep.subr.bf16.mxu0 %v6935_v13  ;;  %v7014_v13 = vcombine.low %v2322_v6, %v2326_v7  ;;  %v7007_v15 = vcombine.high %v2314_v21, %v2318_v28  ;;  %v2166_v44 = vld [vmem:[#allocation7 + $0x670] sm:$0xff] }
 0x294   :  { %v6855_v51 = vcombine.high %v2162_v43, %v2166_v44  ;;  %v2154_v46 = vld [vmem:[#allocation7 + $0x610] sm:$0xff] }
 0x295   :  { %5410 = vmatpush1.bf16.msra.mxu1 %v6806_v24  ;;  %v2306_v24 = vld [vmem:[#allocation7 + $0xad0] sm:$0xff] }
 0x296   :  { %5451 = vmatpush1.bf16.msra.mxu0 %v6934_v25  ;;  %5411 = vmatprep.subr.bf16.mxu1 %v6799_v26  ;;  %v2310_v25 = vld [vmem:[#allocation7 + $0xaf0] sm:$0xff]  ;;  %v6878_v26 = vcombine.low %v2186_v11, %v2190_v20 }
 0x297   :  { %5452 = vmatprep.subr.bf16.mxu0 %v6927_v29  ;;  %v7006_v29 = vcombine.low %v2314_v21, %v2318_v28  ;;  %v6999_v31 = vcombine.high %v2306_v24, %v2310_v25  ;;  %v2158_v49 = vld [vmem:[#allocation7 + $0x630] sm:$0xff] }
 0x298   :  { %v6847_v61 = vcombine.high %v2154_v46, %v2158_v49  ;;  %v2402_v63 = vld [vmem:[#allocation7 + $0xdd0] sm:$0xff] }
 0x299   :  { %5412 = vmatpush1.bf16.msra.mxu1 %v6798_v37  ;;  %v2298_v37 = vld [vmem:[#allocation7 + $0xa90] sm:$0xff] }
 0x29a   :  { %5453 = vmatpush1.bf16.msra.mxu0 %v6926_v38  ;;  %5413 = vmatprep.subr.bf16.mxu1 %v6791_v39  ;;  %v2302_v38 = vld [vmem:[#allocation7 + $0xab0] sm:$0xff]  ;;  %v6870_v39 = vcombine.low %v2178_v18, %v2182_v23 }
 0x29b   :  { %5454 = vmatprep.subr.bf16.mxu0 %v6919_v40  ;;  %v6998_v40 = vcombine.low %v2306_v24, %v2310_v25  ;;  %v6991_v42 = vcombine.high %v2298_v37, %v2302_v38  ;;  %v2406_v59 = vld [vmem:[#allocation7 + $0xdf0] sm:$0xff] }
 0x29c   :  { %v7095_v3 = vcombine.high %v2402_v63, %v2406_v59  ;;  %v2394_v6 = vld [vmem:[#allocation7 + $0xd90] sm:$0xff] }
 0x29d   :  { %5414 = vmatpush1.bf16.msra.mxu1 %v6790_v45  ;;  %v2290_v45 = vld [vmem:[#allocation7 + $0xa50] sm:$0xff] }
 0x29e   :  { %5455 = vmatpush1.bf16.msra.mxu0 %v6918_v47  ;;  %5415 = vmatprep.subr.bf16.mxu1 %v6783_v48  ;;  %v2294_v47 = vld [vmem:[#allocation7 + $0xa70] sm:$0xff]  ;;  %v6862_v48 = vcombine.low %v2170_v32, %v2174_v36 }
 0x29f   :  { %5456 = vmatprep.subr.bf16.mxu0 %v6911_v50  ;;  %v6990_v50 = vcombine.low %v2298_v37, %v2302_v38  ;;  %v6983_v52 = vcombine.high %v2290_v45, %v2294_v47  ;;  %v2398_v7 = vld [vmem:[#allocation7 + $0xdb0] sm:$0xff]  ;;  %v1995_v38 = vld [vmem:[#allocation7 + $0x118] sm:$0xff] }
 0x2a0   :  { %v7087_v11 = vcombine.high %v2394_v6, %v2398_v7  ;;  %v2386_v20 = vld [vmem:[#allocation7 + $0xd50] sm:$0xff]  ;;  %v7086_v23 = vcombine.low %v2394_v6, %v2398_v7 }
 0x2a1   :  { %5416 = vmatpush1.bf16.msra.mxu1 %v6782_v53  ;;  %v2282_v53 = vld [vmem:[#allocation7 + $0xa10] sm:$0xff] }
 0x2a2   :  { %5457 = vmatpush1.bf16.msra.mxu0 %v6910_v54  ;;  %5417 = vmatprep.subr.bf16.mxu1 %v6903_v56  ;;  %v2286_v54 = vld [vmem:[#allocation7 + $0xa30] sm:$0xff]  ;;  %v6854_v56 = vcombine.low %v2162_v43, %v2166_v44 }
 0x2a3   :  { %5458 = vmatprep.subr.bf16.mxu0 %v7031_v60  ;;  %v6982_v60 = vcombine.low %v2290_v45, %v2294_v47  ;;  %v6975_v58 = vcombine.high %v2282_v53, %v2286_v54  ;;  %v2390_v21 = vld [vmem:[#allocation7 + $0xd70] sm:$0xff]  ;;  %v1987_v47 = vld [vmem:[#allocation7 + $0xd8] sm:$0xff] }
 0x2a4   :  { %v2378_v32 = vld [vmem:[#allocation7 + $0xd10] sm:$0xff] }
 0x2a5   :  { %5418 = vmatpush2.bf16.msra.mxu1 %v6902_v0  ;;  %v2019_v0 = vld [vmem:[#allocation7 + $0x1d8] sm:$0xff]  ;;  %v2370_v44 = vld [vmem:[#allocation7 + $0xcd0] sm:$0xff] }
 0x2a6   :  { %5459 = vmatpush2.bf16.msra.mxu0 %v7030_v1  ;;  %5419 = vmatprep.subr.bf16.mxu1 %v6895_v27  ;;  %v2023_v1 = vld [vmem:[#allocation7 + $0x1f8] sm:$0xff]  ;;  %v6846_v27 = vcombine.low %v2154_v46, %v2158_v49  ;;  %v2374_v45 = vld [vmem:[#allocation7 + $0xcf0] sm:$0xff] }
 0x2a7   :  { %5460 = vmatprep.subr.bf16.mxu0 %v7023_v2  ;;  %v6974_v2 = vcombine.low %v2282_v53, %v2286_v54  ;;  %v6713_v4 = vcombine.high %v2019_v0, %v2023_v1  ;;  %v2362_v49 = vld [vmem:[#allocation7 + $0xc90] sm:$0xff]  ;;  %v1979_v54 = vld [vmem:[#allocation7 + $0x98] sm:$0xff] }
 0x2a8   :  { %v2366_v53 = vld [vmem:[#allocation7 + $0xcb0] sm:$0xff] }
 0x2a9   :  { %5420 = vmatpush2.bf16.msra.mxu1 %v6894_v8  ;;  %v7094_v8 = vcombine.low %v2402_v63, %v2406_v59  ;;  %v2354_v59 = vld [vmem:[#allocation7 + $0xc50] sm:$0xff] }
 0x2aa   :  { %5461 = vmatpush2.bf16.msra.mxu0 %v7022_v9  ;;  %5421 = vmatprep.subr.bf16.mxu1 %v6887_v10  ;;  %v2011_v9 = vld [vmem:[#allocation7 + $0x198] sm:$0xff]  ;;  %v2346_v7 = vld [vmem:[#allocation7 + $0xc10] sm:$0xff] }
 0x2ab   :  { %5462 = vmatprep.subr.bf16.mxu0 %v7015_v34  ;;  %v2015_v10 = vld [vmem:[#allocation7 + $0x1b8] sm:$0xff]  ;;  %v6712_v34 = vcombine.low %v2019_v0, %v2023_v1  ;;  %v2358_v0 = vld [vmem:[#allocation7 + $0xc70] sm:$0xff] }
 0x2ac   :  { %v1971_v1 = vld [vmem:[#allocation7 + $0x58] sm:$0xff] }
 0x2ad   :  { %5422 = vmatpush2.bf16.msra.mxu1 %v6886_v12 }
 0x2ae   :  { %5463 = vmatpush2.bf16.msra.mxu0 %v7014_v13  ;;  %5423 = vmatprep.subr.bf16.mxu1 %v6879_v14  ;;  %v6705_v13 = vcombine.high %v2011_v9, %v2015_v10  ;;  %v2003_v14 = vld [vmem:[#allocation7 + $0x158] sm:$0xff] }
 0x2af   :  { %5464 = vmatprep.subr.bf16.mxu0 %v7007_v15  ;;  %v2007_v15 = vld [vmem:[#allocation7 + $0x178] sm:$0xff] }
 0x2b0   :  { %v6696_v43 = vcombine.low %v2003_v14, %v2007_v15 }
 0x2b1   :  { %5424 = vmatpush2.bf16.msra.mxu1 %v6878_v26  ;;  %v6704_v26 = vcombine.low %v2011_v9, %v2015_v10  ;;  %v1963_v9 = vld [vmem:[#allocation7 + $0x18] sm:$0xff] }
 0x2b2   :  { %5465 = vmatpush2.bf16.msra.mxu0 %v7006_v29  ;;  %5425 = vmatprep.subr.bf16.mxu1 %v6871_v30  ;;  %v7079_v29 = vcombine.high %v2386_v20, %v2390_v21  ;;  %v1967_v10 = vld [vmem:[#allocation7 + $0x38] sm:$0xff] }
 0x2b3   :  { %5466 = vmatprep.subr.bf16.mxu0 %v6999_v31  ;;  %v6697_v31 = vcombine.high %v2003_v14, %v2007_v15  ;;  %v2083_v14 = vld [vmem:[#allocation7 + $0x3d8] sm:$0xff] }
 0x2b4   :  { %v2087_v15 = vld [vmem:[#allocation7 + $0x3f8] sm:$0xff] }
 0x2b5   :  { %5426 = vmatpush2.bf16.msra.mxu1 %v6870_v39  ;;  %v1999_v39 = vld [vmem:[#allocation7 + $0x138] sm:$0xff] }
 0x2b6   :  { %5467 = vmatpush2.bf16.msra.mxu0 %v6998_v40  ;;  %5427 = vmatprep.subr.bf16.mxu1 %v6863_v41  ;;  %v7078_v40 = vcombine.low %v2386_v20, %v2390_v21  ;;  %v6657_v21 = vcombine.high %v1963_v9, %v1967_v10 }
 0x2b7   :  { %5468 = vmatprep.subr.bf16.mxu0 %v6991_v42 }
 0x2b9   :  { %5428 = vmatpush2.bf16.msra.mxu1 %v6862_v48  ;;  %v1991_v48 = vld [vmem:[#allocation7 + $0xf8] sm:$0xff] }
 0x2ba   :  { %5469 = vmatpush2.bf16.msra.mxu0 %v6990_v50  ;;  %5429 = vmatprep.subr.bf16.mxu1 %v6855_v51  ;;  %v6688_v51 = vcombine.low %v1995_v38, %v1999_v39  ;;  %v6681_v46 = vcombine.high %v1987_v47, %v1991_v48 }
 0x2bb   :  { %5470 = vmatprep.subr.bf16.mxu0 %v6983_v52  ;;  %v7063_v52 = vcombine.high %v2370_v44, %v2374_v45 }
 0x2bd   :  { %5430 = vmatpush2.bf16.msra.mxu1 %v6854_v56  ;;  %v1983_v56 = vld [vmem:[#allocation7 + $0xb8] sm:$0xff] }
 0x2be   :  { %5471 = vmatpush2.bf16.msra.mxu0 %v6982_v60  ;;  %5431 = vmatprep.subr.bf16.mxu1 %v6847_v61  ;;  %v7062_v60 = vcombine.low %v2370_v44, %v2374_v45  ;;  %v6680_v61 = vcombine.low %v1987_v47, %v1991_v48  ;;  %v6673_v63 = vcombine.high %v1979_v54, %v1983_v56  ;;  %v2442_v48 = vld [vmem:[#allocation7 + $0xf10] sm:$0xff] }
 0x2bf   :  { %5472 = vmatprep.subr.bf16.mxu0 %v6975_v58  ;;  %v7055_v58 = vcombine.high %v2362_v49, %v2366_v53 }
 0x2c1   :  { %5432 = vmatpush2.bf16.msra.mxu1 %v6846_v27  ;;  %v1975_v27 = vld [vmem:[#allocation7 + $0x78] sm:$0xff] }
 0x2c2   :  { %5473 = vmatpush2.bf16.msra.mxu0 %v6974_v2  ;;  %5483 = vmatprep.subr.bf16.mxu1 %v7095_v3  ;;  %v7054_v2 = vcombine.low %v2362_v49, %v2366_v53  ;;  %v6672_v3 = vcombine.low %v1979_v54, %v1983_v56  ;;  %v6665_v6 = vcombine.high %v1971_v1, %v1975_v27  ;;  %v2434_v56 = vld [vmem:[#allocation7 + $0xed0] sm:$0xff] }
 0x2c3   :  { %5524 = vmatprep.subr.bf16.mxu0 %v6713_v4  ;;  %v7047_v4 = vcombine.high %v2354_v59, %v2358_v0 }
 0x2c4   :  { %v7636_v28 = vpop.f32.mrf.mxu0  ;;  %5434 = vmatmul.mubr.bf16.vlgmr.msra.gmra.mxu1 %v7591_v22  ;;  %v5189_v12 = vpop.f32.mrf.mxu1 }
 0x2c5   :  { %5475 = vmatmul.mubr.bf16.vlgmr.msra.gmra.mxu0 %v7601_v35  ;;  %v7641_v18 = vadd.f32 %v5189_v12, %v7629_v57  ;;  %5484 = vmatpush1.bf16.msra.mxu1 %v7094_v8  ;;  %v2382_v57 = vld [vmem:[#allocation7 + $0xd30] sm:$0xff] }
 0x2c6   :  { %5515 = vmatprep.mubr.bf16.mxu1 %v7606_v16  ;;  %5525 = vmatpush1.bf16.msra.mxu0 %v6712_v34  ;;  %v7644_v24 = vpop.f32.mrf.mxu0  ;;  %v5191_v25 = vpop.f32.mrf.mxu1  ;;  %v7070_v50 = vcombine.low %v2378_v32, %v2382_v57  ;;  %v2350_v8 = vld [vmem:[#allocation7 + $0xc30] sm:$0xff]  ;;  %v7046_v34 = vcombine.low %v2354_v59, %v2358_v0 }
 0x2c7   :  { %5556 = vmatprep.mubr.bf16.mxu0 %v7569_v5  ;;  %v7648_v30 = vadd.f32 %v5191_v25, %v7634_v19  ;;  %5485 = vmatprep.subr.bf16.mxu1 %v7087_v11  ;;  %v7071_v5 = vcombine.high %v2378_v32, %v2382_v57  ;;  %v6689_v19 = vcombine.high %v1995_v38, %v1999_v39  ;;  %v2466_v12 = vld [vmem:[#allocation7 + $0xfd0] sm:$0xff]  ;;  %v2075_v57 = vld [vmem:[#allocation7 + $0x398] sm:$0xff] }
 0x2c8   :  { %v5234_v36 = vpop.f32.mrf.mxu0  ;;  %5526 = vmatprep.subr.bf16.mxu0 %v6705_v13  ;;  %v5193_v37 = vpop.f32.mrf.mxu1  ;;  %v6664_v11 = vcombine.low %v1971_v1, %v1975_v27  ;;  %v7039_v20 = vcombine.high %v2346_v7, %v2350_v8  ;;  %v2470_v13 = vld [vmem:[#allocation7 + $0xff0] sm:$0xff]  ;;  %v6656_v25 = vcombine.low %v1963_v9, %v1967_v10  ;;  %v6776_v38 = vcombine.low %v2083_v14, %v2087_v15 }
 0x2c9   :  { %5486 = vmatpush1.bf16.msra.mxu1 %v7086_v23  ;;  %v7038_v23 = vcombine.low %v2346_v7, %v2350_v8  ;;  %v2462_v32 = vld [vmem:[#allocation7 + $0xfb0] sm:$0xff]  ;;  %v2079_v36 = vld [vmem:[#allocation7 + $0x3b8] sm:$0xff]  ;;  %v7158_v37 = vcombine.low %v2466_v12, %v2470_v13 }
 0x2ca   :  { %5527 = vmatpush1.bf16.msra.mxu0 %v6704_v26  ;;  %v5235_v41 = vpop.f32.mrf.mxu0  ;;  %v5194_v42 = vpop.f32.mrf.mxu1  ;;  %5487 = vmatprep.subr.bf16.mxu1 %v7079_v29  ;;  %v7159_v26 = vcombine.high %v2466_v12, %v2470_v13  ;;  %v6777_v29 = vcombine.high %v2083_v14, %v2087_v15  ;;  %v6768_v44 = vcombine.low %v2075_v57, %v2079_v36  ;;  %v2426_v27 = vld [vmem:[#allocation7 + $0xe90] sm:$0xff] }
 0x2cb   :  { %5528 = vmatprep.subr.bf16.mxu0 %v6697_v31  ;;  %v2458_v31 = vld [vmem:[#allocation7 + $0xf90] sm:$0xff] }
 0x2cc   :  { %v7151_v39 = vcombine.high %v2458_v31, %v2462_v32  ;;  %v2450_v41 = vld [vmem:[#allocation7 + $0xf50] sm:$0xff] }
 0x2cd   :  { %5488 = vmatpush1.bf16.msra.mxu1 %v7078_v40  ;;  %v6769_v40 = vcombine.high %v2075_v57, %v2079_v36  ;;  %v2454_v42 = vld [vmem:[#allocation7 + $0xf70] sm:$0xff]  ;;  %v2147_v36 = vld [vmem:[#allocation7 + $0x5d8] sm:$0xff] }
 0x2ce   :  { %5529 = vmatpush1.bf16.msra.mxu0 %v6696_v43  ;;  %5489 = vmatprep.subr.bf16.mxu1 %v7071_v5  ;;  %v2067_v43 = vld [vmem:[#allocation7 + $0x358] sm:$0xff]  ;;  %v7143_v45 = vcombine.high %v2450_v41, %v2454_v42  ;;  %v2418_v10 = vld [vmem:[#allocation7 + $0xe50] sm:$0xff] }
 0x2cf   :  { %5530 = vmatprep.subr.bf16.mxu0 %v6689_v19  ;;  %v2071_v5 = vld [vmem:[#allocation7 + $0x378] sm:$0xff]  ;;  %v7150_v19 = vcombine.low %v2458_v31, %v2462_v32  ;;  %v2410_v15 = vld [vmem:[#allocation7 + $0xe10] sm:$0xff] }
 0x2d0   :  { %v6761_v47 = vcombine.high %v2067_v43, %v2071_v5  ;;  %v6760_v49 = vcombine.low %v2067_v43, %v2071_v5  ;;  %v2139_v5 = vld [vmem:[#allocation7 + $0x598] sm:$0xff] }
 0x2d1   :  { %5490 = vmatpush1.bf16.msra.mxu1 %v7070_v50  ;;  %v2446_v50 = vld [vmem:[#allocation7 + $0xf30] sm:$0xff] }
 0x2d2   :  { %5531 = vmatpush1.bf16.msra.mxu0 %v6688_v51  ;;  %5491 = vmatprep.subr.bf16.mxu1 %v7063_v52  ;;  %v2059_v51 = vld [vmem:[#allocation7 + $0x318] sm:$0xff]  ;;  %v7135_v53 = vcombine.high %v2442_v48, %v2446_v50 }
 0x2d3   :  { %5532 = vmatprep.subr.bf16.mxu0 %v6681_v46  ;;  %v2063_v52 = vld [vmem:[#allocation7 + $0x338] sm:$0xff]  ;;  %v7142_v46 = vcombine.low %v2450_v41, %v2454_v42 }
 0x2d4   :  { %v6753_v54 = vcombine.high %v2059_v51, %v2063_v52  ;;  %v6752_v59 = vcombine.low %v2059_v51, %v2063_v52  ;;  %v2131_v51 = vld [vmem:[#allocation7 + $0x558] sm:$0xff] }
 0x2d5   :  { %5492 = vmatpush1.bf16.msra.mxu1 %v7062_v60  ;;  %v2438_v60 = vld [vmem:[#allocation7 + $0xef0] sm:$0xff]  ;;  %v2135_v52 = vld [vmem:[#allocation7 + $0x578] sm:$0xff] }
 0x2d6   :  { %5533 = vmatpush1.bf16.msra.mxu0 %v6680_v61  ;;  %5493 = vmatprep.subr.bf16.mxu1 %v7055_v58  ;;  %v2051_v61 = vld [vmem:[#allocation7 + $0x2d8] sm:$0xff]  ;;  %v7127_v0 = vcombine.high %v2434_v56, %v2438_v60 }
 0x2d7   :  { %5534 = vmatprep.subr.bf16.mxu0 %v6673_v63  ;;  %v2055_v58 = vld [vmem:[#allocation7 + $0x2f8] sm:$0xff]  ;;  %v7134_v63 = vcombine.low %v2442_v48, %v2446_v50 }
 0x2d8   :  { %v6745_v1 = vcombine.high %v2051_v61, %v2055_v58  ;;  %v6744_v7 = vcombine.low %v2051_v61, %v2055_v58 }
 0x2d9   :  { %5494 = vmatpush1.bf16.msra.mxu1 %v7054_v2  ;;  %v2430_v2 = vld [vmem:[#allocation7 + $0xeb0] sm:$0xff] }
 0x2da   :  { %5535 = vmatpush1.bf16.msra.mxu0 %v6672_v3  ;;  %5495 = vmatprep.subr.bf16.mxu1 %v7047_v4  ;;  %v2043_v3 = vld [vmem:[#allocation7 + $0x298] sm:$0xff]  ;;  %v7119_v8 = vcombine.high %v2426_v27, %v2430_v2 }
 0x2db   :  { %5536 = vmatprep.subr.bf16.mxu0 %v6665_v6  ;;  %v2047_v4 = vld [vmem:[#allocation7 + $0x2b8] sm:$0xff]  ;;  %v7126_v6 = vcombine.low %v2434_v56, %v2438_v60 }
 0x2dc   :  { %v6737_v9 = vcombine.high %v2043_v3, %v2047_v4  ;;  %v6736_v12 = vcombine.low %v2043_v3, %v2047_v4  ;;  %v2263_v56 = vld [vmem:[#allocation7 + $0x978] sm:$0xff] }
 0x2dd   :  { %5496 = vmatpush1.bf16.msra.mxu1 %v7046_v34  ;;  %v2422_v34 = vld [vmem:[#allocation7 + $0xe70] sm:$0xff]  ;;  %v2127_v3 = vld [vmem:[#allocation7 + $0x538] sm:$0xff] }
 0x2de   :  { %5537 = vmatpush1.bf16.msra.mxu0 %v6664_v11  ;;  %5497 = vmatprep.subr.bf16.mxu1 %v7039_v20  ;;  %v2035_v11 = vld [vmem:[#allocation7 + $0x258] sm:$0xff]  ;;  %v7111_v13 = vcombine.high %v2418_v10, %v2422_v34 }
 0x2df   :  { %5538 = vmatprep.subr.bf16.mxu0 %v6657_v21  ;;  %v2039_v20 = vld [vmem:[#allocation7 + $0x278] sm:$0xff]  ;;  %v7118_v21 = vcombine.low %v2426_v27, %v2430_v2 }
 0x2e0   :  { %v6729_v14 = vcombine.high %v2035_v11, %v2039_v20  ;;  %v6728_v31 = vcombine.low %v2035_v11, %v2039_v20  ;;  %v2115_v11 = vld [vmem:[#allocation7 + $0x4d8] sm:$0xff] }
 0x2e1   :  { %5498 = vmatpush1.bf16.msra.mxu1 %v7038_v23  ;;  %v2414_v23 = vld [vmem:[#allocation7 + $0xe30] sm:$0xff]  ;;  %v2119_v20 = vld [vmem:[#allocation7 + $0x4f8] sm:$0xff] }
 0x2e2   :  { %5539 = vmatpush1.bf16.msra.mxu0 %v6656_v25  ;;  %5499 = vmatprep.subr.bf16.mxu1 %v7159_v26  ;;  %v2027_v25 = vld [vmem:[#allocation7 + $0x218] sm:$0xff]  ;;  %v7103_v32 = vcombine.high %v2410_v15, %v2414_v23 }
 0x2e3   :  { %5540 = vmatprep.subr.bf16.mxu0 %v6777_v29  ;;  %v2031_v26 = vld [vmem:[#allocation7 + $0x238] sm:$0xff]  ;;  %v7110_v29 = vcombine.low %v2418_v10, %v2422_v34 }
 0x2e4   :  { %v6721_v57 = vcombine.high %v2027_v25, %v2031_v26  ;;  %v6720_v41 = vcombine.low %v2027_v25, %v2031_v26  ;;  %v2107_v25 = vld [vmem:[#allocation7 + $0x498] sm:$0xff] }
 0x2e5   :  { %5500 = vmatpush2.bf16.msra.mxu1 %v7158_v37  ;;  %v2151_v37 = vld [vmem:[#allocation7 + $0x5f8] sm:$0xff] }
 0x2e6   :  { %5541 = vmatpush2.bf16.msra.mxu0 %v6776_v38  ;;  %5501 = vmatprep.subr.bf16.mxu1 %v7151_v39  ;;  %v2275_v38 = vld [vmem:[#allocation7 + $0x9d8] sm:$0xff]  ;;  %v6841_v42 = vcombine.high %v2147_v36, %v2151_v37 }
 0x2e7   :  { %5542 = vmatprep.subr.bf16.mxu0 %v6769_v40  ;;  %v2279_v39 = vld [vmem:[#allocation7 + $0x9f8] sm:$0xff]  ;;  %v7102_v40 = vcombine.low %v2410_v15, %v2414_v23  ;;  %v6809_v15 = vcombine.high %v2115_v11, %v2119_v20 }
 0x2e8   :  { %v6969_v43 = vcombine.high %v2275_v38, %v2279_v39  ;;  %v6968_v48 = vcombine.low %v2275_v38, %v2279_v39  ;;  %v2111_v26 = vld [vmem:[#allocation7 + $0x4b8] sm:$0xff] }
 0x2e9   :  { %5502 = vmatpush2.bf16.msra.mxu1 %v7150_v19  ;;  %v2143_v19 = vld [vmem:[#allocation7 + $0x5b8] sm:$0xff] }
 0x2ea   :  { %5543 = vmatpush2.bf16.msra.mxu0 %v6768_v44  ;;  %5503 = vmatprep.subr.bf16.mxu1 %v7143_v45  ;;  %v6840_v44 = vcombine.low %v2147_v36, %v2151_v37  ;;  %v2267_v45 = vld [vmem:[#allocation7 + $0x998] sm:$0xff]  ;;  %v6833_v50 = vcombine.high %v2139_v5, %v2143_v19  ;;  %v6832_v61 = vcombine.low %v2139_v5, %v2143_v19 }
 0x2eb   :  { %5544 = vmatprep.subr.bf16.mxu0 %v6761_v47  ;;  %v2271_v47 = vld [vmem:[#allocation7 + $0x9b8] sm:$0xff]  ;;  %v6801_v36 = vcombine.high %v2107_v25, %v2111_v26 }
 0x2ec   :  { %v2099_v38 = vld [vmem:[#allocation7 + $0x458] sm:$0xff] }
 0x2ed   :  { %5504 = vmatpush2.bf16.msra.mxu1 %v7142_v46  ;;  %v2103_v39 = vld [vmem:[#allocation7 + $0x478] sm:$0xff] }
 0x2ee   :  { %5545 = vmatpush2.bf16.msra.mxu0 %v6760_v49  ;;  %5505 = vmatprep.subr.bf16.mxu1 %v7135_v53  ;;  %v6961_v53 = vcombine.high %v2267_v45, %v2271_v47  ;;  %v6793_v5 = vcombine.high %v2099_v38, %v2103_v39 }
 0x2ef   :  { %5546 = vmatprep.subr.bf16.mxu0 %v6753_v54  ;;  %v2259_v54 = vld [vmem:[#allocation7 + $0x958] sm:$0xff] }
 0x2f0   :  { %v6953_v2 = vcombine.high %v2259_v54, %v2263_v56 }
 0x2f1   :  { %5506 = vmatpush2.bf16.msra.mxu1 %v7134_v63 }
 0x2f2   :  { %5547 = vmatpush2.bf16.msra.mxu0 %v6752_v59  ;;  %5507 = vmatprep.subr.bf16.mxu1 %v7127_v0  ;;  %v6960_v59 = vcombine.low %v2267_v45, %v2271_v47  ;;  %v6825_v0 = vcombine.high %v2131_v51, %v2135_v52  ;;  %v2095_v45 = vld [vmem:[#allocation7 + $0x438] sm:$0xff] }
 0x2f3   :  { %5548 = vmatprep.subr.bf16.mxu0 %v6745_v1  ;;  %v2219_v47 = vld [vmem:[#allocation7 + $0x818] sm:$0xff] }
 0x2f5   :  { %5508 = vmatpush2.bf16.msra.mxu1 %v7126_v6  ;;  %v2251_v6 = vld [vmem:[#allocation7 + $0x918] sm:$0xff] }
 0x2f6   :  { %5549 = vmatpush2.bf16.msra.mxu0 %v6744_v7  ;;  %5509 = vmatprep.subr.bf16.mxu1 %v7119_v8  ;;  %v6824_v8 = vcombine.low %v2131_v51, %v2135_v52 }
 0x2f7   :  { %5550 = vmatprep.subr.bf16.mxu0 %v6737_v9 }
 0x2f9   :  { %5510 = vmatpush2.bf16.msra.mxu1 %v7118_v21  ;;  %v2243_v21 = vld [vmem:[#allocation7 + $0x8d8] sm:$0xff] }
 0x2fa   :  { %5551 = vmatpush2.bf16.msra.mxu0 %v6736_v12  ;;  %5511 = vmatprep.subr.bf16.mxu1 %v7111_v13  ;;  %v2247_v12 = vld [vmem:[#allocation7 + $0x8f8] sm:$0xff] }
 0x2fb   :  { %5552 = vmatprep.subr.bf16.mxu0 %v6729_v14  ;;  %v6937_v23 = vcombine.high %v2243_v21, %v2247_v12 }
 0x2fd   :  { %5512 = vmatpush2.bf16.msra.mxu1 %v7110_v29  ;;  %v2235_v29 = vld [vmem:[#allocation7 + $0x898] sm:$0xff] }
 0x2fe   :  { %5553 = vmatpush2.bf16.msra.mxu0 %v6728_v31  ;;  %5513 = vmatprep.subr.bf16.mxu1 %v7103_v32  ;;  %v2239_v31 = vld [vmem:[#allocation7 + $0x8b8] sm:$0xff]  ;;  %v6808_v32 = vcombine.low %v2115_v11, %v2119_v20 }
 0x2ff   :  { %5554 = vmatprep.subr.bf16.mxu0 %v6721_v57  ;;  %v6936_v57 = vcombine.low %v2243_v21, %v2247_v12  ;;  %v6929_v37 = vcombine.high %v2235_v29, %v2239_v31  ;;  %v2187_v11 = vld [vmem:[#allocation7 + $0x718] sm:$0xff] }
 0x300   :  { %v2191_v20 = vld [vmem:[#allocation7 + $0x738] sm:$0xff] }
 0x301   :  { %5514 = vmatpush2.bf16.msra.mxu1 %v7102_v40  ;;  %v2227_v40 = vld [vmem:[#allocation7 + $0x858] sm:$0xff] }
 0x302   :  { %5555 = vmatpush2.bf16.msra.mxu0 %v6720_v41  ;;  %5565 = vmatprep.subr.bf16.mxu1 %v6841_v42  ;;  %v2231_v41 = vld [vmem:[#allocation7 + $0x878] sm:$0xff]  ;;  %v6800_v42 = vcombine.low %v2107_v25, %v2111_v26 }
 0x303   :  { %5606 = vmatprep.subr.bf16.mxu0 %v6969_v43  ;;  %v6928_v43 = vcombine.low %v2235_v29, %v2239_v31  ;;  %v6921_v19 = vcombine.high %v2227_v40, %v2231_v41  ;;  %v6920_v51 = vcombine.low %v2227_v40, %v2231_v41  ;;  %v2315_v21 = vld [vmem:[#allocation7 + $0xb18] sm:$0xff] }
 0x304   :  { %v5271_v46 = vpop.f32.mrf.mxu1  ;;  %v5312_v49 = vpop.f32.mrf.mxu0  ;;  %5516 = vmatmul.mubr.bf16.vlgmr.msra.gmra.mxu1 %v7608_v62  ;;  %v2319_v12 = vld [vmem:[#allocation7 + $0xb38] sm:$0xff] }
 0x305   :  { %v5272_v60 = vadd.f32 %v5271_v46, %v7636_v28  ;;  %5557 = vmatmul.mubr.bf16.vlgmr.msra.gmra.mxu0 %v7580_v55  ;;  %5566 = vmatpush1.bf16.msra.mxu1 %v6840_v44  ;;  %v2123_v28 = vld [vmem:[#allocation7 + $0x518] sm:$0xff] }
 0x306   :  { %5597 = vmatprep.mubr.bf16.mxu1 %v7583_v17  ;;  %5607 = vmatpush1.bf16.msra.mxu0 %v6968_v48  ;;  %v5273_v58 = vpop.f32.mrf.mxu1  ;;  %v5314_v63 = vpop.f32.mrf.mxu0  ;;  %v2255_v17 = vld [vmem:[#allocation7 + $0x938] sm:$0xff]  ;;  %v6817_v34 = vcombine.high %v2123_v28, %v2127_v3  ;;  %v6816_v13 = vcombine.low %v2123_v28, %v2127_v3 }
 0x307   :  { %v7654_v1 = vadd.f32 %v5312_v49, %v5272_v60  ;;  %5638 = vmatprep.mubr.bf16.mxu0 %v7599_v33  ;;  %v5274_v27 = vadd.f32 %v5273_v58, %v7644_v24  ;;  %5567 = vmatprep.subr.bf16.mxu1 %v6833_v50  ;;  %v6952_v33 = vcombine.low %v2259_v54, %v2263_v56  ;;  %v2091_v44 = vld [vmem:[#allocation7 + $0x418] sm:$0xff] }
 0x308   :  { %v5275_v55 = vpop.f32.mrf.mxu1  ;;  %v5316_v4 = vpop.f32.mrf.mxu0  ;;  %5608 = vmatprep.subr.bf16.mxu0 %v6961_v53  ;;  %v6945_v24 = vcombine.high %v2251_v6, %v2255_v17  ;;  %v6944_v14 = vcombine.low %v2251_v6, %v2255_v17  ;;  %v2223_v48 = vld [vmem:[#allocation7 + $0x838] sm:$0xff]  ;;  %v6792_v50 = vcombine.low %v2099_v38, %v2103_v39  ;;  %v6785_v52 = vcombine.high %v2091_v44, %v2095_v45 }
 0x309   :  { %v7658_v7 = vadd.f32 %v5314_v63, %v5274_v27  ;;  %5568 = vmatpush1.bf16.msra.mxu1 %v6832_v61  ;;  %v6913_v46 = vcombine.high %v2219_v47, %v2223_v48  ;;  %v2211_v49 = vld [vmem:[#allocation7 + $0x7d8] sm:$0xff]  ;;  %v6784_v60 = vcombine.low %v2091_v44, %v2095_v45  ;;  %v6912_v61 = vcombine.low %v2219_v47, %v2223_v48 }
 0x30a   :  { %5609 = vmatpush1.bf16.msra.mxu0 %v6960_v59  ;;  %v5276_v9 = vpop.f32.mrf.mxu1  ;;  %v5317_v10 = vpop.f32.mrf.mxu0  ;;  %5569 = vmatprep.subr.bf16.mxu1 %v6825_v0  ;;  %v2215_v53 = vld [vmem:[#allocation7 + $0x7f8] sm:$0xff] }
 0x30b   :  { %5610 = vmatprep.subr.bf16.mxu0 %v6953_v2  ;;  %v2339_v54 = vld [vmem:[#allocation7 + $0xbd8] sm:$0xff]  ;;  %v6905_v58 = vcombine.high %v2211_v49, %v2215_v53  ;;  %v6904_v28 = vcombine.low %v2211_v49, %v2215_v53 }
 0x30c   :  { %v2343_v56 = vld [vmem:[#allocation7 + $0xbf8] sm:$0xff] }
 0x30d   :  { %5570 = vmatpush1.bf16.msra.mxu1 %v6824_v8  ;;  %v7033_v63 = vcombine.high %v2339_v54, %v2343_v56  ;;  %v2203_v59 = vld [vmem:[#allocation7 + $0x798] sm:$0xff]  ;;  %v7032_v3 = vcombine.low %v2339_v54, %v2343_v56 }
 0x30e   :  { %5611 = vmatpush1.bf16.msra.mxu0 %v6952_v33  ;;  %5571 = vmatprep.subr.bf16.mxu1 %v6817_v34  ;;  %v2207_v0 = vld [vmem:[#allocation7 + $0x7b8] sm:$0xff] }
 0x30f   :  { %5612 = vmatprep.subr.bf16.mxu0 %v6945_v24  ;;  %v2331_v27 = vld [vmem:[#allocation7 + $0xb98] sm:$0xff]  ;;  %v6897_v55 = vcombine.high %v2203_v59, %v2207_v0  ;;  %v6896_v10 = vcombine.low %v2203_v59, %v2207_v0 }
 0x310   :  { %v2335_v2 = vld [vmem:[#allocation7 + $0xbb8] sm:$0xff] }
 0x311   :  { %5572 = vmatpush1.bf16.msra.mxu1 %v6816_v13  ;;  %v7025_v4 = vcombine.high %v2331_v27, %v2335_v2  ;;  %v2195_v6 = vld [vmem:[#allocation7 + $0x758] sm:$0xff]  ;;  %v7024_v33 = vcombine.low %v2331_v27, %v2335_v2 }
 0x312   :  { %5613 = vmatpush1.bf16.msra.mxu0 %v6944_v14  ;;  %5573 = vmatprep.subr.bf16.mxu1 %v6809_v15  ;;  %v2199_v17 = vld [vmem:[#allocation7 + $0x778] sm:$0xff]  ;;  %v6881_v15 = vcombine.high %v2187_v11, %v2191_v20 }
 0x313   :  { %5614 = vmatprep.subr.bf16.mxu0 %v6937_v23  ;;  %v2323_v8 = vld [vmem:[#allocation7 + $0xb58] sm:$0xff]  ;;  %v6889_v34 = vcombine.high %v2195_v6, %v2199_v17  ;;  %v6888_v13 = vcombine.low %v2195_v6, %v2199_v17  ;;  %v7009_v23 = vcombine.high %v2315_v21, %v2319_v12  ;;  %v5689_v6 = vmax.f32 %v7648_v30, 0.0 }
 0x314   :  { %v2327_v9 = vld [vmem:[#allocation7 + $0xb78] sm:$0xff] }
 0x315   :  { %5574 = vmatpush1.bf16.msra.mxu1 %v6808_v32  ;;  %v7017_v24 = vcombine.high %v2323_v8, %v2327_v9  ;;  %v7016_v14 = vcombine.low %v2323_v8, %v2327_v9  ;;  %v2179_v25 = vld [vmem:[#allocation7 + $0x6d8] sm:$0xff]  ;;  %v6880_v32 = vcombine.low %v2187_v11, %v2191_v20  ;;  %v5697_v11 = vpack.c.bf16 %v5689_v6, %v5689_v6 }
 0x316   :  { %5615 = vmatpush1.bf16.msra.mxu0 %v6936_v57  ;;  %5575 = vmatprep.subr.bf16.mxu1 %v6801_v36  ;;  %v2183_v26 = vld [vmem:[#allocation7 + $0x6f8] sm:$0xff]  ;;  %v7008_v57 = vcombine.low %v2315_v21, %v2319_v12 }
 0x317   :  { %5616 = vmatprep.subr.bf16.mxu0 %v6929_v37  ;;  %v2307_v29 = vld [vmem:[#allocation7 + $0xad8] sm:$0xff]  ;;  %v6873_v36 = vcombine.high %v2179_v25, %v2183_v26 }
 0x318   :  { %v2311_v31 = vld [vmem:[#allocation7 + $0xaf8] sm:$0xff] }
 0x319   :  { %5576 = vmatpush1.bf16.msra.mxu1 %v6800_v42  ;;  %v7001_v37 = vcombine.high %v2307_v29, %v2311_v31  ;;  %v2171_v38 = vld [vmem:[#allocation7 + $0x698] sm:$0xff]  ;;  %v6872_v42 = vcombine.low %v2179_v25, %v2183_v26 }
 0x31a   :  { %5617 = vmatpush1.bf16.msra.mxu0 %v6928_v43  ;;  %5577 = vmatprep.subr.bf16.mxu1 %v6793_v5  ;;  %v2175_v39 = vld [vmem:[#allocation7 + $0x6b8] sm:$0xff]  ;;  %v7000_v43 = vcombine.low %v2307_v29, %v2311_v31 }
 0x31b   :  { %5618 = vmatprep.subr.bf16.mxu0 %v6921_v19  ;;  %v2299_v40 = vld [vmem:[#allocation7 + $0xa98] sm:$0xff]  ;;  %v6865_v5 = vcombine.high %v2171_v38, %v2175_v39 }
 0x31c   :  { %v2303_v41 = vld [vmem:[#allocation7 + $0xab8] sm:$0xff] }
 0x31d   :  { %5578 = vmatpush1.bf16.msra.mxu1 %v6792_v50  ;;  %v6993_v19 = vcombine.high %v2299_v40, %v2303_v41  ;;  %v2163_v44 = vld [vmem:[#allocation7 + $0x658] sm:$0xff]  ;;  %v6864_v50 = vcombine.low %v2171_v38, %v2175_v39  ;;  %v7330_v39 = vld [vmem:[#allocation8 + $0x20] sm:$0xff]  }
 0x31e   :  { %5619 = vmatpush1.bf16.msra.mxu0 %v6920_v51  ;;  %5579 = vmatprep.subr.bf16.mxu1 %v6785_v52  ;;  %v2167_v45 = vld [vmem:[#allocation7 + $0x678] sm:$0xff]  ;;  %v6992_v51 = vcombine.low %v2299_v40, %v2303_v41 }
 0x31f   :  { %5620 = vmatprep.subr.bf16.mxu0 %v6913_v46  ;;  %v2291_v47 = vld [vmem:[#allocation7 + $0xa58] sm:$0xff]  ;;  %v6857_v52 = vcombine.high %v2163_v44, %v2167_v45 }
 0x320   :  { %v2295_v48 = vld [vmem:[#allocation7 + $0xa78] sm:$0xff] }
 0x321   :  { %5580 = vmatpush1.bf16.msra.mxu1 %v6784_v60  ;;  %v6985_v46 = vcombine.high %v2291_v47, %v2295_v48  ;;  %v2155_v49 = vld [vmem:[#allocation7 + $0x618] sm:$0xff]  ;;  %v6856_v60 = vcombine.low %v2163_v44, %v2167_v45  ;;  %v7333_v45 = vld [vmem:[#allocation8 + $0x50] sm:$0xff]  }
 0x322   :  { %5621 = vmatpush1.bf16.msra.mxu0 %v6912_v61  ;;  %5581 = vmatprep.subr.bf16.mxu1 %v6905_v58  ;;  %v2159_v53 = vld [vmem:[#allocation7 + $0x638] sm:$0xff]  ;;  %v6984_v61 = vcombine.low %v2291_v47, %v2295_v48 }
 0x323   :  { %5622 = vmatprep.subr.bf16.mxu0 %v7033_v63  ;;  %v2283_v54 = vld [vmem:[#allocation7 + $0xa18] sm:$0xff]  ;;  %v6849_v58 = vcombine.high %v2155_v49, %v2159_v53  ;;  %v6848_v27 = vcombine.low %v2155_v49, %v2159_v53 }
 0x324   :  { %v2287_v56 = vld [vmem:[#allocation7 + $0xa38] sm:$0xff] }
 0x325   :  { %5582 = vmatpush2.bf16.msra.mxu1 %v6904_v28  ;;  %v6977_v63 = vcombine.high %v2283_v54, %v2287_v56  ;;  %v2403_v59 = vld [vmem:[#allocation7 + $0xdd8] sm:$0xff]  ;;  %v6976_v2 = vcombine.low %v2283_v54, %v2287_v56  ;;  %v7336_v56 = vld [vmem:[#allocation8 + $0x8] sm:$0xff]  }
 0x326   :  { %5623 = vmatpush2.bf16.msra.mxu0 %v7032_v3  ;;  %5583 = vmatprep.subr.bf16.mxu1 %v6897_v55  ;;  %v2407_v0 = vld [vmem:[#allocation7 + $0xdf8] sm:$0xff] }
 0x327   :  { %5624 = vmatprep.subr.bf16.mxu0 %v7025_v4  ;;  %v7097_v28 = vcombine.high %v2403_v59, %v2407_v0  ;;  %v7323_v3 = vld [vmem:[#allocation8 + $0x78] sm:$0xff]   ;;  %v7096_v17 = vcombine.low %v2403_v59, %v2407_v0  ;;  %v7338_v0 = vld [vmem:[#allocation8] sm:$0xff]  }
 0x328   :  { %v2395_v55 = vld [vmem:[#allocation7 + $0xd98] sm:$0xff] }
 0x329   :  { %5584 = vmatpush2.bf16.msra.mxu1 %v6896_v10  ;;  %v2399_v4 = vld [vmem:[#allocation7 + $0xdb8] sm:$0xff] }
 0x32a   :  { %5625 = vmatpush2.bf16.msra.mxu0 %v7024_v33  ;;  %5585 = vmatprep.subr.bf16.mxu1 %v6889_v34  ;;  %v7324_v8 = vld [vmem:[#allocation8 + $0x38] sm:$0xff]   ;;  %v7089_v9 = vcombine.high %v2395_v55, %v2399_v4  ;;  %v7088_v30 = vcombine.low %v2395_v55, %v2399_v4 }
 0x32b   :  { %5626 = vmatprep.subr.bf16.mxu0 %v7017_v24  ;;  %v2387_v10 = vld [vmem:[#allocation7 + $0xd58] sm:$0xff]  ;;  %v7325_v24 = vld [vmem:[#allocation8 + $0x70] sm:$0xff]  }
 0x32c   :  { %v2391_v33 = vld [vmem:[#allocation7 + $0xd78] sm:$0xff] }
 0x32d   :  { %5586 = vmatpush2.bf16.msra.mxu1 %v6888_v13  ;;  %v7326_v13 = vld [vmem:[#allocation8 + $0x30] sm:$0xff]   ;;  %v7331_v41 = vld [vmem:[#allocation8 + $0x58] sm:$0xff]  }
 0x32e   :  { %5627 = vmatpush2.bf16.msra.mxu0 %v7016_v14  ;;  %5587 = vmatprep.subr.bf16.mxu1 %v6881_v15  ;;  %v7081_v14 = vcombine.high %v2387_v10, %v2391_v33  ;;  %v7327_v15 = vld [vmem:[#allocation8 + $0x68] sm:$0xff]   ;;  %v2355_v47 = vld [vmem:[#allocation7 + $0xc58] sm:$0xff] }
 0x32f   :  { %5628 = vmatprep.subr.bf16.mxu0 %v7009_v23  ;;  %v2383_v23 = vld [vmem:[#allocation7 + $0xd38] sm:$0xff] }
 0x330   :  { %v2359_v48 = vld [vmem:[#allocation7 + $0xc78] sm:$0xff] }
 0x331   :  { %5588 = vmatpush2.bf16.msra.mxu1 %v6880_v32  ;;  %v2347_v49 = vld [vmem:[#allocation7 + $0xc18] sm:$0xff]  ;;  %v7048_v54 = vcombine.low %v2355_v47, %v2359_v48 }
 0x332   :  { %5629 = vmatpush2.bf16.msra.mxu0 %v7008_v57  ;;  %5589 = vmatprep.subr.bf16.mxu1 %v6873_v36  ;;  %v7329_v57 = vld [vmem:[#allocation8 + $0x60] sm:$0xff]   ;;  %v2371_v36 = vld [vmem:[#allocation7 + $0xcd8] sm:$0xff] }
 0x333   :  { %5630 = vmatprep.subr.bf16.mxu0 %v7001_v37  ;;  %v2375_v37 = vld [vmem:[#allocation7 + $0xcf8] sm:$0xff] }
 0x334   :  { %v7065_v40 = vcombine.high %v2371_v36, %v2375_v37  ;;  %v2351_v53 = vld [vmem:[#allocation7 + $0xc38] sm:$0xff] }
 0x335   :  { %5590 = vmatpush2.bf16.msra.mxu1 %v6872_v42  ;;  %v2363_v42 = vld [vmem:[#allocation7 + $0xc98] sm:$0xff]  ;;  %v7040_v59 = vcombine.low %v2347_v49, %v2351_v53 }
 0x336   :  { %5631 = vmatpush2.bf16.msra.mxu0 %v7000_v43  ;;  %5591 = vmatprep.subr.bf16.mxu1 %v6865_v5  ;;  %v2367_v43 = vld [vmem:[#allocation7 + $0xcb8] sm:$0xff]  ;;  %v7064_v5 = vcombine.low %v2371_v36, %v2375_v37 }
 0x337   :  { %5632 = vmatprep.subr.bf16.mxu0 %v6993_v19  ;;  %v7332_v19 = vld [vmem:[#allocation8 + $0x18] sm:$0xff]   ;;  %v7057_v44 = vcombine.high %v2363_v42, %v2367_v43 }
 0x338   :  { %v7355_v55 = vld [vmem:[#allocation8 + $0x178] sm:$0xff]  }
 0x339   :  { %5592 = vmatpush2.bf16.msra.mxu1 %v6864_v50  ;;  %v7056_v50 = vcombine.low %v2363_v42, %v2367_v43 }
 0x33a   :  { %5633 = vmatpush2.bf16.msra.mxu0 %v6992_v51  ;;  %5593 = vmatprep.subr.bf16.mxu1 %v6857_v52  ;;  %v7334_v51 = vld [vmem:[#allocation8 + $0x10] sm:$0xff]   ;;  %v7049_v52 = vcombine.high %v2355_v47, %v2359_v48 }
 0x33b   :  { %5634 = vmatprep.subr.bf16.mxu0 %v6985_v46  ;;  %v7335_v46 = vld [vmem:[#allocation8 + $0x48] sm:$0xff]  }
 0x33d   :  { %5594 = vmatpush2.bf16.msra.mxu1 %v6856_v60  ;;  %v7041_v60 = vcombine.high %v2347_v49, %v2351_v53  ;;  %v7339_v49 = vld [vmem:[#allocation8 + $0xf8] sm:$0xff]   ;;  %v7370_v53 = vld [vmem:[#allocation8 + $0x100] sm:$0xff]  }
 0x33e   :  { %5635 = vmatpush2.bf16.msra.mxu0 %v6984_v61  ;;  %5595 = vmatprep.subr.bf16.mxu1 %v6849_v58  ;;  %v7337_v61 = vld [vmem:[#allocation8 + $0x40] sm:$0xff]   ;;  %v2467_v58 = vld [vmem:[#allocation7 + $0xfd8] sm:$0xff] }
 0x33f   :  { %5636 = vmatprep.subr.bf16.mxu0 %v6977_v63  ;;  %v2471_v63 = vld [vmem:[#allocation7 + $0xff8] sm:$0xff] }
 0x340   :  { %v7160_v4 = vcombine.low %v2467_v58, %v2471_v63 }
 0x341   :  { %5596 = vmatpush2.bf16.msra.mxu1 %v6848_v27  ;;  %v7161_v27 = vcombine.high %v2467_v58, %v2471_v63  ;;  %v7342_v63 = vld [vmem:[#allocation8 + $0xb0] sm:$0xff]  }
 0x342   :  { %5637 = vmatpush2.bf16.msra.mxu0 %v6976_v2  ;;  %5647 = vmatprep.subr.bf16.mxu1 %v7097_v28  ;;  %v5688_v2 = vmax.f32 %v7641_v18, 0.0  ;;  %v2459_v28 = vld [vmem:[#allocation7 + $0xf98] sm:$0xff] }
 0x343   :  { %7226 = vmatprep.subr.bf16.mxu0 %v7323_v3  ;;  %v2463_v3 = vld [vmem:[#allocation7 + $0xfb8] sm:$0xff] }
 0x344   :  { %v5353_v34 = vpop.f32.mrf.mxu1  ;;  %5598 = vmatmul.mubr.bf16.vlgmr.msra.gmra.mxu1 %v7591_v22  ;;  %v7153_v6 = vcombine.high %v2459_v28, %v2463_v3 }
 0x345   :  { %v7663_v20 = vadd.f32 %v5353_v34, %v7654_v1  ;;  %v7665_v21 = vpop.f32.mrf.mxu0  ;;  %5639 = vmatmul.mubr.bf16.vlgmr.msra.gmra.mxu0 %v7601_v35  ;;  %5648 = vmatpush1.bf16.msra.mxu1 %v7096_v17  ;;  %v2379_v1 = vld [vmem:[#allocation7 + $0xd18] sm:$0xff]  ;;  %v7080_v35 = vcombine.low %v2387_v10, %v2391_v33  ;;  %v7357_v33 = vld [vmem:[#allocation8 + $0x170] sm:$0xff]   ;;  %v7152_v34 = vcombine.low %v2459_v28, %v2463_v3 }
 0x346   :  { %5679 = vmatprep.mubr.bf16.mxu1 %v7606_v16  ;;  %7227 = vmatpush3.bf16.msra.mxu0 %v7324_v8  ;;  %v7669_v12 = vpop.f32.mrf.mxu1  ;;  %v7328_v16 = vld [vmem:[#allocation8 + $0x28] sm:$0xff]   ;;  %v7073_v31 = vcombine.high %v2379_v1, %v2383_v23  ;;  %v7072_v38 = vcombine.low %v2379_v1, %v2383_v23  ;;  %v7356_v17 = vld [vmem:[#allocation8 + $0x138] sm:$0xff]   ;;  %v5696_v8 = vpack.c.bf16 %v5688_v2, %v5688_v2 }
 0x347   :  { %6248 = vmatprep.mubr.bf16.mxu0 %v5697_v11  ;;  %v7671_v22 = vpop.f32.mrf.mxu0  ;;  %5649 = vmatprep.subr.bf16.mxu1 %v7089_v9  ;;  %v2451_v9 = vld [vmem:[#allocation7 + $0xf58] sm:$0xff]  ;;  %v7360_v1 = vld [vmem:[#allocation8 + $0x128] sm:$0xff]  }
 0x348   :  { %v5357_v25 = vpop.f32.mrf.mxu1  ;;  %7228 = vmatprep.subr.bf16.mxu0 %v7325_v24  ;;  %v2455_v10 = vld [vmem:[#allocation7 + $0xf78] sm:$0xff]  ;;  %v7358_v24 = vld [vmem:[#allocation8 + $0x130] sm:$0xff]  }
 0x349   :  { %v5398_v26 = vpop.f32.mrf.mxu0  ;;  %5650 = vmatpush1.bf16.msra.mxu1 %v7088_v30  ;;  %v7145_v18 = vcombine.high %v2451_v9, %v2455_v10  ;;  %v2443_v11 = vld [vmem:[#allocation7 + $0xf18] sm:$0xff] }
 0x34a   :  { %7229 = vmatpush3.bf16.msra.mxu0 %v7326_v13  ;;  %v5358_v29 = vpop.f32.mrf.mxu1  ;;  %5651 = vmatprep.subr.bf16.mxu1 %v7081_v14  ;;  %v2447_v30 = vld [vmem:[#allocation7 + $0xf38] sm:$0xff]  ;;  %v7359_v13 = vld [vmem:[#allocation8 + $0x168] sm:$0xff]   ;;  %v7144_v14 = vcombine.low %v2451_v9, %v2455_v10  ;;  %v7361_v26 = vld [vmem:[#allocation8 + $0x160] sm:$0xff]  }
 0x34b   :  { %v5399_v32 = vpop.f32.mrf.mxu0  ;;  %7230 = vmatprep.subr.bf16.mxu0 %v7327_v15  ;;  %v7137_v15 = vcombine.high %v2443_v11, %v2447_v30  ;;  %v2435_v23 = vld [vmem:[#allocation7 + $0xed8] sm:$0xff]  ;;  %v7349_v9 = vld [vmem:[#allocation8 + $0xd0] sm:$0xff]  }
 0x34c   :  { %v2439_v25 = vld [vmem:[#allocation7 + $0xef8] sm:$0xff]  ;;  %v7350_v10 = vld [vmem:[#allocation8 + $0x90] sm:$0xff]  }
 0x34d   :  { %5652 = vmatpush1.bf16.msra.mxu1 %v7080_v35  ;;  %v7136_v35 = vcombine.low %v2443_v11, %v2447_v30  ;;  %v7129_v29 = vcombine.high %v2435_v23, %v2439_v25  ;;  %v2431_v32 = vld [vmem:[#allocation7 + $0xeb8] sm:$0xff]  ;;  %v7128_v36 = vcombine.low %v2435_v23, %v2439_v25  ;;  %v5690_v11 = vmax.f32 %v7663_v20, 0.0  ;;  %v7375_v23 = vld [vmem:[#allocation8 + $0x1e8] sm:$0xff]  }
 0x34e   :  { %7231 = vmatpush3.bf16.msra.mxu0 %v7328_v16  ;;  %5653 = vmatprep.subr.bf16.mxu1 %v7073_v31  ;;  %v7362_v16 = vld [vmem:[#allocation8 + $0x120] sm:$0xff]   ;;  %v2427_v31 = vld [vmem:[#allocation7 + $0xe98] sm:$0xff]  ;;  %v7376_v25 = vld [vmem:[#allocation8 + $0x1a8] sm:$0xff]  }
 0x34f   :  { %7232 = vmatprep.subr.bf16.mxu0 %v7329_v57  ;;  %v7363_v57 = vld [vmem:[#allocation8 + $0x158] sm:$0xff]   ;;  %v7121_v37 = vcombine.high %v2427_v31, %v2431_v32  ;;  %v7120_v42 = vcombine.low %v2427_v31, %v2431_v32  ;;  %v5698_v30 = vpack.c.bf16 %v5690_v11, %v5690_v11  ;;  %v7382_v31 = vld [vmem:[#allocation8 + $0x190] sm:$0xff]  }
 0x350   :  { %v7379_v20 = vld [vmem:[#allocation8 + $0x1d8] sm:$0xff]  }
 0x351   :  { %5654 = vmatpush1.bf16.msra.mxu1 %v7072_v38  ;;  %v7364_v38 = vld [vmem:[#allocation8 + $0x118] sm:$0xff]  }
 0x352   :  { %7233 = vmatpush3.bf16.msra.mxu0 %v7330_v39  ;;  %5655 = vmatprep.subr.bf16.mxu1 %v7065_v40  ;;  %v2419_v39 = vld [vmem:[#allocation7 + $0xe58] sm:$0xff] }
 0x353   :  { %7234 = vmatprep.subr.bf16.mxu0 %v7331_v41  ;;  %v2423_v40 = vld [vmem:[#allocation7 + $0xe78] sm:$0xff]  ;;  %v7365_v41 = vld [vmem:[#allocation8 + $0x150] sm:$0xff]  }
 0x354   :  { %v7113_v43 = vcombine.high %v2419_v39, %v2423_v40  ;;  %v7112_v47 = vcombine.low %v2419_v39, %v2423_v40  ;;  %v7383_v40 = vld [vmem:[#allocation8 + $0x1c8] sm:$0xff]  }
 0x355   :  { %5656 = vmatpush1.bf16.msra.mxu1 %v7064_v5  ;;  %v7366_v5 = vld [vmem:[#allocation8 + $0x110] sm:$0xff]  }
 0x356   :  { %7235 = vmatpush3.bf16.msra.mxu0 %v7332_v19  ;;  %5657 = vmatprep.subr.bf16.mxu1 %v7057_v44  ;;  %v2411_v19 = vld [vmem:[#allocation7 + $0xe18] sm:$0xff] }
 0x357   :  { %7236 = vmatprep.subr.bf16.mxu0 %v7333_v45  ;;  %v2415_v44 = vld [vmem:[#allocation7 + $0xe38] sm:$0xff]  ;;  %v7367_v45 = vld [vmem:[#allocation8 + $0x148] sm:$0xff]  }
 0x358   :  { %v7105_v48 = vcombine.high %v2411_v19, %v2415_v44 }
 0x359   :  { %5658 = vmatpush1.bf16.msra.mxu1 %v7056_v50  ;;  %v7368_v50 = vld [vmem:[#allocation8 + $0x108] sm:$0xff]  }
 0x35a   :  { %7237 = vmatpush3.bf16.msra.mxu0 %v7334_v51  ;;  %5659 = vmatprep.subr.bf16.mxu1 %v7049_v52  ;;  %v5356_v51 = vadd.f32 %v7669_v12, %v7658_v7  ;;  %v7369_v52 = vld [vmem:[#allocation8 + $0x140] sm:$0xff]  }
 0x35b   :  { %7238 = vmatprep.subr.bf16.mxu0 %v7335_v46  ;;  %v7104_v46 = vcombine.low %v2411_v19, %v2415_v44 }
 0x35d   :  { %5660 = vmatpush1.bf16.msra.mxu1 %v7048_v54  ;;  %v5691_v54 = vmax.f32 %v5356_v51, 0.0  ;;  %v7386_v51 = vld [vmem:[#allocation8 + $0x180] sm:$0xff]  }
 0x35e   :  { %7239 = vmatpush3.bf16.msra.mxu0 %v7336_v56  ;;  %5661 = vmatprep.subr.bf16.mxu1 %v7041_v60  ;;  %v7340_v56 = vld [vmem:[#allocation8 + $0xb8] sm:$0xff]   ;;  %v7341_v60 = vld [vmem:[#allocation8 + $0xf0] sm:$0xff]  }
 0x35f   :  { %7240 = vmatprep.subr.bf16.mxu0 %v7337_v61  ;;  %v5699_v61 = vpack.c.bf16 %v5691_v54, %v5691_v54 }
 0x361   :  { %5662 = vmatpush1.bf16.msra.mxu1 %v7040_v59 }
 0x362   :  { %7241 = vmatpush3.bf16.msra.mxu0 %v7338_v0  ;;  %5663 = vmatprep.subr.bf16.mxu1 %v7161_v27  ;;  %v7343_v0 = vld [vmem:[#allocation8 + $0xe8] sm:$0xff]  }
 0x363   :  { %7270 = vmatprep.subr.bf16.mxu0 %v7355_v55  ;;  %v7344_v55 = vld [vmem:[#allocation8 + $0xa8] sm:$0xff]  }
 0x365   :  { %6249 = vmatmul.mubr.bf16.vlgmr.msra.gmra.mxu0 %v5696_v8  ;;  %5664 = vmatpush2.bf16.msra.mxu1 %v7160_v4  ;;  %v7348_v8 = vld [vmem:[#allocation8 + $0x98] sm:$0xff]  }
 0x366   :  { %5665 = vmatprep.subr.bf16.mxu1 %v7153_v6  ;;  %7271 = vmatpush3.bf16.msra.mxu0 %v7356_v17  ;;  %v7345_v6 = vld [vmem:[#allocation8 + $0xe0] sm:$0xff]  }
 0x367   :  { %7272 = vmatprep.subr.bf16.mxu0 %v7357_v33  ;;  %v7351_v33 = vld [vmem:[#allocation8 + $0xc8] sm:$0xff]  }
 0x369   :  { %5666 = vmatpush2.bf16.msra.mxu1 %v7152_v34  ;;  %v7352_v34 = vld [vmem:[#allocation8 + $0x88] sm:$0xff]  }
 0x36a   :  { %5667 = vmatprep.subr.bf16.mxu1 %v7145_v18  ;;  %7273 = vmatpush3.bf16.msra.mxu0 %v7358_v24  ;;  %v7353_v18 = vld [vmem:[#allocation8 + $0xc0] sm:$0xff]  }
 0x36b   :  { %7274 = vmatprep.subr.bf16.mxu0 %v7359_v13  ;;  %v7354_v24 = vld [vmem:[#allocation8 + $0x80] sm:$0xff]   ;;  %v7371_v13 = vld [vmem:[#allocation8 + $0x1f8] sm:$0xff]  }
 0x36d   :  { %5668 = vmatpush2.bf16.msra.mxu1 %v7144_v14  ;;  %v7372_v14 = vld [vmem:[#allocation8 + $0x1b8] sm:$0xff]  }
 0x36e   :  { %5669 = vmatprep.subr.bf16.mxu1 %v7137_v15  ;;  %7275 = vmatpush3.bf16.msra.mxu0 %v7360_v1  ;;  %v7373_v15 = vld [vmem:[#allocation8 + $0x1f0] sm:$0xff]  }
 0x36f   :  { %7276 = vmatprep.subr.bf16.mxu0 %v7361_v26  ;;  %v7374_v1 = vld [vmem:[#allocation8 + $0x1b0] sm:$0xff]   ;;  %v7377_v26 = vld [vmem:[#allocation8 + $0x1e0] sm:$0xff]  }
 0x371   :  { %5670 = vmatpush2.bf16.msra.mxu1 %v7136_v35  ;;  %v7378_v35 = vld [vmem:[#allocation8 + $0x1a0] sm:$0xff]  }
 0x372   :  { %5671 = vmatprep.subr.bf16.mxu1 %v7129_v29  ;;  %7277 = vmatpush3.bf16.msra.mxu0 %v7362_v16  ;;  %v7380_v29 = vld [vmem:[#allocation8 + $0x198] sm:$0xff]   ;;  %v7381_v16 = vld [vmem:[#allocation8 + $0x1d0] sm:$0xff]  }
 0x373   :  { %7278 = vmatprep.subr.bf16.mxu0 %v7363_v57 }
 0x375   :  { %5672 = vmatpush2.bf16.msra.mxu1 %v7128_v36 }
 0x376   :  { %5673 = vmatprep.subr.bf16.mxu1 %v7121_v37  ;;  %7279 = vmatpush3.bf16.msra.mxu0 %v7364_v38 }
 0x377   :  { %7280 = vmatprep.subr.bf16.mxu0 %v7365_v41 }
 0x379   :  { %5674 = vmatpush2.bf16.msra.mxu1 %v7120_v42 }
 0x37a   :  { %5675 = vmatprep.subr.bf16.mxu1 %v7113_v43  ;;  %7281 = vmatpush3.bf16.msra.mxu0 %v7366_v5  ;;  %v7384_v43 = vld [vmem:[#allocation8 + $0x188] sm:$0xff]  }
 0x37b   :  { %7282 = vmatprep.subr.bf16.mxu0 %v7367_v45 }
 0x37d   :  { %5676 = vmatpush2.bf16.msra.mxu1 %v7112_v47 }
 0x37e   :  { %5677 = vmatprep.subr.bf16.mxu1 %v7105_v48  ;;  %7283 = vmatpush3.bf16.msra.mxu0 %v7368_v50  ;;  %v7385_v48 = vld [vmem:[#allocation8 + $0x1c0] sm:$0xff]  }
 0x37f   :  { %7284 = vmatprep.subr.bf16.mxu0 %v7369_v52 }
 0x381   :  { %5678 = vmatpush2.bf16.msra.mxu1 %v7104_v46 }
 0x382   :  { %7248 = vmatprep.subr.bf16.mxu1 %v7339_v49  ;;  %7285 = vmatpush3.bf16.msra.mxu0 %v7370_v53 }
 0x384   :  { %v5435_v58 = vpop.f32.mrf.mxu1  ;;  %5680 = vmatmul.mubr.bf16.vlgmr.msra.gmra.mxu1 %v7608_v62  ;;  %v7346_v62 = vld [vmem:[#allocation8 + $0xa0] sm:$0xff]  }
 0x385   :  { %v5436_v7 = vadd.f32 %v5435_v58, %v7665_v21  ;;  %v5476_v12 = vpop.f32.mrf.mxu0  ;;  %7249 = vmatpush3.bf16.msra.mxu1 %v7340_v56  ;;  %6288 = vmatprep.mubr.bf16.mxu1 %v5699_v61  ;;  %v7347_v21 = vld [vmem:[#allocation8 + $0xd8] sm:$0xff]  }
 0x386   :  { %v5437_v59 = vpop.f32.mrf.mxu1  ;;  %7250 = vmatprep.subr.bf16.mxu1 %v7341_v60 }
 0x387   :  { %v5477_v27 = vadd.f32 %v5476_v12, %v5436_v7  ;;  %v5478_v2 = vpop.f32.mrf.mxu0  ;;  %v5438_v32 = vadd.f32 %v5437_v59, %v7671_v22 }
 0x388   :  { %v5439_v28 = vpop.f32.mrf.mxu1 }
 0x389   :  { %v5480_v3 = vpop.f32.mrf.mxu0  ;;  %7251 = vmatpush3.bf16.msra.mxu1 %v7342_v63  ;;  %v5479_v36 = vadd.f32 %v5478_v2, %v5438_v32 }
 0x38a   :  { %v5440_v4 = vpop.f32.mrf.mxu1  ;;  %7252 = vmatprep.subr.bf16.mxu1 %v7343_v0 }
 0x38b   :  { %v5481_v17 = vpop.f32.mrf.mxu0 }
 0x38d   :  { %7253 = vmatpush3.bf16.msra.mxu1 %v7344_v55 }
 0x38e   :  { %7254 = vmatprep.subr.bf16.mxu1 %v7345_v6 }
 0x391   :  { %7255 = vmatpush3.bf16.msra.mxu1 %v7346_v62 }
 0x392   :  { %7256 = vmatprep.subr.bf16.mxu1 %v7347_v21 }
 0x395   :  { %7257 = vmatpush3.bf16.msra.mxu1 %v7348_v8 }
 0x396   :  { %7258 = vmatprep.subr.bf16.mxu1 %v7349_v9 }
 0x399   :  { %7259 = vmatpush3.bf16.msra.mxu1 %v7350_v10 }
 0x39a   :  { %7260 = vmatprep.subr.bf16.mxu1 %v7351_v33 }
 0x39d   :  { %7261 = vmatpush3.bf16.msra.mxu1 %v7352_v34 }
 0x39e   :  { %7262 = vmatprep.subr.bf16.mxu1 %v7353_v18 }
 0x3a1   :  { %7263 = vmatpush3.bf16.msra.mxu1 %v7354_v24 }
 0x3a2   :  { %7292 = vmatprep.subr.bf16.mxu1 %v7371_v13 }
 0x3a4   :  { %6289 = vmatmul.mubr.bf16.vlgmr.msra.gmra.mxu1 %v5698_v30 }
 0x3a5   :  { %7293 = vmatpush3.bf16.msra.mxu1 %v7372_v14 }
 0x3a6   :  { %7294 = vmatprep.subr.bf16.mxu1 %v7373_v15 }
 0x3a9   :  { %7295 = vmatpush3.bf16.msra.mxu1 %v7374_v1 }
 0x3aa   :  { %7296 = vmatprep.subr.bf16.mxu1 %v7375_v23 }
 0x3ad   :  { %7297 = vmatpush3.bf16.msra.mxu1 %v7376_v25 }
 0x3ae   :  { %7298 = vmatprep.subr.bf16.mxu1 %v7377_v26 }
 0x3b1   :  { %7299 = vmatpush3.bf16.msra.mxu1 %v7378_v35 }
 0x3b2   :  { %7300 = vmatprep.subr.bf16.mxu1 %v7379_v20 }
 0x3b5   :  { %7301 = vmatpush3.bf16.msra.mxu1 %v7380_v29 }
 0x3b6   :  { %7302 = vmatprep.subr.bf16.mxu1 %v7381_v16 }
 0x3b9   :  { %7303 = vmatpush3.bf16.msra.mxu1 %v7382_v31 }
 0x3ba   :  { %7304 = vmatprep.subr.bf16.mxu1 %v7383_v40 }
 0x3bd   :  { %7305 = vmatpush3.bf16.msra.mxu1 %v7384_v43 }
 0x3be   :  { %7306 = vmatprep.subr.bf16.mxu1 %v7385_v48 }
 0x3c1   :  { %7307 = vmatpush3.bf16.msra.mxu1 %v7386_v51 }
 0x3c4   :  { %v5517_v57 = vpop.f32.mrf.mxu1 }
 0x3c5   :  { %v5518_v37 = vadd.f32 %v5517_v57, %v5477_v27  ;;  %v5558_v38 = vpop.f32.mrf.mxu0 }
 0x3c6   :  { %v5519_v39 = vpop.f32.mrf.mxu1 }
 0x3c7   :  { %v5520_v41 = vadd.f32 %v5519_v39, %v5479_v36  ;;  %v5560_v42 = vpop.f32.mrf.mxu0  ;;  %v5692_v5 = vmax.f32 %v5518_v37, 0.0 }
 0x3c8   :  { %v5521_v19 = vpop.f32.mrf.mxu1 }
 0x3c9   :  { %v5693_v44 = vmax.f32 %v5520_v41, 0.0  ;;  %v5562_v45 = vpop.f32.mrf.mxu0  ;;  %v5700_v52 = vpack.c.bf16 %v5692_v5, %v5692_v5 }
 0x3ca   :  { %v5522_v47 = vpop.f32.mrf.mxu1 }
 0x3cb   :  { %v5701_v50 = vpack.c.bf16 %v5693_v44, %v5693_v44  ;;  %v5563_v22 = vpop.f32.mrf.mxu0 }
 0x3cd   :  { %6328 = vmatprep.mubr.bf16.mxu0 %v5701_v50 }
 0x3ce   :  { %6329 = vmatmul.mubr.bf16.vlgmr.msra.gmra.mxu0 %v5700_v52 }
 0x404   :  { %v5599_v46 = vpop.f32.mrf.mxu1 }
 0x405   :  { %v5600_v49 = vadd.f32 %v5599_v46, %v5558_v38  ;;  %v5640_v53 = vpop.f32.mrf.mxu0 }
 0x406   :  { %v5601_v54 = vpop.f32.mrf.mxu1 }
 0x407   :  { %v5641_v56 = vadd.f32 %v5640_v53, %v5600_v49  ;;  %v5642_v60 = vpop.f32.mrf.mxu0  ;;  %v5602_v28 = vadd.f32 %v5601_v54, %v5560_v42 }
 0x408   :  { %v5603_v61 = vpop.f32.mrf.mxu1 }
 0x409   :  { %v5644_v58 = vpop.f32.mrf.mxu0  ;;  %v5643_v55 = vadd.f32 %v5642_v60, %v5602_v28 }
 0x40a   :  { %v5604_v7 = vpop.f32.mrf.mxu1 }
 0x40b   :  { %v5645_v12 = vpop.f32.mrf.mxu0 }
 0x425   :  { %v7242_v63 = vpop.f32.mrf.mxu0 }
 0x427   :  { %v7243_v59 = vpop.f32.mrf.mxu0 }
 0x428   :  { %v7244_v0 = vadd.f32 %v7243_v59, %v7242_v63 }
 0x429   :  { %v7245_v27 = vpop.f32.mrf.mxu0 }
 0x42b   :  { %v7246_v2 = vpop.f32.mrf.mxu0 }
 0x444   :  { %v5681_v3 = vpop.f32.mrf.mxu1 }
 0x445   :  { %v5682_v4 = vadd.f32 %v5681_v3, %v5641_v56 }
 0x446   :  { %v5683_v6 = vpop.f32.mrf.mxu1 }
 0x447   :  { %v5684_v17 = vadd.f32 %v5683_v6, %v5643_v55  ;;  %v5694_v62 = vmax.f32 %v5682_v4, 0.0 }
 0x448   :  { %v5685_v21 = vpop.f32.mrf.mxu1 }
 0x449   :  { %v5695_v8 = vmax.f32 %v5684_v17, 0.0  ;;  %v5702_v33 = vpack.c.bf16 %v5694_v62, %v5694_v62 }
 0x44a   :  { %v5686_v9 = vpop.f32.mrf.mxu1 }
 0x44b   :  { %v5703_v10 = vpack.c.bf16 %v5695_v8, %v5695_v8 }
 0x44d   :  { %6368 = vmatprep.mubr.bf16.mxu1 %v5703_v10 }
 0x44e   :  { %6369 = vmatmul.mubr.bf16.vlgmr.msra.gmra.mxu1 %v5702_v33 }
 0x464   :  { %v7264_v34 = vpop.f32.mrf.mxu1 }
 0x466   :  { %v7265_v18 = vpop.f32.mrf.mxu1 }
 0x467   :  { %v7266_v24 = vadd.f32 %v7265_v18, %v7264_v34 }
 0x468   :  { %v7267_v11 = vpop.f32.mrf.mxu1 }
 0x469   :  { %v6291_v30 = vadd.f32 %v7266_v24, %v7244_v0 }
 0x46a   :  { %v7268_v13 = vpop.f32.mrf.mxu1 }
 0x48e   :  { %v7286_v14 = vpop.f32.mrf.mxu0 }
 0x490   :  { %v7287_v15 = vpop.f32.mrf.mxu0 }
 0x491   :  { %v7288_v1 = vadd.f32 %v7287_v15, %v7286_v14 }
 0x492   :  { %v7289_v23 = vpop.f32.mrf.mxu0 }
 0x493   :  { %v6331_v25 = vadd.f32 %v7288_v1, %v6291_v30 }
 0x494   :  { %v7290_v26 = vpop.f32.mrf.mxu0 }
 0x50e   :  { %v7308_v35 = vpop.f32.mrf.mxu1 }
 0x510   :  { %v7309_v20 = vpop.f32.mrf.mxu1 }
 0x511   :  { %v7310_v29 = vadd.f32 %v7309_v20, %v7308_v35 }
 0x512   :  { %v7311_v16 = vpop.f32.mrf.mxu1 }
 0x513   :  { %v6371_v31 = vadd.f32 %v7310_v29, %v6331_v25 }
 0x514   :  { %v7312_v32 = vpop.f32.mrf.mxu1 }
 0x515   :  { %6376 = vst [vmem:[#allocation10] sm:$0xff] %v6371_v31 }
 0x516   :  { %7478 = shalt.err (!%p7475_p10)
}
 0x517   :  { %6386 = dma.vmem_to_hbm [thread:$0]  %s6384_s3, 128, %s7687_s4, [#allocation4]  }
 0x518   :  { %7493 = dma.done.wait [#allocation4], 128  }
 0x519   :  { %7494 = vsyncadd [#allocation4], 4294967168 }
 0x51a   :  { %6390 = vsyncpa [#allocation3], 1 }
 0x51b   :  { %6391 = vsyncpa [#allocation6], 1 }
 0x51c   :  { %6392 = vsyncpa [#allocation9], 1 }
 0x51d   :  { %6393 = vsyncpa [#allocation4], 1 }

</bundles_post_ra>
